<compile_context>
chip_gen: v7x
topology: tpu7x:2x2x1
jax: 0.10.0
libtpu: 0.0.40
codegen_flags: <defaults>
</compile_context>

<pallas_src>
import functools
import math

import jax
import jax.numpy as jnp
from jax.experimental import pallas as pl
from jax.experimental.pallas import tpu as pltpu

_BN_EPS = 1e-5
_PARAM_COLS = 128        # lane width of the packed parameter slab
_FMA_MAX_TERMS = 6       # use VPU broadcast-FMA when nk*cin <= this, else one MXU dot

# (cin, cout, use_1x1_shortcut, stride) per residual block, as in ResNet_apt_fc
BLOCK_CFG = ((2, 2, False, 1), (2, 2, False, 1),
             (2, 4, True, 2), (4, 4, False, 1),
             (4, 8, True, 2), (8, 8, False, 1),
             (8, 16, True, 2), (16, 16, False, 1))


# --------------------------------------------------------------------- packing
def _build_layout(output_class):
    """Static row layout of the packed (rows, 128) parameter slab."""
    layout = {}
    off = 0

    def add(name, rows, cols):
        nonlocal off
        layout[name] = (off, rows, cols)
        off += rows

    add('stem_w', 3, 2); add('stem_b', 1, 2)
    add('stem_g', 1, 2); add('stem_be', 1, 2)
    for i, (cin, cout, use_1x1, _stride) in enumerate(BLOCK_CFG):
        add(f'b{i}_w1', 3 * cin, cout); add(f'b{i}_b1', 1, cout)
        add(f'b{i}_g1', 1, cout);       add(f'b{i}_be1', 1, cout)
        add(f'b{i}_w2', 3 * cout, cout); add(f'b{i}_b2', 1, cout)
        add(f'b{i}_g2', 1, cout);        add(f'b{i}_be2', 1, cout)
        if use_1x1:
            add(f'b{i}_w3', cin, cout); add(f'b{i}_b3', 1, cout)
    add('fc_w', 16, output_class); add('fc_b', 1, output_class)
    return layout, off


def init_params(key, output_class=5):
    """Build all ResNet_apt_fc parameters and pack them into ONE (rows, 128)
    f32 slab (row offsets = the static layout used inside the kernel)."""
    layout, total_rows = _build_layout(output_class)
    slab = jnp.zeros((total_rows, _PARAM_COLS), jnp.float32)

    def put(s, name, arr):
        off, r, c = layout[name]
        return s.at[off:off + r, 0:c].set(arr.astype(jnp.float32))

    def conv_init(s, k, wname, bname, nk, cin, cout):
        kw, kb = jax.random.split(k)
        bound = 1.0 / math.sqrt(cin * nk)
        # weight stored directly in im2col layout (nk*cin, cout), k-major / cin-minor
        w = jax.random.uniform(kw, (nk * cin, cout), jnp.float32, -bound, bound)
        b = jax.random.uniform(kb, (1, cout), jnp.float32, -bound, bound)
        return put(put(s, wname, w), bname, b)

    keys = iter(jax.random.split(key, 64))
    slab = conv_init(slab, next(keys), 'stem_w', 'stem_b', 3, 1, 2)
    slab = put(slab, 'stem_g', jnp.ones((1, 2), jnp.float32))
    slab = put(slab, 'stem_be', jnp.zeros((1, 2), jnp.float32))
    for i, (cin, cout, use_1x1, _stride) in enumerate(BLOCK_CFG):
        slab = conv_init(slab, next(keys), f'b{i}_w1', f'b{i}_b1', 3, cin, cout)
        slab = put(slab, f'b{i}_g1', jnp.ones((1, cout), jnp.float32))
        slab = put(slab, f'b{i}_be1', jnp.zeros((1, cout), jnp.float32))
        slab = conv_init(slab, next(keys), f'b{i}_w2', f'b{i}_b2', 3, cout, cout)
        slab = put(slab, f'b{i}_g2', jnp.ones((1, cout), jnp.float32))
        slab = put(slab, f'b{i}_be2', jnp.zeros((1, cout), jnp.float32))
        if use_1x1:
            slab = conv_init(slab, next(keys), f'b{i}_w3', f'b{i}_b3', 1, cin, cout)
    kw, kb = jax.random.split(next(keys))
    bound = 1.0 / math.sqrt(16)
    slab = put(slab, 'fc_w',
               jax.random.uniform(kw, (16, output_class), jnp.float32, -bound, bound))
    slab = put(slab, 'fc_b',
               jax.random.uniform(kb, (1, output_class), jnp.float32, -bound, bound))
    return slab


# ----------------------------------------------------------------- in-kernel ops
def _apply_weights(taps, w2d, bias, *, cin, cout):
    """taps: list of (rows, cin) slabs, k-major.  w2d: (nk*cin, cout) im2col
    weight (k-major / cin-minor).  Returns im2col(taps) @ w2d + bias."""
    nk = len(taps)
    if nk * cin <= _FMA_MAX_TERMS:
        # tiny conv: VPU broadcast-FMA chain, skip the exposed MXU push+pop latency
        y = None
        for k in range(nk):
            t = taps[k]
            for c in range(cin):
                col = t if cin == 1 else t[:, c:c + 1]
                term = col * w2d[k * cin + c:k * cin + c + 1, :]
                y = term if y is None else y + term
    else:
        col = taps[0] if nk == 1 else jnp.concatenate(taps, axis=1)
        y = jnp.dot(col, w2d, preferred_element_type=jnp.float32)
    return y + bias


def _pad_samples(x, fill, *, B, W, C):
    """(B*W, C) -> (B*(W+2), C): per-sample [fill, x_b, fill] padding, so conv /
    pool taps never leak across the sample boundary."""
    p1 = jnp.full((1, C), fill, jnp.float32)
    p2 = jnp.full((2, C), fill, jnp.float32)
    pieces = []
    for b in range(B):
        pieces.append(p1 if b == 0 else p2)
        pieces.append(x[b * W:(b + 1) * W])
    pieces.append(p1)
    return jnp.concatenate(pieces, axis=0)


def _unpad_valid(y, *, B, W):
    """Drop the junk rows straddling sample boundaries: keep rows
    [b*(W+2), b*(W+2)+W) for each sample b."""
    if B == 1:
        return y[0:W]
    return jnp.concatenate([y[b * (W + 2):b * (W + 2) + W] for b in range(B)],
                           axis=0)


def _conv3_s1(x, w2d, bias, *, B, W, cin, cout):
    """k=(1,3), pad=(0,1), stride 1 conv on the fused (B*W, cin) slab."""
    xp = _pad_samples(x, 0.0, B=B, W=W, C=cin)             # (B*(W+2), cin)
    wf = B * (W + 2) - 2
    taps = [xp[k:k + wf] for k in range(3)]
    y = _apply_weights(taps, w2d, bias, cin=cin, cout=cout)  # (wf, cout)
    return _unpad_valid(y, B=B, W=W)                        # (B*W, cout)


def _conv3_s2(x, w2d, bias, s_ref, *, B, W, cin, cout):
    """k=(1,3), pad=(0,1), stride 2 conv.  The fused input is staged in a VMEM
    scratch ref and even/odd rows are read back with strided slices, so the
    downsample needs no selection matmul and produces no junk rows.  Also
    returns the even rows (the stride-2 1x1-shortcut input)."""
    Wh = W // 2
    s_ref[...] = x                                          # (B*W, cin)
    x_even = s_ref[pl.ds(0, B * Wh, stride=2), :]           # x[2i]   per sample
    x_odd = s_ref[pl.ds(1, B * Wh, stride=2), :]            # x[2i+1] per sample
    # kernel-position-0 tap is x[2i-1] with a left zero pad per sample
    z1 = jnp.zeros((1, cin), jnp.float32)
    pieces = []
    for b in range(B):
        pieces.append(z1)
        pieces.append(x_odd[b * Wh:(b + 1) * Wh - 1])
    tap0 = jnp.concatenate(pieces, axis=0)                  # (B*Wh, cin)
    y = _apply_weights([tap0, x_even, x_odd], w2d, bias, cin=cin, cout=cout)
    return y, x_even


def _batchnorm(y, gamma, beta):
    """Training-mode BatchNorm on the fused (N, C) slab; single-pass stats."""
    inv_n = 1.0 / y.shape[0]
    s = jnp.sum(y, axis=0, keepdims=True)
    ss = jnp.sum(y * y, axis=0, keepdims=True)
    mean = s * inv_n
    var = ss * inv_n - mean * mean                          # biased variance
    scale = gamma * jax.lax.rsqrt(var + _BN_EPS)            # EUP rsqrt (free slot)
    shift = beta - mean * scale
    return y * scale + shift


def _maxpool3(x, *, B, W, C):
    """MaxPool (1,3), stride 1, padding 1 (-inf) on the fused (B*W, C) slab."""
    xp = _pad_samples(x, -jnp.inf, B=B, W=W, C=C)
    wf = B * (W + 2) - 2
    y = jnp.maximum(jnp.maximum(xp[0:wf], xp[1:wf + 1]), xp[2:wf + 2])
    return _unpad_valid(y, B=B, W=W)


# --------------------------------------------------------------------- kernel
def _make_forward_kernel(*, B, L, layout):
    def kernel(x_ref, p_ref, o_ref, *scratch):
        def ld(name):                                       # static slice of the slab
            off, r, c = layout[name]
            return p_ref[off:off + r, 0:c]

        x = x_ref[...]                                      # fused (B*L, 1) f32
        W = L

        # ---- stem: Conv(1->2, k=(1,3), p=(0,1)) -> BN -> MaxPool(1,3) ------
        x = _conv3_s1(x, ld('stem_w'), ld('stem_b'), B=B, W=W, cin=1, cout=2)
        x = _batchnorm(x, ld('stem_g'), ld('stem_be'))
        x = _maxpool3(x, B=B, W=W, C=2)

        # ---- residual blocks ------------------------------------------------
        s_idx = 0
        for i, (cin, cout, use_1x1, stride) in enumerate(BLOCK_CFG):
            res = x
            x_even = None
            if stride == 1:
                y = _conv3_s1(x, ld(f'b{i}_w1'), ld(f'b{i}_b1'),
                              B=B, W=W, cin=cin, cout=cout)
                Wn = W
            else:
                y, x_even = _conv3_s2(x, ld(f'b{i}_w1'), ld(f'b{i}_b1'),
                                      scratch[s_idx], B=B, W=W,
                                      cin=cin, cout=cout)
                s_idx += 1
                Wn = W // 2
            y = jnp.maximum(_batchnorm(y, ld(f'b{i}_g1'), ld(f'b{i}_be1')), 0.0)
            y = _conv3_s1(y, ld(f'b{i}_w2'), ld(f'b{i}_b2'),
                          B=B, W=Wn, cin=cout, cout=cout)
            y = _batchnorm(y, ld(f'b{i}_g2'), ld(f'b{i}_be2'))
            if use_1x1:
                short_in = x_even if stride != 1 else x
                res = _apply_weights([short_in], ld(f'b{i}_w3'), ld(f'b{i}_b3'),
                                     cin=cin, cout=cout)
            x = jnp.maximum(y + res, 0.0)
            W = Wn

        # ---- head: AdaptiveAvgPool((1,1)) -> Flatten -> Linear(16, nclass) ---
        feat = jnp.concatenate(
            [jnp.mean(x[b * W:(b + 1) * W], axis=0, keepdims=True)
             for b in range(B)], axis=0)                    # (B, 16)
        out = (jnp.dot(feat, ld('fc_w'), preferred_element_type=jnp.float32)
               + ld('fc_b'))
        o_ref[...] = out.astype(o_ref.dtype)

    return kernel


# ---------------------------------------------------------------------- model
@functools.partial(jax.jit, static_argnames=('nclass',))
def forward(param_slab, inputs, nclass=5):
    B = int(inputs.shape[0])
    L = int(inputs.shape[-1])
    assert L % 8 == 0 and L >= 16, "fused stride-2 path assumes even widths"
    layout, _ = _build_layout(nclass)
    # torch.reshape(inputs, (B,1,1,L)) : NCHW with H=1 -> fused (B*W, C=1) slab
    x = inputs.reshape(B * L, 1).astype(jnp.float32)

    # one small VMEM scratch ref per stride-2 block (even/odd row staging)
    scratch = []
    Wc = L
    for (cin, _cout, _use_1x1, stride) in BLOCK_CFG:
        if stride != 1:
            scratch.append(pltpu.VMEM((B * Wc, cin), jnp.float32))
            Wc //= 2

    kern = _make_forward_kernel(B=B, L=L, layout=layout)
    return pl.pallas_call(
        kern,
        out_shape=jax.ShapeDtypeStruct((B, nclass), jnp.float32),
        in_specs=[pl.BlockSpec(memory_space=pltpu.MemorySpace.VMEM)] * 2,
        out_specs=pl.BlockSpec(memory_space=pltpu.MemorySpace.VMEM),
        scratch_shapes=scratch,
    )(x, param_slab)


if __name__ == "__main__":
    key = jax.random.PRNGKey(0)
    nclass = 5
    param_slab = init_params(jax.random.fold_in(key, 1), output_class=nclass)
    B, L = 2, 16
    inputs = jax.random.normal(jax.random.fold_in(key, 2), (B, L), dtype=jnp.float32)
    out = forward(param_slab, inputs, nclass=nclass)
    out = jax.block_until_ready(out)
    assert out.shape == (B, nclass)
    assert bool(jnp.all(jnp.isfinite(out)))
    print("KERNEL_OK")
</pallas_src>

<mosaic_0001>
module attributes {stable_mosaic.version = 11 : i64} {
  func.func @kernel(%arg0: memref<32x1xf32, #tpu.memory_space<vmem>>, %arg1: memref<406x128xf32, #tpu.memory_space<vmem>>, %arg2: memref<2x5xf32, #tpu.memory_space<vmem>>, %arg3: memref<32x2xf32, #tpu.memory_space<vmem>>, %arg4: memref<16x4xf32, #tpu.memory_space<vmem>>, %arg5: memref<8x8xf32, #tpu.memory_space<vmem>>) attributes {dimension_semantics = [], scalar_prefetch = 0 : i64, scratch_operands = 3 : i64, tpu.core_type = #tpu.core_type<tc>} {
    %c0 = arith.constant 0 : index
    %c0_0 = arith.constant 0 : index
    %0 = vector.load %arg0[%c0, %c0_0] : memref<32x1xf32, #tpu.memory_space<vmem>>, vector<32x1xf32>
    %c0_1 = arith.constant 0 : index
    %c0_2 = arith.constant 0 : index
    %1 = vector.load %arg1[%c0_1, %c0_2] : memref<406x128xf32, #tpu.memory_space<vmem>>, vector<3x2xf32>
    %c3 = arith.constant 3 : index
    %c0_3 = arith.constant 0 : index
    %2 = vector.load %arg1[%c3, %c0_3] : memref<406x128xf32, #tpu.memory_space<vmem>>, vector<1x2xf32>
    %cst = arith.constant 0.000000e+00 : f32
    %3 = vector.broadcast %cst : f32 to vector<1x1xf32>
    %cst_4 = arith.constant 0.000000e+00 : f32
    %4 = vector.broadcast %cst_4 : f32 to vector<2x1xf32>
    %5 = vector.extract_strided_slice %0 {offsets = [0, 0], sizes = [16, 1], strides = [1, 1]} : vector<32x1xf32> to vector<16x1xf32>
    %6 = vector.extract_strided_slice %0 {offsets = [16, 0], sizes = [16, 1], strides = [1, 1]} : vector<32x1xf32> to vector<16x1xf32>
    %7 = tpu.concatenate %3, %5, %4, %6, %3 in 0 : vector<1x1xf32>, vector<16x1xf32>, vector<2x1xf32>, vector<16x1xf32>, vector<1x1xf32> -> vector<36x1xf32>
    %8 = vector.extract_strided_slice %7 {offsets = [0, 0], sizes = [34, 1], strides = [1, 1]} : vector<36x1xf32> to vector<34x1xf32>
    %9 = vector.extract_strided_slice %7 {offsets = [1, 0], sizes = [34, 1], strides = [1, 1]} : vector<36x1xf32> to vector<34x1xf32>
    %10 = vector.extract_strided_slice %7 {offsets = [2, 0], sizes = [34, 1], strides = [1, 1]} : vector<36x1xf32> to vector<34x1xf32>
    %11 = vector.extract_strided_slice %1 {offsets = [0, 0], sizes = [1, 2], strides = [1, 1]} : vector<3x2xf32> to vector<1x2xf32>
    %12 = vector.broadcast %8 : vector<34x1xf32> to vector<34x2xf32>
    %13 = vector.broadcast %11 : vector<1x2xf32> to vector<34x2xf32>
    %14 = arith.mulf %12, %13 : vector<34x2xf32>
    %15 = vector.extract_strided_slice %1 {offsets = [1, 0], sizes = [1, 2], strides = [1, 1]} : vector<3x2xf32> to vector<1x2xf32>
    %16 = vector.broadcast %9 : vector<34x1xf32> to vector<34x2xf32>
    %17 = vector.broadcast %15 : vector<1x2xf32> to vector<34x2xf32>
    %18 = arith.mulf %16, %17 : vector<34x2xf32>
    %19 = arith.addf %14, %18 : vector<34x2xf32>
    %20 = vector.extract_strided_slice %1 {offsets = [2, 0], sizes = [1, 2], strides = [1, 1]} : vector<3x2xf32> to vector<1x2xf32>
    %21 = vector.broadcast %10 : vector<34x1xf32> to vector<34x2xf32>
    %22 = vector.broadcast %20 : vector<1x2xf32> to vector<34x2xf32>
    %23 = arith.mulf %21, %22 : vector<34x2xf32>
    %24 = arith.addf %19, %23 : vector<34x2xf32>
    %25 = vector.broadcast %2 : vector<1x2xf32> to vector<34x2xf32>
    %26 = arith.addf %24, %25 : vector<34x2xf32>
    %27 = vector.extract_strided_slice %26 {offsets = [0, 0], sizes = [16, 2], strides = [1, 1]} : vector<34x2xf32> to vector<16x2xf32>
    %28 = vector.extract_strided_slice %26 {offsets = [18, 0], sizes = [16, 2], strides = [1, 1]} : vector<34x2xf32> to vector<16x2xf32>
    %29 = tpu.concatenate %27, %28 in 0 : vector<16x2xf32>, vector<16x2xf32> -> vector<32x2xf32>
    %c4 = arith.constant 4 : index
    %c0_5 = arith.constant 0 : index
    %30 = vector.load %arg1[%c4, %c0_5] : memref<406x128xf32, #tpu.memory_space<vmem>>, vector<1x2xf32>
    %c5 = arith.constant 5 : index
    %c0_6 = arith.constant 0 : index
    %31 = vector.load %arg1[%c5, %c0_6] : memref<406x128xf32, #tpu.memory_space<vmem>>, vector<1x2xf32>
    %cst_7 = arith.constant dense<0.000000e+00> : vector<2xf32>
    %32 = vector.multi_reduction <add>, %29, %cst_7 [0] : vector<32x2xf32> to vector<2xf32>
    %33 = vector.shape_cast %32 : vector<2xf32> to vector<1x2xf32>
    %34 = arith.mulf %29, %29 : vector<32x2xf32>
    %cst_8 = arith.constant dense<0.000000e+00> : vector<2xf32>
    %35 = vector.multi_reduction <add>, %34, %cst_8 [0] : vector<32x2xf32> to vector<2xf32>
    %36 = vector.shape_cast %35 : vector<2xf32> to vector<1x2xf32>
    %cst_9 = arith.constant 3.125000e-02 : f32
    %37 = vector.broadcast %cst_9 : f32 to vector<1x2xf32>
    %38 = arith.mulf %33, %37 : vector<1x2xf32>
    %cst_10 = arith.constant 3.125000e-02 : f32
    %39 = vector.broadcast %cst_10 : f32 to vector<1x2xf32>
    %40 = arith.mulf %36, %39 : vector<1x2xf32>
    %41 = arith.mulf %38, %38 : vector<1x2xf32>
    %42 = arith.subf %40, %41 : vector<1x2xf32>
    %cst_11 = arith.constant 9.99999974E-6 : f32
    %43 = vector.broadcast %cst_11 : f32 to vector<1x2xf32>
    %44 = arith.addf %42, %43 : vector<1x2xf32>
    %45 = math.rsqrt %44 : vector<1x2xf32>
    %46 = arith.mulf %30, %45 : vector<1x2xf32>
    %47 = arith.mulf %38, %46 : vector<1x2xf32>
    %48 = arith.subf %31, %47 : vector<1x2xf32>
    %49 = vector.broadcast %46 : vector<1x2xf32> to vector<32x2xf32>
    %50 = arith.mulf %29, %49 : vector<32x2xf32>
    %51 = vector.broadcast %48 : vector<1x2xf32> to vector<32x2xf32>
    %52 = arith.addf %50, %51 : vector<32x2xf32>
    %cst_12 = arith.constant 0xFF800000 : f32
    %53 = vector.broadcast %cst_12 : f32 to vector<1x2xf32>
    %cst_13 = arith.constant 0xFF800000 : f32
    %54 = vector.broadcast %cst_13 : f32 to vector<2x2xf32>
    %55 = vector.extract_strided_slice %52 {offsets = [0, 0], sizes = [16, 2], strides = [1, 1]} : vector<32x2xf32> to vector<16x2xf32>
    %56 = vector.extract_strided_slice %52 {offsets = [16, 0], sizes = [16, 2], strides = [1, 1]} : vector<32x2xf32> to vector<16x2xf32>
    %57 = tpu.concatenate %53, %55, %54, %56, %53 in 0 : vector<1x2xf32>, vector<16x2xf32>, vector<2x2xf32>, vector<16x2xf32>, vector<1x2xf32> -> vector<36x2xf32>
    %58 = vector.extract_strided_slice %57 {offsets = [0, 0], sizes = [34, 2], strides = [1, 1]} : vector<36x2xf32> to vector<34x2xf32>
    %59 = vector.extract_strided_slice %57 {offsets = [1, 0], sizes = [34, 2], strides = [1, 1]} : vector<36x2xf32> to vector<34x2xf32>
    %60 = arith.maximumf %58, %59 : vector<34x2xf32>
    %61 = vector.extract_strided_slice %57 {offsets = [2, 0], sizes = [34, 2], strides = [1, 1]} : vector<36x2xf32> to vector<34x2xf32>
    %62 = arith.maximumf %60, %61 : vector<34x2xf32>
    %63 = vector.extract_strided_slice %62 {offsets = [0, 0], sizes = [16, 2], strides = [1, 1]} : vector<34x2xf32> to vector<16x2xf32>
    %64 = vector.extract_strided_slice %62 {offsets = [18, 0], sizes = [16, 2], strides = [1, 1]} : vector<34x2xf32> to vector<16x2xf32>
    %65 = tpu.concatenate %63, %64 in 0 : vector<16x2xf32>, vector<16x2xf32> -> vector<32x2xf32>
    %c6 = arith.constant 6 : index
    %c0_14 = arith.constant 0 : index
    %66 = vector.load %arg1[%c6, %c0_14] : memref<406x128xf32, #tpu.memory_space<vmem>>, vector<6x2xf32>
    %c12 = arith.constant 12 : index
    %c0_15 = arith.constant 0 : index
    %67 = vector.load %arg1[%c12, %c0_15] : memref<406x128xf32, #tpu.memory_space<vmem>>, vector<1x2xf32>
    %cst_16 = arith.constant 0.000000e+00 : f32
    %68 = vector.broadcast %cst_16 : f32 to vector<1x2xf32>
    %cst_17 = arith.constant 0.000000e+00 : f32
    %69 = vector.broadcast %cst_17 : f32 to vector<2x2xf32>
    %70 = vector.extract_strided_slice %65 {offsets = [0, 0], sizes = [16, 2], strides = [1, 1]} : vector<32x2xf32> to vector<16x2xf32>
    %71 = vector.extract_strided_slice %65 {offsets = [16, 0], sizes = [16, 2], strides = [1, 1]} : vector<32x2xf32> to vector<16x2xf32>
    %72 = tpu.concatenate %68, %70, %69, %71, %68 in 0 : vector<1x2xf32>, vector<16x2xf32>, vector<2x2xf32>, vector<16x2xf32>, vector<1x2xf32> -> vector<36x2xf32>
    %73 = vector.extract_strided_slice %72 {offsets = [0, 0], sizes = [34, 2], strides = [1, 1]} : vector<36x2xf32> to vector<34x2xf32>
    %74 = vector.extract_strided_slice %72 {offsets = [1, 0], sizes = [34, 2], strides = [1, 1]} : vector<36x2xf32> to vector<34x2xf32>
    %75 = vector.extract_strided_slice %72 {offsets = [2, 0], sizes = [34, 2], strides = [1, 1]} : vector<36x2xf32> to vector<34x2xf32>
    %76 = vector.extract_strided_slice %73 {offsets = [0, 0], sizes = [34, 1], strides = [1, 1]} : vector<34x2xf32> to vector<34x1xf32>
    %77 = vector.extract_strided_slice %66 {offsets = [0, 0], sizes = [1, 2], strides = [1, 1]} : vector<6x2xf32> to vector<1x2xf32>
    %78 = vector.broadcast %76 : vector<34x1xf32> to vector<34x2xf32>
    %79 = vector.broadcast %77 : vector<1x2xf32> to vector<34x2xf32>
    %80 = arith.mulf %78, %79 : vector<34x2xf32>
    %81 = vector.extract_strided_slice %73 {offsets = [0, 1], sizes = [34, 1], strides = [1, 1]} : vector<34x2xf32> to vector<34x1xf32>
    %82 = vector.extract_strided_slice %66 {offsets = [1, 0], sizes = [1, 2], strides = [1, 1]} : vector<6x2xf32> to vector<1x2xf32>
    %83 = vector.broadcast %81 : vector<34x1xf32> to vector<34x2xf32>
    %84 = vector.broadcast %82 : vector<1x2xf32> to vector<34x2xf32>
    %85 = arith.mulf %83, %84 : vector<34x2xf32>
    %86 = arith.addf %80, %85 : vector<34x2xf32>
    %87 = vector.extract_strided_slice %74 {offsets = [0, 0], sizes = [34, 1], strides = [1, 1]} : vector<34x2xf32> to vector<34x1xf32>
    %88 = vector.extract_strided_slice %66 {offsets = [2, 0], sizes = [1, 2], strides = [1, 1]} : vector<6x2xf32> to vector<1x2xf32>
    %89 = vector.broadcast %87 : vector<34x1xf32> to vector<34x2xf32>
    %90 = vector.broadcast %88 : vector<1x2xf32> to vector<34x2xf32>
    %91 = arith.mulf %89, %90 : vector<34x2xf32>
    %92 = arith.addf %86, %91 : vector<34x2xf32>
    %93 = vector.extract_strided_slice %74 {offsets = [0, 1], sizes = [34, 1], strides = [1, 1]} : vector<34x2xf32> to vector<34x1xf32>
    %94 = vector.extract_strided_slice %66 {offsets = [3, 0], sizes = [1, 2], strides = [1, 1]} : vector<6x2xf32> to vector<1x2xf32>
    %95 = vector.broadcast %93 : vector<34x1xf32> to vector<34x2xf32>
    %96 = vector.broadcast %94 : vector<1x2xf32> to vector<34x2xf32>
    %97 = arith.mulf %95, %96 : vector<34x2xf32>
    %98 = arith.addf %92, %97 : vector<34x2xf32>
    %99 = vector.extract_strided_slice %75 {offsets = [0, 0], sizes = [34, 1], strides = [1, 1]} : vector<34x2xf32> to vector<34x1xf32>
    %100 = vector.extract_strided_slice %66 {offsets = [4, 0], sizes = [1, 2], strides = [1, 1]} : vector<6x2xf32> to vector<1x2xf32>
    %101 = vector.broadcast %99 : vector<34x1xf32> to vector<34x2xf32>
    %102 = vector.broadcast %100 : vector<1x2xf32> to vector<34x2xf32>
    %103 = arith.mulf %101, %102 : vector<34x2xf32>
    %104 = arith.addf %98, %103 : vector<34x2xf32>
    %105 = vector.extract_strided_slice %75 {offsets = [0, 1], sizes = [34, 1], strides = [1, 1]} : vector<34x2xf32> to vector<34x1xf32>
    %106 = vector.extract_strided_slice %66 {offsets = [5, 0], sizes = [1, 2], strides = [1, 1]} : vector<6x2xf32> to vector<1x2xf32>
    %107 = vector.broadcast %105 : vector<34x1xf32> to vector<34x2xf32>
    %108 = vector.broadcast %106 : vector<1x2xf32> to vector<34x2xf32>
    %109 = arith.mulf %107, %108 : vector<34x2xf32>
    %110 = arith.addf %104, %109 : vector<34x2xf32>
    %111 = vector.broadcast %67 : vector<1x2xf32> to vector<34x2xf32>
    %112 = arith.addf %110, %111 : vector<34x2xf32>
    %113 = vector.extract_strided_slice %112 {offsets = [0, 0], sizes = [16, 2], strides = [1, 1]} : vector<34x2xf32> to vector<16x2xf32>
    %114 = vector.extract_strided_slice %112 {offsets = [18, 0], sizes = [16, 2], strides = [1, 1]} : vector<34x2xf32> to vector<16x2xf32>
    %115 = tpu.concatenate %113, %114 in 0 : vector<16x2xf32>, vector<16x2xf32> -> vector<32x2xf32>
    %c13 = arith.constant 13 : index
    %c0_18 = arith.constant 0 : index
    %116 = vector.load %arg1[%c13, %c0_18] : memref<406x128xf32, #tpu.memory_space<vmem>>, vector<1x2xf32>
    %c14 = arith.constant 14 : index
    %c0_19 = arith.constant 0 : index
    %117 = vector.load %arg1[%c14, %c0_19] : memref<406x128xf32, #tpu.memory_space<vmem>>, vector<1x2xf32>
    %cst_20 = arith.constant dense<0.000000e+00> : vector<2xf32>
    %118 = vector.multi_reduction <add>, %115, %cst_20 [0] : vector<32x2xf32> to vector<2xf32>
    %119 = vector.shape_cast %118 : vector<2xf32> to vector<1x2xf32>
    %120 = arith.mulf %115, %115 : vector<32x2xf32>
    %cst_21 = arith.constant dense<0.000000e+00> : vector<2xf32>
    %121 = vector.multi_reduction <add>, %120, %cst_21 [0] : vector<32x2xf32> to vector<2xf32>
    %122 = vector.shape_cast %121 : vector<2xf32> to vector<1x2xf32>
    %cst_22 = arith.constant 3.125000e-02 : f32
    %123 = vector.broadcast %cst_22 : f32 to vector<1x2xf32>
    %124 = arith.mulf %119, %123 : vector<1x2xf32>
    %cst_23 = arith.constant 3.125000e-02 : f32
    %125 = vector.broadcast %cst_23 : f32 to vector<1x2xf32>
    %126 = arith.mulf %122, %125 : vector<1x2xf32>
    %127 = arith.mulf %124, %124 : vector<1x2xf32>
    %128 = arith.subf %126, %127 : vector<1x2xf32>
    %cst_24 = arith.constant 9.99999974E-6 : f32
    %129 = vector.broadcast %cst_24 : f32 to vector<1x2xf32>
    %130 = arith.addf %128, %129 : vector<1x2xf32>
    %131 = math.rsqrt %130 : vector<1x2xf32>
    %132 = arith.mulf %116, %131 : vector<1x2xf32>
    %133 = arith.mulf %124, %132 : vector<1x2xf32>
    %134 = arith.subf %117, %133 : vector<1x2xf32>
    %135 = vector.broadcast %132 : vector<1x2xf32> to vector<32x2xf32>
    %136 = arith.mulf %115, %135 : vector<32x2xf32>
    %137 = vector.broadcast %134 : vector<1x2xf32> to vector<32x2xf32>
    %138 = arith.addf %136, %137 : vector<32x2xf32>
    %cst_25 = arith.constant 0.000000e+00 : f32
    %139 = vector.broadcast %cst_25 : f32 to vector<32x2xf32>
    %140 = arith.maximumf %138, %139 : vector<32x2xf32>
    %c15 = arith.constant 15 : index
    %c0_26 = arith.constant 0 : index
    %141 = vector.load %arg1[%c15, %c0_26] : memref<406x128xf32, #tpu.memory_space<vmem>>, vector<6x2xf32>
    %c21 = arith.constant 21 : index
    %c0_27 = arith.constant 0 : index
    %142 = vector.load %arg1[%c21, %c0_27] : memref<406x128xf32, #tpu.memory_space<vmem>>, vector<1x2xf32>
    %cst_28 = arith.constant 0.000000e+00 : f32
    %143 = vector.broadcast %cst_28 : f32 to vector<1x2xf32>
    %cst_29 = arith.constant 0.000000e+00 : f32
    %144 = vector.broadcast %cst_29 : f32 to vector<2x2xf32>
    %145 = vector.extract_strided_slice %140 {offsets = [0, 0], sizes = [16, 2], strides = [1, 1]} : vector<32x2xf32> to vector<16x2xf32>
    %146 = vector.extract_strided_slice %140 {offsets = [16, 0], sizes = [16, 2], strides = [1, 1]} : vector<32x2xf32> to vector<16x2xf32>
    %147 = tpu.concatenate %143, %145, %144, %146, %143 in 0 : vector<1x2xf32>, vector<16x2xf32>, vector<2x2xf32>, vector<16x2xf32>, vector<1x2xf32> -> vector<36x2xf32>
    %148 = vector.extract_strided_slice %147 {offsets = [0, 0], sizes = [34, 2], strides = [1, 1]} : vector<36x2xf32> to vector<34x2xf32>
    %149 = vector.extract_strided_slice %147 {offsets = [1, 0], sizes = [34, 2], strides = [1, 1]} : vector<36x2xf32> to vector<34x2xf32>
    %150 = vector.extract_strided_slice %147 {offsets = [2, 0], sizes = [34, 2], strides = [1, 1]} : vector<36x2xf32> to vector<34x2xf32>
    %151 = vector.extract_strided_slice %148 {offsets = [0, 0], sizes = [34, 1], strides = [1, 1]} : vector<34x2xf32> to vector<34x1xf32>
    %152 = vector.extract_strided_slice %141 {offsets = [0, 0], sizes = [1, 2], strides = [1, 1]} : vector<6x2xf32> to vector<1x2xf32>
    %153 = vector.broadcast %151 : vector<34x1xf32> to vector<34x2xf32>
    %154 = vector.broadcast %152 : vector<1x2xf32> to vector<34x2xf32>
    %155 = arith.mulf %153, %154 : vector<34x2xf32>
    %156 = vector.extract_strided_slice %148 {offsets = [0, 1], sizes = [34, 1], strides = [1, 1]} : vector<34x2xf32> to vector<34x1xf32>
    %157 = vector.extract_strided_slice %141 {offsets = [1, 0], sizes = [1, 2], strides = [1, 1]} : vector<6x2xf32> to vector<1x2xf32>
    %158 = vector.broadcast %156 : vector<34x1xf32> to vector<34x2xf32>
    %159 = vector.broadcast %157 : vector<1x2xf32> to vector<34x2xf32>
    %160 = arith.mulf %158, %159 : vector<34x2xf32>
    %161 = arith.addf %155, %160 : vector<34x2xf32>
    %162 = vector.extract_strided_slice %149 {offsets = [0, 0], sizes = [34, 1], strides = [1, 1]} : vector<34x2xf32> to vector<34x1xf32>
    %163 = vector.extract_strided_slice %141 {offsets = [2, 0], sizes = [1, 2], strides = [1, 1]} : vector<6x2xf32> to vector<1x2xf32>
    %164 = vector.broadcast %162 : vector<34x1xf32> to vector<34x2xf32>
    %165 = vector.broadcast %163 : vector<1x2xf32> to vector<34x2xf32>
    %166 = arith.mulf %164, %165 : vector<34x2xf32>
    %167 = arith.addf %161, %166 : vector<34x2xf32>
    %168 = vector.extract_strided_slice %149 {offsets = [0, 1], sizes = [34, 1], strides = [1, 1]} : vector<34x2xf32> to vector<34x1xf32>
    %169 = vector.extract_strided_slice %141 {offsets = [3, 0], sizes = [1, 2], strides = [1, 1]} : vector<6x2xf32> to vector<1x2xf32>
    %170 = vector.broadcast %168 : vector<34x1xf32> to vector<34x2xf32>
    %171 = vector.broadcast %169 : vector<1x2xf32> to vector<34x2xf32>
    %172 = arith.mulf %170, %171 : vector<34x2xf32>
    %173 = arith.addf %167, %172 : vector<34x2xf32>
    %174 = vector.extract_strided_slice %150 {offsets = [0, 0], sizes = [34, 1], strides = [1, 1]} : vector<34x2xf32> to vector<34x1xf32>
    %175 = vector.extract_strided_slice %141 {offsets = [4, 0], sizes = [1, 2], strides = [1, 1]} : vector<6x2xf32> to vector<1x2xf32>
    %176 = vector.broadcast %174 : vector<34x1xf32> to vector<34x2xf32>
    %177 = vector.broadcast %175 : vector<1x2xf32> to vector<34x2xf32>
    %178 = arith.mulf %176, %177 : vector<34x2xf32>
    %179 = arith.addf %173, %178 : vector<34x2xf32>
    %180 = vector.extract_strided_slice %150 {offsets = [0, 1], sizes = [34, 1], strides = [1, 1]} : vector<34x2xf32> to vector<34x1xf32>
    %181 = vector.extract_strided_slice %141 {offsets = [5, 0], sizes = [1, 2], strides = [1, 1]} : vector<6x2xf32> to vector<1x2xf32>
    %182 = vector.broadcast %180 : vector<34x1xf32> to vector<34x2xf32>
    %183 = vector.broadcast %181 : vector<1x2xf32> to vector<34x2xf32>
    %184 = arith.mulf %182, %183 : vector<34x2xf32>
    %185 = arith.addf %179, %184 : vector<34x2xf32>
    %186 = vector.broadcast %142 : vector<1x2xf32> to vector<34x2xf32>
    %187 = arith.addf %185, %186 : vector<34x2xf32>
    %188 = vector.extract_strided_slice %187 {offsets = [0, 0], sizes = [16, 2], strides = [1, 1]} : vector<34x2xf32> to vector<16x2xf32>
    %189 = vector.extract_strided_slice %187 {offsets = [18, 0], sizes = [16, 2], strides = [1, 1]} : vector<34x2xf32> to vector<16x2xf32>
    %190 = tpu.concatenate %188, %189 in 0 : vector<16x2xf32>, vector<16x2xf32> -> vector<32x2xf32>
    %c22 = arith.constant 22 : index
    %c0_30 = arith.constant 0 : index
    %191 = vector.load %arg1[%c22, %c0_30] : memref<406x128xf32, #tpu.memory_space<vmem>>, vector<1x2xf32>
    %c23 = arith.constant 23 : index
    %c0_31 = arith.constant 0 : index
    %192 = vector.load %arg1[%c23, %c0_31] : memref<406x128xf32, #tpu.memory_space<vmem>>, vector<1x2xf32>
    %cst_32 = arith.constant dense<0.000000e+00> : vector<2xf32>
    %193 = vector.multi_reduction <add>, %190, %cst_32 [0] : vector<32x2xf32> to vector<2xf32>
    %194 = vector.shape_cast %193 : vector<2xf32> to vector<1x2xf32>
    %195 = arith.mulf %190, %190 : vector<32x2xf32>
    %cst_33 = arith.constant dense<0.000000e+00> : vector<2xf32>
    %196 = vector.multi_reduction <add>, %195, %cst_33 [0] : vector<32x2xf32> to vector<2xf32>
    %197 = vector.shape_cast %196 : vector<2xf32> to vector<1x2xf32>
    %cst_34 = arith.constant 3.125000e-02 : f32
    %198 = vector.broadcast %cst_34 : f32 to vector<1x2xf32>
    %199 = arith.mulf %194, %198 : vector<1x2xf32>
    %cst_35 = arith.constant 3.125000e-02 : f32
    %200 = vector.broadcast %cst_35 : f32 to vector<1x2xf32>
    %201 = arith.mulf %197, %200 : vector<1x2xf32>
    %202 = arith.mulf %199, %199 : vector<1x2xf32>
    %203 = arith.subf %201, %202 : vector<1x2xf32>
    %cst_36 = arith.constant 9.99999974E-6 : f32
    %204 = vector.broadcast %cst_36 : f32 to vector<1x2xf32>
    %205 = arith.addf %203, %204 : vector<1x2xf32>
    %206 = math.rsqrt %205 : vector<1x2xf32>
    %207 = arith.mulf %191, %206 : vector<1x2xf32>
    %208 = arith.mulf %199, %207 : vector<1x2xf32>
    %209 = arith.subf %192, %208 : vector<1x2xf32>
    %210 = vector.broadcast %207 : vector<1x2xf32> to vector<32x2xf32>
    %211 = arith.mulf %190, %210 : vector<32x2xf32>
    %212 = vector.broadcast %209 : vector<1x2xf32> to vector<32x2xf32>
    %213 = arith.addf %211, %212 : vector<32x2xf32>
    %214 = arith.addf %213, %65 : vector<32x2xf32>
    %cst_37 = arith.constant 0.000000e+00 : f32
    %215 = vector.broadcast %cst_37 : f32 to vector<32x2xf32>
    %216 = arith.maximumf %214, %215 : vector<32x2xf32>
    %c24 = arith.constant 24 : index
    %c0_38 = arith.constant 0 : index
    %217 = vector.load %arg1[%c24, %c0_38] : memref<406x128xf32, #tpu.memory_space<vmem>>, vector<6x2xf32>
    %c30 = arith.constant 30 : index
    %c0_39 = arith.constant 0 : index
    %218 = vector.load %arg1[%c30, %c0_39] : memref<406x128xf32, #tpu.memory_space<vmem>>, vector<1x2xf32>
    %cst_40 = arith.constant 0.000000e+00 : f32
    %219 = vector.broadcast %cst_40 : f32 to vector<1x2xf32>
    %cst_41 = arith.constant 0.000000e+00 : f32
    %220 = vector.broadcast %cst_41 : f32 to vector<2x2xf32>
    %221 = vector.extract_strided_slice %216 {offsets = [0, 0], sizes = [16, 2], strides = [1, 1]} : vector<32x2xf32> to vector<16x2xf32>
    %222 = vector.extract_strided_slice %216 {offsets = [16, 0], sizes = [16, 2], strides = [1, 1]} : vector<32x2xf32> to vector<16x2xf32>
    %223 = tpu.concatenate %219, %221, %220, %222, %219 in 0 : vector<1x2xf32>, vector<16x2xf32>, vector<2x2xf32>, vector<16x2xf32>, vector<1x2xf32> -> vector<36x2xf32>
    %224 = vector.extract_strided_slice %223 {offsets = [0, 0], sizes = [34, 2], strides = [1, 1]} : vector<36x2xf32> to vector<34x2xf32>
    %225 = vector.extract_strided_slice %223 {offsets = [1, 0], sizes = [34, 2], strides = [1, 1]} : vector<36x2xf32> to vector<34x2xf32>
    %226 = vector.extract_strided_slice %223 {offsets = [2, 0], sizes = [34, 2], strides = [1, 1]} : vector<36x2xf32> to vector<34x2xf32>
    %227 = vector.extract_strided_slice %224 {offsets = [0, 0], sizes = [34, 1], strides = [1, 1]} : vector<34x2xf32> to vector<34x1xf32>
    %228 = vector.extract_strided_slice %217 {offsets = [0, 0], sizes = [1, 2], strides = [1, 1]} : vector<6x2xf32> to vector<1x2xf32>
    %229 = vector.broadcast %227 : vector<34x1xf32> to vector<34x2xf32>
    %230 = vector.broadcast %228 : vector<1x2xf32> to vector<34x2xf32>
    %231 = arith.mulf %229, %230 : vector<34x2xf32>
    %232 = vector.extract_strided_slice %224 {offsets = [0, 1], sizes = [34, 1], strides = [1, 1]} : vector<34x2xf32> to vector<34x1xf32>
    %233 = vector.extract_strided_slice %217 {offsets = [1, 0], sizes = [1, 2], strides = [1, 1]} : vector<6x2xf32> to vector<1x2xf32>
    %234 = vector.broadcast %232 : vector<34x1xf32> to vector<34x2xf32>
    %235 = vector.broadcast %233 : vector<1x2xf32> to vector<34x2xf32>
    %236 = arith.mulf %234, %235 : vector<34x2xf32>
    %237 = arith.addf %231, %236 : vector<34x2xf32>
    %238 = vector.extract_strided_slice %225 {offsets = [0, 0], sizes = [34, 1], strides = [1, 1]} : vector<34x2xf32> to vector<34x1xf32>
    %239 = vector.extract_strided_slice %217 {offsets = [2, 0], sizes = [1, 2], strides = [1, 1]} : vector<6x2xf32> to vector<1x2xf32>
    %240 = vector.broadcast %238 : vector<34x1xf32> to vector<34x2xf32>
    %241 = vector.broadcast %239 : vector<1x2xf32> to vector<34x2xf32>
    %242 = arith.mulf %240, %241 : vector<34x2xf32>
    %243 = arith.addf %237, %242 : vector<34x2xf32>
    %244 = vector.extract_strided_slice %225 {offsets = [0, 1], sizes = [34, 1], strides = [1, 1]} : vector<34x2xf32> to vector<34x1xf32>
    %245 = vector.extract_strided_slice %217 {offsets = [3, 0], sizes = [1, 2], strides = [1, 1]} : vector<6x2xf32> to vector<1x2xf32>
    %246 = vector.broadcast %244 : vector<34x1xf32> to vector<34x2xf32>
    %247 = vector.broadcast %245 : vector<1x2xf32> to vector<34x2xf32>
    %248 = arith.mulf %246, %247 : vector<34x2xf32>
    %249 = arith.addf %243, %248 : vector<34x2xf32>
    %250 = vector.extract_strided_slice %226 {offsets = [0, 0], sizes = [34, 1], strides = [1, 1]} : vector<34x2xf32> to vector<34x1xf32>
    %251 = vector.extract_strided_slice %217 {offsets = [4, 0], sizes = [1, 2], strides = [1, 1]} : vector<6x2xf32> to vector<1x2xf32>
    %252 = vector.broadcast %250 : vector<34x1xf32> to vector<34x2xf32>
    %253 = vector.broadcast %251 : vector<1x2xf32> to vector<34x2xf32>
    %254 = arith.mulf %252, %253 : vector<34x2xf32>
    %255 = arith.addf %249, %254 : vector<34x2xf32>
    %256 = vector.extract_strided_slice %226 {offsets = [0, 1], sizes = [34, 1], strides = [1, 1]} : vector<34x2xf32> to vector<34x1xf32>
    %257 = vector.extract_strided_slice %217 {offsets = [5, 0], sizes = [1, 2], strides = [1, 1]} : vector<6x2xf32> to vector<1x2xf32>
    %258 = vector.broadcast %256 : vector<34x1xf32> to vector<34x2xf32>
    %259 = vector.broadcast %257 : vector<1x2xf32> to vector<34x2xf32>
    %260 = arith.mulf %258, %259 : vector<34x2xf32>
    %261 = arith.addf %255, %260 : vector<34x2xf32>
    %262 = vector.broadcast %218 : vector<1x2xf32> to vector<34x2xf32>
    %263 = arith.addf %261, %262 : vector<34x2xf32>
    %264 = vector.extract_strided_slice %263 {offsets = [0, 0], sizes = [16, 2], strides = [1, 1]} : vector<34x2xf32> to vector<16x2xf32>
    %265 = vector.extract_strided_slice %263 {offsets = [18, 0], sizes = [16, 2], strides = [1, 1]} : vector<34x2xf32> to vector<16x2xf32>
    %266 = tpu.concatenate %264, %265 in 0 : vector<16x2xf32>, vector<16x2xf32> -> vector<32x2xf32>
    %c31 = arith.constant 31 : index
    %c0_42 = arith.constant 0 : index
    %267 = vector.load %arg1[%c31, %c0_42] : memref<406x128xf32, #tpu.memory_space<vmem>>, vector<1x2xf32>
    %c32 = arith.constant 32 : index
    %c0_43 = arith.constant 0 : index
    %268 = vector.load %arg1[%c32, %c0_43] : memref<406x128xf32, #tpu.memory_space<vmem>>, vector<1x2xf32>
    %cst_44 = arith.constant dense<0.000000e+00> : vector<2xf32>
    %269 = vector.multi_reduction <add>, %266, %cst_44 [0] : vector<32x2xf32> to vector<2xf32>
    %270 = vector.shape_cast %269 : vector<2xf32> to vector<1x2xf32>
    %271 = arith.mulf %266, %266 : vector<32x2xf32>
    %cst_45 = arith.constant dense<0.000000e+00> : vector<2xf32>
    %272 = vector.multi_reduction <add>, %271, %cst_45 [0] : vector<32x2xf32> to vector<2xf32>
    %273 = vector.shape_cast %272 : vector<2xf32> to vector<1x2xf32>
    %cst_46 = arith.constant 3.125000e-02 : f32
    %274 = vector.broadcast %cst_46 : f32 to vector<1x2xf32>
    %275 = arith.mulf %270, %274 : vector<1x2xf32>
    %cst_47 = arith.constant 3.125000e-02 : f32
    %276 = vector.broadcast %cst_47 : f32 to vector<1x2xf32>
    %277 = arith.mulf %273, %276 : vector<1x2xf32>
    %278 = arith.mulf %275, %275 : vector<1x2xf32>
    %279 = arith.subf %277, %278 : vector<1x2xf32>
    %cst_48 = arith.constant 9.99999974E-6 : f32
    %280 = vector.broadcast %cst_48 : f32 to vector<1x2xf32>
    %281 = arith.addf %279, %280 : vector<1x2xf32>
    %282 = math.rsqrt %281 : vector<1x2xf32>
    %283 = arith.mulf %267, %282 : vector<1x2xf32>
    %284 = arith.mulf %275, %283 : vector<1x2xf32>
    %285 = arith.subf %268, %284 : vector<1x2xf32>
    %286 = vector.broadcast %283 : vector<1x2xf32> to vector<32x2xf32>
    %287 = arith.mulf %266, %286 : vector<32x2xf32>
    %288 = vector.broadcast %285 : vector<1x2xf32> to vector<32x2xf32>
    %289 = arith.addf %287, %288 : vector<32x2xf32>
    %cst_49 = arith.constant 0.000000e+00 : f32
    %290 = vector.broadcast %cst_49 : f32 to vector<32x2xf32>
    %291 = arith.maximumf %289, %290 : vector<32x2xf32>
    %c33 = arith.constant 33 : index
    %c0_50 = arith.constant 0 : index
    %292 = vector.load %arg1[%c33, %c0_50] : memref<406x128xf32, #tpu.memory_space<vmem>>, vector<6x2xf32>
    %c39 = arith.constant 39 : index
    %c0_51 = arith.constant 0 : index
    %293 = vector.load %arg1[%c39, %c0_51] : memref<406x128xf32, #tpu.memory_space<vmem>>, vector<1x2xf32>
    %cst_52 = arith.constant 0.000000e+00 : f32
    %294 = vector.broadcast %cst_52 : f32 to vector<1x2xf32>
    %cst_53 = arith.constant 0.000000e+00 : f32
    %295 = vector.broadcast %cst_53 : f32 to vector<2x2xf32>
    %296 = vector.extract_strided_slice %291 {offsets = [0, 0], sizes = [16, 2], strides = [1, 1]} : vector<32x2xf32> to vector<16x2xf32>
    %297 = vector.extract_strided_slice %291 {offsets = [16, 0], sizes = [16, 2], strides = [1, 1]} : vector<32x2xf32> to vector<16x2xf32>
    %298 = tpu.concatenate %294, %296, %295, %297, %294 in 0 : vector<1x2xf32>, vector<16x2xf32>, vector<2x2xf32>, vector<16x2xf32>, vector<1x2xf32> -> vector<36x2xf32>
    %299 = vector.extract_strided_slice %298 {offsets = [0, 0], sizes = [34, 2], strides = [1, 1]} : vector<36x2xf32> to vector<34x2xf32>
    %300 = vector.extract_strided_slice %298 {offsets = [1, 0], sizes = [34, 2], strides = [1, 1]} : vector<36x2xf32> to vector<34x2xf32>
    %301 = vector.extract_strided_slice %298 {offsets = [2, 0], sizes = [34, 2], strides = [1, 1]} : vector<36x2xf32> to vector<34x2xf32>
    %302 = vector.extract_strided_slice %299 {offsets = [0, 0], sizes = [34, 1], strides = [1, 1]} : vector<34x2xf32> to vector<34x1xf32>
    %303 = vector.extract_strided_slice %292 {offsets = [0, 0], sizes = [1, 2], strides = [1, 1]} : vector<6x2xf32> to vector<1x2xf32>
    %304 = vector.broadcast %302 : vector<34x1xf32> to vector<34x2xf32>
    %305 = vector.broadcast %303 : vector<1x2xf32> to vector<34x2xf32>
    %306 = arith.mulf %304, %305 : vector<34x2xf32>
    %307 = vector.extract_strided_slice %299 {offsets = [0, 1], sizes = [34, 1], strides = [1, 1]} : vector<34x2xf32> to vector<34x1xf32>
    %308 = vector.extract_strided_slice %292 {offsets = [1, 0], sizes = [1, 2], strides = [1, 1]} : vector<6x2xf32> to vector<1x2xf32>
    %309 = vector.broadcast %307 : vector<34x1xf32> to vector<34x2xf32>
    %310 = vector.broadcast %308 : vector<1x2xf32> to vector<34x2xf32>
    %311 = arith.mulf %309, %310 : vector<34x2xf32>
    %312 = arith.addf %306, %311 : vector<34x2xf32>
    %313 = vector.extract_strided_slice %300 {offsets = [0, 0], sizes = [34, 1], strides = [1, 1]} : vector<34x2xf32> to vector<34x1xf32>
    %314 = vector.extract_strided_slice %292 {offsets = [2, 0], sizes = [1, 2], strides = [1, 1]} : vector<6x2xf32> to vector<1x2xf32>
    %315 = vector.broadcast %313 : vector<34x1xf32> to vector<34x2xf32>
    %316 = vector.broadcast %314 : vector<1x2xf32> to vector<34x2xf32>
    %317 = arith.mulf %315, %316 : vector<34x2xf32>
    %318 = arith.addf %312, %317 : vector<34x2xf32>
    %319 = vector.extract_strided_slice %300 {offsets = [0, 1], sizes = [34, 1], strides = [1, 1]} : vector<34x2xf32> to vector<34x1xf32>
    %320 = vector.extract_strided_slice %292 {offsets = [3, 0], sizes = [1, 2], strides = [1, 1]} : vector<6x2xf32> to vector<1x2xf32>
    %321 = vector.broadcast %319 : vector<34x1xf32> to vector<34x2xf32>
    %322 = vector.broadcast %320 : vector<1x2xf32> to vector<34x2xf32>
    %323 = arith.mulf %321, %322 : vector<34x2xf32>
    %324 = arith.addf %318, %323 : vector<34x2xf32>
    %325 = vector.extract_strided_slice %301 {offsets = [0, 0], sizes = [34, 1], strides = [1, 1]} : vector<34x2xf32> to vector<34x1xf32>
    %326 = vector.extract_strided_slice %292 {offsets = [4, 0], sizes = [1, 2], strides = [1, 1]} : vector<6x2xf32> to vector<1x2xf32>
    %327 = vector.broadcast %325 : vector<34x1xf32> to vector<34x2xf32>
    %328 = vector.broadcast %326 : vector<1x2xf32> to vector<34x2xf32>
    %329 = arith.mulf %327, %328 : vector<34x2xf32>
    %330 = arith.addf %324, %329 : vector<34x2xf32>
    %331 = vector.extract_strided_slice %301 {offsets = [0, 1], sizes = [34, 1], strides = [1, 1]} : vector<34x2xf32> to vector<34x1xf32>
    %332 = vector.extract_strided_slice %292 {offsets = [5, 0], sizes = [1, 2], strides = [1, 1]} : vector<6x2xf32> to vector<1x2xf32>
    %333 = vector.broadcast %331 : vector<34x1xf32> to vector<34x2xf32>
    %334 = vector.broadcast %332 : vector<1x2xf32> to vector<34x2xf32>
    %335 = arith.mulf %333, %334 : vector<34x2xf32>
    %336 = arith.addf %330, %335 : vector<34x2xf32>
    %337 = vector.broadcast %293 : vector<1x2xf32> to vector<34x2xf32>
    %338 = arith.addf %336, %337 : vector<34x2xf32>
    %339 = vector.extract_strided_slice %338 {offsets = [0, 0], sizes = [16, 2], strides = [1, 1]} : vector<34x2xf32> to vector<16x2xf32>
    %340 = vector.extract_strided_slice %338 {offsets = [18, 0], sizes = [16, 2], strides = [1, 1]} : vector<34x2xf32> to vector<16x2xf32>
    %341 = tpu.concatenate %339, %340 in 0 : vector<16x2xf32>, vector<16x2xf32> -> vector<32x2xf32>
    %c40 = arith.constant 40 : index
    %c0_54 = arith.constant 0 : index
    %342 = vector.load %arg1[%c40, %c0_54] : memref<406x128xf32, #tpu.memory_space<vmem>>, vector<1x2xf32>
    %c41 = arith.constant 41 : index
    %c0_55 = arith.constant 0 : index
    %343 = vector.load %arg1[%c41, %c0_55] : memref<406x128xf32, #tpu.memory_space<vmem>>, vector<1x2xf32>
    %cst_56 = arith.constant dense<0.000000e+00> : vector<2xf32>
    %344 = vector.multi_reduction <add>, %341, %cst_56 [0] : vector<32x2xf32> to vector<2xf32>
    %345 = vector.shape_cast %344 : vector<2xf32> to vector<1x2xf32>
    %346 = arith.mulf %341, %341 : vector<32x2xf32>
    %cst_57 = arith.constant dense<0.000000e+00> : vector<2xf32>
    %347 = vector.multi_reduction <add>, %346, %cst_57 [0] : vector<32x2xf32> to vector<2xf32>
    %348 = vector.shape_cast %347 : vector<2xf32> to vector<1x2xf32>
    %cst_58 = arith.constant 3.125000e-02 : f32
    %349 = vector.broadcast %cst_58 : f32 to vector<1x2xf32>
    %350 = arith.mulf %345, %349 : vector<1x2xf32>
    %cst_59 = arith.constant 3.125000e-02 : f32
    %351 = vector.broadcast %cst_59 : f32 to vector<1x2xf32>
    %352 = arith.mulf %348, %351 : vector<1x2xf32>
    %353 = arith.mulf %350, %350 : vector<1x2xf32>
    %354 = arith.subf %352, %353 : vector<1x2xf32>
    %cst_60 = arith.constant 9.99999974E-6 : f32
    %355 = vector.broadcast %cst_60 : f32 to vector<1x2xf32>
    %356 = arith.addf %354, %355 : vector<1x2xf32>
    %357 = math.rsqrt %356 : vector<1x2xf32>
    %358 = arith.mulf %342, %357 : vector<1x2xf32>
    %359 = arith.mulf %350, %358 : vector<1x2xf32>
    %360 = arith.subf %343, %359 : vector<1x2xf32>
    %361 = vector.broadcast %358 : vector<1x2xf32> to vector<32x2xf32>
    %362 = arith.mulf %341, %361 : vector<32x2xf32>
    %363 = vector.broadcast %360 : vector<1x2xf32> to vector<32x2xf32>
    %364 = arith.addf %362, %363 : vector<32x2xf32>
    %365 = arith.addf %364, %216 : vector<32x2xf32>
    %cst_61 = arith.constant 0.000000e+00 : f32
    %366 = vector.broadcast %cst_61 : f32 to vector<32x2xf32>
    %367 = arith.maximumf %365, %366 : vector<32x2xf32>
    %c42 = arith.constant 42 : index
    %c0_62 = arith.constant 0 : index
    %368 = vector.load %arg1[%c42, %c0_62] : memref<406x128xf32, #tpu.memory_space<vmem>>, vector<6x4xf32>
    %c48 = arith.constant 48 : index
    %c0_63 = arith.constant 0 : index
    %369 = vector.load %arg1[%c48, %c0_63] : memref<406x128xf32, #tpu.memory_space<vmem>>, vector<1x4xf32>
    %c0_64 = arith.constant 0 : index
    %c0_65 = arith.constant 0 : index
    %370 = vector.load %arg3[%c0_64, %c0_65] : memref<32x2xf32, #tpu.memory_space<vmem>>, vector<32x2xf32>
    tpu.vector_store %arg3[%c0_64, %c0_65], %367 {strides = array<i32>} : memref<32x2xf32, #tpu.memory_space<vmem>>, vector<32x2xf32>,
    %c0_66 = arith.constant 0 : index
    %c0_67 = arith.constant 0 : index
    %371 = tpu.strided_load %arg3[%c0_66, %c0_67] {strides = array<i32: 2, 1>} : memref<32x2xf32, #tpu.memory_space<vmem>>, vector<16x2xf32>
    %c1 = arith.constant 1 : index
    %c0_68 = arith.constant 0 : index
    %372 = tpu.strided_load %arg3[%c1, %c0_68] {strides = array<i32: 2, 1>} : memref<32x2xf32, #tpu.memory_space<vmem>>, vector<16x2xf32>
    %cst_69 = arith.constant 0.000000e+00 : f32
    %373 = vector.broadcast %cst_69 : f32 to vector<1x2xf32>
    %374 = vector.extract_strided_slice %372 {offsets = [0, 0], sizes = [7, 2], strides = [1, 1]} : vector<16x2xf32> to vector<7x2xf32>
    %375 = vector.extract_strided_slice %372 {offsets = [8, 0], sizes = [7, 2], strides = [1, 1]} : vector<16x2xf32> to vector<7x2xf32>
    %376 = tpu.concatenate %373, %374, %373, %375 in 0 : vector<1x2xf32>, vector<7x2xf32>, vector<1x2xf32>, vector<7x2xf32> -> vector<16x2xf32>
    %377 = vector.extract_strided_slice %376 {offsets = [0, 0], sizes = [16, 1], strides = [1, 1]} : vector<16x2xf32> to vector<16x1xf32>
    %378 = vector.extract_strided_slice %368 {offsets = [0, 0], sizes = [1, 4], strides = [1, 1]} : vector<6x4xf32> to vector<1x4xf32>
    %379 = vector.broadcast %377 : vector<16x1xf32> to vector<16x4xf32>
    %380 = vector.broadcast %378 : vector<1x4xf32> to vector<16x4xf32>
    %381 = arith.mulf %379, %380 : vector<16x4xf32>
    %382 = vector.extract_strided_slice %376 {offsets = [0, 1], sizes = [16, 1], strides = [1, 1]} : vector<16x2xf32> to vector<16x1xf32>
    %383 = vector.extract_strided_slice %368 {offsets = [1, 0], sizes = [1, 4], strides = [1, 1]} : vector<6x4xf32> to vector<1x4xf32>
    %384 = vector.broadcast %382 : vector<16x1xf32> to vector<16x4xf32>
    %385 = vector.broadcast %383 : vector<1x4xf32> to vector<16x4xf32>
    %386 = arith.mulf %384, %385 : vector<16x4xf32>
    %387 = arith.addf %381, %386 : vector<16x4xf32>
    %388 = vector.extract_strided_slice %371 {offsets = [0, 0], sizes = [16, 1], strides = [1, 1]} : vector<16x2xf32> to vector<16x1xf32>
    %389 = vector.extract_strided_slice %368 {offsets = [2, 0], sizes = [1, 4], strides = [1, 1]} : vector<6x4xf32> to vector<1x4xf32>
    %390 = vector.broadcast %388 : vector<16x1xf32> to vector<16x4xf32>
    %391 = vector.broadcast %389 : vector<1x4xf32> to vector<16x4xf32>
    %392 = arith.mulf %390, %391 : vector<16x4xf32>
    %393 = arith.addf %387, %392 : vector<16x4xf32>
    %394 = vector.extract_strided_slice %371 {offsets = [0, 1], sizes = [16, 1], strides = [1, 1]} : vector<16x2xf32> to vector<16x1xf32>
    %395 = vector.extract_strided_slice %368 {offsets = [3, 0], sizes = [1, 4], strides = [1, 1]} : vector<6x4xf32> to vector<1x4xf32>
    %396 = vector.broadcast %394 : vector<16x1xf32> to vector<16x4xf32>
    %397 = vector.broadcast %395 : vector<1x4xf32> to vector<16x4xf32>
    %398 = arith.mulf %396, %397 : vector<16x4xf32>
    %399 = arith.addf %393, %398 : vector<16x4xf32>
    %400 = vector.extract_strided_slice %372 {offsets = [0, 0], sizes = [16, 1], strides = [1, 1]} : vector<16x2xf32> to vector<16x1xf32>
    %401 = vector.extract_strided_slice %368 {offsets = [4, 0], sizes = [1, 4], strides = [1, 1]} : vector<6x4xf32> to vector<1x4xf32>
    %402 = vector.broadcast %400 : vector<16x1xf32> to vector<16x4xf32>
    %403 = vector.broadcast %401 : vector<1x4xf32> to vector<16x4xf32>
    %404 = arith.mulf %402, %403 : vector<16x4xf32>
    %405 = arith.addf %399, %404 : vector<16x4xf32>
    %406 = vector.extract_strided_slice %372 {offsets = [0, 1], sizes = [16, 1], strides = [1, 1]} : vector<16x2xf32> to vector<16x1xf32>
    %407 = vector.extract_strided_slice %368 {offsets = [5, 0], sizes = [1, 4], strides = [1, 1]} : vector<6x4xf32> to vector<1x4xf32>
    %408 = vector.broadcast %406 : vector<16x1xf32> to vector<16x4xf32>
    %409 = vector.broadcast %407 : vector<1x4xf32> to vector<16x4xf32>
    %410 = arith.mulf %408, %409 : vector<16x4xf32>
    %411 = arith.addf %405, %410 : vector<16x4xf32>
    %412 = vector.broadcast %369 : vector<1x4xf32> to vector<16x4xf32>
    %413 = arith.addf %411, %412 : vector<16x4xf32>
    %c49 = arith.constant 49 : index
    %c0_70 = arith.constant 0 : index
    %414 = vector.load %arg1[%c49, %c0_70] : memref<406x128xf32, #tpu.memory_space<vmem>>, vector<1x4xf32>
    %c50 = arith.constant 50 : index
    %c0_71 = arith.constant 0 : index
    %415 = vector.load %arg1[%c50, %c0_71] : memref<406x128xf32, #tpu.memory_space<vmem>>, vector<1x4xf32>
    %cst_72 = arith.constant dense<0.000000e+00> : vector<4xf32>
    %416 = vector.multi_reduction <add>, %413, %cst_72 [0] : vector<16x4xf32> to vector<4xf32>
    %417 = vector.shape_cast %416 : vector<4xf32> to vector<1x4xf32>
    %418 = arith.mulf %413, %413 : vector<16x4xf32>
    %cst_73 = arith.constant dense<0.000000e+00> : vector<4xf32>
    %419 = vector.multi_reduction <add>, %418, %cst_73 [0] : vector<16x4xf32> to vector<4xf32>
    %420 = vector.shape_cast %419 : vector<4xf32> to vector<1x4xf32>
    %cst_74 = arith.constant 6.250000e-02 : f32
    %421 = vector.broadcast %cst_74 : f32 to vector<1x4xf32>
    %422 = arith.mulf %417, %421 : vector<1x4xf32>
    %cst_75 = arith.constant 6.250000e-02 : f32
    %423 = vector.broadcast %cst_75 : f32 to vector<1x4xf32>
    %424 = arith.mulf %420, %423 : vector<1x4xf32>
    %425 = arith.mulf %422, %422 : vector<1x4xf32>
    %426 = arith.subf %424, %425 : vector<1x4xf32>
    %cst_76 = arith.constant 9.99999974E-6 : f32
    %427 = vector.broadcast %cst_76 : f32 to vector<1x4xf32>
    %428 = arith.addf %426, %427 : vector<1x4xf32>
    %429 = math.rsqrt %428 : vector<1x4xf32>
    %430 = arith.mulf %414, %429 : vector<1x4xf32>
    %431 = arith.mulf %422, %430 : vector<1x4xf32>
    %432 = arith.subf %415, %431 : vector<1x4xf32>
    %433 = vector.broadcast %430 : vector<1x4xf32> to vector<16x4xf32>
    %434 = arith.mulf %413, %433 : vector<16x4xf32>
    %435 = vector.broadcast %432 : vector<1x4xf32> to vector<16x4xf32>
    %436 = arith.addf %434, %435 : vector<16x4xf32>
    %cst_77 = arith.constant 0.000000e+00 : f32
    %437 = vector.broadcast %cst_77 : f32 to vector<16x4xf32>
    %438 = arith.maximumf %436, %437 : vector<16x4xf32>
    %c51 = arith.constant 51 : index
    %c0_78 = arith.constant 0 : index
    %439 = vector.load %arg1[%c51, %c0_78] : memref<406x128xf32, #tpu.memory_space<vmem>>, vector<12x4xf32>
    %c63 = arith.constant 63 : index
    %c0_79 = arith.constant 0 : index
    %440 = vector.load %arg1[%c63, %c0_79] : memref<406x128xf32, #tpu.memory_space<vmem>>, vector<1x4xf32>
    %cst_80 = arith.constant 0.000000e+00 : f32
    %441 = vector.broadcast %cst_80 : f32 to vector<1x4xf32>
    %cst_81 = arith.constant 0.000000e+00 : f32
    %442 = vector.broadcast %cst_81 : f32 to vector<2x4xf32>
    %443 = vector.extract_strided_slice %438 {offsets = [0, 0], sizes = [8, 4], strides = [1, 1]} : vector<16x4xf32> to vector<8x4xf32>
    %444 = vector.extract_strided_slice %438 {offsets = [8, 0], sizes = [8, 4], strides = [1, 1]} : vector<16x4xf32> to vector<8x4xf32>
    %445 = tpu.concatenate %441, %443, %442, %444, %441 in 0 : vector<1x4xf32>, vector<8x4xf32>, vector<2x4xf32>, vector<8x4xf32>, vector<1x4xf32> -> vector<20x4xf32>
    %446 = vector.extract_strided_slice %445 {offsets = [0, 0], sizes = [18, 4], strides = [1, 1]} : vector<20x4xf32> to vector<18x4xf32>
    %447 = vector.extract_strided_slice %445 {offsets = [1, 0], sizes = [18, 4], strides = [1, 1]} : vector<20x4xf32> to vector<18x4xf32>
    %448 = vector.extract_strided_slice %445 {offsets = [2, 0], sizes = [18, 4], strides = [1, 1]} : vector<20x4xf32> to vector<18x4xf32>
    %449 = tpu.concatenate %446, %447, %448 in 1 : vector<18x4xf32>, vector<18x4xf32>, vector<18x4xf32> -> vector<18x12xf32>
    %cst_82 = arith.constant dense<0.000000e+00> : vector<18x4xf32>
    %450 = tpu.matmul %449, %439, %cst_82 {dimension_numbers = #tpu.dot_dimension_numbers<[1], [0], [0], [1], [0, 0, 1, 1], [], []>} : vector<18x12xf32>, vector<12x4xf32>, vector<18x4xf32> -> vector<18x4xf32>
    %451 = vector.broadcast %440 : vector<1x4xf32> to vector<18x4xf32>
    %452 = arith.addf %450, %451 : vector<18x4xf32>
    %453 = vector.extract_strided_slice %452 {offsets = [0, 0], sizes = [8, 4], strides = [1, 1]} : vector<18x4xf32> to vector<8x4xf32>
    %454 = vector.extract_strided_slice %452 {offsets = [10, 0], sizes = [8, 4], strides = [1, 1]} : vector<18x4xf32> to vector<8x4xf32>
    %455 = tpu.concatenate %453, %454 in 0 : vector<8x4xf32>, vector<8x4xf32> -> vector<16x4xf32>
    %c64 = arith.constant 64 : index
    %c0_83 = arith.constant 0 : index
    %456 = vector.load %arg1[%c64, %c0_83] : memref<406x128xf32, #tpu.memory_space<vmem>>, vector<1x4xf32>
    %c65 = arith.constant 65 : index
    %c0_84 = arith.constant 0 : index
    %457 = vector.load %arg1[%c65, %c0_84] : memref<406x128xf32, #tpu.memory_space<vmem>>, vector<1x4xf32>
    %cst_85 = arith.constant dense<0.000000e+00> : vector<4xf32>
    %458 = vector.multi_reduction <add>, %455, %cst_85 [0] : vector<16x4xf32> to vector<4xf32>
    %459 = vector.shape_cast %458 : vector<4xf32> to vector<1x4xf32>
    %460 = arith.mulf %455, %455 : vector<16x4xf32>
    %cst_86 = arith.constant dense<0.000000e+00> : vector<4xf32>
    %461 = vector.multi_reduction <add>, %460, %cst_86 [0] : vector<16x4xf32> to vector<4xf32>
    %462 = vector.shape_cast %461 : vector<4xf32> to vector<1x4xf32>
    %cst_87 = arith.constant 6.250000e-02 : f32
    %463 = vector.broadcast %cst_87 : f32 to vector<1x4xf32>
    %464 = arith.mulf %459, %463 : vector<1x4xf32>
    %cst_88 = arith.constant 6.250000e-02 : f32
    %465 = vector.broadcast %cst_88 : f32 to vector<1x4xf32>
    %466 = arith.mulf %462, %465 : vector<1x4xf32>
    %467 = arith.mulf %464, %464 : vector<1x4xf32>
    %468 = arith.subf %466, %467 : vector<1x4xf32>
    %cst_89 = arith.constant 9.99999974E-6 : f32
    %469 = vector.broadcast %cst_89 : f32 to vector<1x4xf32>
    %470 = arith.addf %468, %469 : vector<1x4xf32>
    %471 = math.rsqrt %470 : vector<1x4xf32>
    %472 = arith.mulf %456, %471 : vector<1x4xf32>
    %473 = arith.mulf %464, %472 : vector<1x4xf32>
    %474 = arith.subf %457, %473 : vector<1x4xf32>
    %475 = vector.broadcast %472 : vector<1x4xf32> to vector<16x4xf32>
    %476 = arith.mulf %455, %475 : vector<16x4xf32>
    %477 = vector.broadcast %474 : vector<1x4xf32> to vector<16x4xf32>
    %478 = arith.addf %476, %477 : vector<16x4xf32>
    %c66 = arith.constant 66 : index
    %c0_90 = arith.constant 0 : index
    %479 = vector.load %arg1[%c66, %c0_90] : memref<406x128xf32, #tpu.memory_space<vmem>>, vector<2x4xf32>
    %c68 = arith.constant 68 : index
    %c0_91 = arith.constant 0 : index
    %480 = vector.load %arg1[%c68, %c0_91] : memref<406x128xf32, #tpu.memory_space<vmem>>, vector<1x4xf32>
    %481 = vector.extract_strided_slice %371 {offsets = [0, 0], sizes = [16, 1], strides = [1, 1]} : vector<16x2xf32> to vector<16x1xf32>
    %482 = vector.extract_strided_slice %479 {offsets = [0, 0], sizes = [1, 4], strides = [1, 1]} : vector<2x4xf32> to vector<1x4xf32>
    %483 = vector.broadcast %481 : vector<16x1xf32> to vector<16x4xf32>
    %484 = vector.broadcast %482 : vector<1x4xf32> to vector<16x4xf32>
    %485 = arith.mulf %483, %484 : vector<16x4xf32>
    %486 = vector.extract_strided_slice %371 {offsets = [0, 1], sizes = [16, 1], strides = [1, 1]} : vector<16x2xf32> to vector<16x1xf32>
    %487 = vector.extract_strided_slice %479 {offsets = [1, 0], sizes = [1, 4], strides = [1, 1]} : vector<2x4xf32> to vector<1x4xf32>
    %488 = vector.broadcast %486 : vector<16x1xf32> to vector<16x4xf32>
    %489 = vector.broadcast %487 : vector<1x4xf32> to vector<16x4xf32>
    %490 = arith.mulf %488, %489 : vector<16x4xf32>
    %491 = arith.addf %485, %490 : vector<16x4xf32>
    %492 = vector.broadcast %480 : vector<1x4xf32> to vector<16x4xf32>
    %493 = arith.addf %491, %492 : vector<16x4xf32>
    %494 = arith.addf %478, %493 : vector<16x4xf32>
    %cst_92 = arith.constant 0.000000e+00 : f32
    %495 = vector.broadcast %cst_92 : f32 to vector<16x4xf32>
    %496 = arith.maximumf %494, %495 : vector<16x4xf32>
    %c69 = arith.constant 69 : index
    %c0_93 = arith.constant 0 : index
    %497 = vector.load %arg1[%c69, %c0_93] : memref<406x128xf32, #tpu.memory_space<vmem>>, vector<12x4xf32>
    %c81 = arith.constant 81 : index
    %c0_94 = arith.constant 0 : index
    %498 = vector.load %arg1[%c81, %c0_94] : memref<406x128xf32, #tpu.memory_space<vmem>>, vector<1x4xf32>
    %cst_95 = arith.constant 0.000000e+00 : f32
    %499 = vector.broadcast %cst_95 : f32 to vector<1x4xf32>
    %cst_96 = arith.constant 0.000000e+00 : f32
    %500 = vector.broadcast %cst_96 : f32 to vector<2x4xf32>
    %501 = vector.extract_strided_slice %496 {offsets = [0, 0], sizes = [8, 4], strides = [1, 1]} : vector<16x4xf32> to vector<8x4xf32>
    %502 = vector.extract_strided_slice %496 {offsets = [8, 0], sizes = [8, 4], strides = [1, 1]} : vector<16x4xf32> to vector<8x4xf32>
    %503 = tpu.concatenate %499, %501, %500, %502, %499 in 0 : vector<1x4xf32>, vector<8x4xf32>, vector<2x4xf32>, vector<8x4xf32>, vector<1x4xf32> -> vector<20x4xf32>
    %504 = vector.extract_strided_slice %503 {offsets = [0, 0], sizes = [18, 4], strides = [1, 1]} : vector<20x4xf32> to vector<18x4xf32>
    %505 = vector.extract_strided_slice %503 {offsets = [1, 0], sizes = [18, 4], strides = [1, 1]} : vector<20x4xf32> to vector<18x4xf32>
    %506 = vector.extract_strided_slice %503 {offsets = [2, 0], sizes = [18, 4], strides = [1, 1]} : vector<20x4xf32> to vector<18x4xf32>
    %507 = tpu.concatenate %504, %505, %506 in 1 : vector<18x4xf32>, vector<18x4xf32>, vector<18x4xf32> -> vector<18x12xf32>
    %cst_97 = arith.constant dense<0.000000e+00> : vector<18x4xf32>
    %508 = tpu.matmul %507, %497, %cst_97 {dimension_numbers = #tpu.dot_dimension_numbers<[1], [0], [0], [1], [0, 0, 1, 1], [], []>} : vector<18x12xf32>, vector<12x4xf32>, vector<18x4xf32> -> vector<18x4xf32>
    %509 = vector.broadcast %498 : vector<1x4xf32> to vector<18x4xf32>
    %510 = arith.addf %508, %509 : vector<18x4xf32>
    %511 = vector.extract_strided_slice %510 {offsets = [0, 0], sizes = [8, 4], strides = [1, 1]} : vector<18x4xf32> to vector<8x4xf32>
    %512 = vector.extract_strided_slice %510 {offsets = [10, 0], sizes = [8, 4], strides = [1, 1]} : vector<18x4xf32> to vector<8x4xf32>
    %513 = tpu.concatenate %511, %512 in 0 : vector<8x4xf32>, vector<8x4xf32> -> vector<16x4xf32>
    %c82 = arith.constant 82 : index
    %c0_98 = arith.constant 0 : index
    %514 = vector.load %arg1[%c82, %c0_98] : memref<406x128xf32, #tpu.memory_space<vmem>>, vector<1x4xf32>
    %c83 = arith.constant 83 : index
    %c0_99 = arith.constant 0 : index
    %515 = vector.load %arg1[%c83, %c0_99] : memref<406x128xf32, #tpu.memory_space<vmem>>, vector<1x4xf32>
    %cst_100 = arith.constant dense<0.000000e+00> : vector<4xf32>
    %516 = vector.multi_reduction <add>, %513, %cst_100 [0] : vector<16x4xf32> to vector<4xf32>
    %517 = vector.shape_cast %516 : vector<4xf32> to vector<1x4xf32>
    %518 = arith.mulf %513, %513 : vector<16x4xf32>
    %cst_101 = arith.constant dense<0.000000e+00> : vector<4xf32>
    %519 = vector.multi_reduction <add>, %518, %cst_101 [0] : vector<16x4xf32> to vector<4xf32>
    %520 = vector.shape_cast %519 : vector<4xf32> to vector<1x4xf32>
    %cst_102 = arith.constant 6.250000e-02 : f32
    %521 = vector.broadcast %cst_102 : f32 to vector<1x4xf32>
    %522 = arith.mulf %517, %521 : vector<1x4xf32>
    %cst_103 = arith.constant 6.250000e-02 : f32
    %523 = vector.broadcast %cst_103 : f32 to vector<1x4xf32>
    %524 = arith.mulf %520, %523 : vector<1x4xf32>
    %525 = arith.mulf %522, %522 : vector<1x4xf32>
    %526 = arith.subf %524, %525 : vector<1x4xf32>
    %cst_104 = arith.constant 9.99999974E-6 : f32
    %527 = vector.broadcast %cst_104 : f32 to vector<1x4xf32>
    %528 = arith.addf %526, %527 : vector<1x4xf32>
    %529 = math.rsqrt %528 : vector<1x4xf32>
    %530 = arith.mulf %514, %529 : vector<1x4xf32>
    %531 = arith.mulf %522, %530 : vector<1x4xf32>
    %532 = arith.subf %515, %531 : vector<1x4xf32>
    %533 = vector.broadcast %530 : vector<1x4xf32> to vector<16x4xf32>
    %534 = arith.mulf %513, %533 : vector<16x4xf32>
    %535 = vector.broadcast %532 : vector<1x4xf32> to vector<16x4xf32>
    %536 = arith.addf %534, %535 : vector<16x4xf32>
    %cst_105 = arith.constant 0.000000e+00 : f32
    %537 = vector.broadcast %cst_105 : f32 to vector<16x4xf32>
    %538 = arith.maximumf %536, %537 : vector<16x4xf32>
    %c84 = arith.constant 84 : index
    %c0_106 = arith.constant 0 : index
    %539 = vector.load %arg1[%c84, %c0_106] : memref<406x128xf32, #tpu.memory_space<vmem>>, vector<12x4xf32>
    %c96 = arith.constant 96 : index
    %c0_107 = arith.constant 0 : index
    %540 = vector.load %arg1[%c96, %c0_107] : memref<406x128xf32, #tpu.memory_space<vmem>>, vector<1x4xf32>
    %cst_108 = arith.constant 0.000000e+00 : f32
    %541 = vector.broadcast %cst_108 : f32 to vector<1x4xf32>
    %cst_109 = arith.constant 0.000000e+00 : f32
    %542 = vector.broadcast %cst_109 : f32 to vector<2x4xf32>
    %543 = vector.extract_strided_slice %538 {offsets = [0, 0], sizes = [8, 4], strides = [1, 1]} : vector<16x4xf32> to vector<8x4xf32>
    %544 = vector.extract_strided_slice %538 {offsets = [8, 0], sizes = [8, 4], strides = [1, 1]} : vector<16x4xf32> to vector<8x4xf32>
    %545 = tpu.concatenate %541, %543, %542, %544, %541 in 0 : vector<1x4xf32>, vector<8x4xf32>, vector<2x4xf32>, vector<8x4xf32>, vector<1x4xf32> -> vector<20x4xf32>
    %546 = vector.extract_strided_slice %545 {offsets = [0, 0], sizes = [18, 4], strides = [1, 1]} : vector<20x4xf32> to vector<18x4xf32>
    %547 = vector.extract_strided_slice %545 {offsets = [1, 0], sizes = [18, 4], strides = [1, 1]} : vector<20x4xf32> to vector<18x4xf32>
    %548 = vector.extract_strided_slice %545 {offsets = [2, 0], sizes = [18, 4], strides = [1, 1]} : vector<20x4xf32> to vector<18x4xf32>
    %549 = tpu.concatenate %546, %547, %548 in 1 : vector<18x4xf32>, vector<18x4xf32>, vector<18x4xf32> -> vector<18x12xf32>
    %cst_110 = arith.constant dense<0.000000e+00> : vector<18x4xf32>
    %550 = tpu.matmul %549, %539, %cst_110 {dimension_numbers = #tpu.dot_dimension_numbers<[1], [0], [0], [1], [0, 0, 1, 1], [], []>} : vector<18x12xf32>, vector<12x4xf32>, vector<18x4xf32> -> vector<18x4xf32>
    %551 = vector.broadcast %540 : vector<1x4xf32> to vector<18x4xf32>
    %552 = arith.addf %550, %551 : vector<18x4xf32>
    %553 = vector.extract_strided_slice %552 {offsets = [0, 0], sizes = [8, 4], strides = [1, 1]} : vector<18x4xf32> to vector<8x4xf32>
    %554 = vector.extract_strided_slice %552 {offsets = [10, 0], sizes = [8, 4], strides = [1, 1]} : vector<18x4xf32> to vector<8x4xf32>
    %555 = tpu.concatenate %553, %554 in 0 : vector<8x4xf32>, vector<8x4xf32> -> vector<16x4xf32>
    %c97 = arith.constant 97 : index
    %c0_111 = arith.constant 0 : index
    %556 = vector.load %arg1[%c97, %c0_111] : memref<406x128xf32, #tpu.memory_space<vmem>>, vector<1x4xf32>
    %c98 = arith.constant 98 : index
    %c0_112 = arith.constant 0 : index
    %557 = vector.load %arg1[%c98, %c0_112] : memref<406x128xf32, #tpu.memory_space<vmem>>, vector<1x4xf32>
    %cst_113 = arith.constant dense<0.000000e+00> : vector<4xf32>
    %558 = vector.multi_reduction <add>, %555, %cst_113 [0] : vector<16x4xf32> to vector<4xf32>
    %559 = vector.shape_cast %558 : vector<4xf32> to vector<1x4xf32>
    %560 = arith.mulf %555, %555 : vector<16x4xf32>
    %cst_114 = arith.constant dense<0.000000e+00> : vector<4xf32>
    %561 = vector.multi_reduction <add>, %560, %cst_114 [0] : vector<16x4xf32> to vector<4xf32>
    %562 = vector.shape_cast %561 : vector<4xf32> to vector<1x4xf32>
    %cst_115 = arith.constant 6.250000e-02 : f32
    %563 = vector.broadcast %cst_115 : f32 to vector<1x4xf32>
    %564 = arith.mulf %559, %563 : vector<1x4xf32>
    %cst_116 = arith.constant 6.250000e-02 : f32
    %565 = vector.broadcast %cst_116 : f32 to vector<1x4xf32>
    %566 = arith.mulf %562, %565 : vector<1x4xf32>
    %567 = arith.mulf %564, %564 : vector<1x4xf32>
    %568 = arith.subf %566, %567 : vector<1x4xf32>
    %cst_117 = arith.constant 9.99999974E-6 : f32
    %569 = vector.broadcast %cst_117 : f32 to vector<1x4xf32>
    %570 = arith.addf %568, %569 : vector<1x4xf32>
    %571 = math.rsqrt %570 : vector<1x4xf32>
    %572 = arith.mulf %556, %571 : vector<1x4xf32>
    %573 = arith.mulf %564, %572 : vector<1x4xf32>
    %574 = arith.subf %557, %573 : vector<1x4xf32>
    %575 = vector.broadcast %572 : vector<1x4xf32> to vector<16x4xf32>
    %576 = arith.mulf %555, %575 : vector<16x4xf32>
    %577 = vector.broadcast %574 : vector<1x4xf32> to vector<16x4xf32>
    %578 = arith.addf %576, %577 : vector<16x4xf32>
    %579 = arith.addf %578, %496 : vector<16x4xf32>
    %cst_118 = arith.constant 0.000000e+00 : f32
    %580 = vector.broadcast %cst_118 : f32 to vector<16x4xf32>
    %581 = arith.maximumf %579, %580 : vector<16x4xf32>
    %c99 = arith.constant 99 : index
    %c0_119 = arith.constant 0 : index
    %582 = vector.load %arg1[%c99, %c0_119] : memref<406x128xf32, #tpu.memory_space<vmem>>, vector<12x8xf32>
    %c111 = arith.constant 111 : index
    %c0_120 = arith.constant 0 : index
    %583 = vector.load %arg1[%c111, %c0_120] : memref<406x128xf32, #tpu.memory_space<vmem>>, vector<1x8xf32>
    %c0_121 = arith.constant 0 : index
    %c0_122 = arith.constant 0 : index
    %584 = vector.load %arg4[%c0_121, %c0_122] : memref<16x4xf32, #tpu.memory_space<vmem>>, vector<16x4xf32>
    tpu.vector_store %arg4[%c0_121, %c0_122], %581 {strides = array<i32>} : memref<16x4xf32, #tpu.memory_space<vmem>>, vector<16x4xf32>,
    %c0_123 = arith.constant 0 : index
    %c0_124 = arith.constant 0 : index
    %585 = tpu.strided_load %arg4[%c0_123, %c0_124] {strides = array<i32: 2, 1>} : memref<16x4xf32, #tpu.memory_space<vmem>>, vector<8x4xf32>
    %c1_125 = arith.constant 1 : index
    %c0_126 = arith.constant 0 : index
    %586 = tpu.strided_load %arg4[%c1_125, %c0_126] {strides = array<i32: 2, 1>} : memref<16x4xf32, #tpu.memory_space<vmem>>, vector<8x4xf32>
    %cst_127 = arith.constant 0.000000e+00 : f32
    %587 = vector.broadcast %cst_127 : f32 to vector<1x4xf32>
    %588 = vector.extract_strided_slice %586 {offsets = [0, 0], sizes = [3, 4], strides = [1, 1]} : vector<8x4xf32> to vector<3x4xf32>
    %589 = vector.extract_strided_slice %586 {offsets = [4, 0], sizes = [3, 4], strides = [1, 1]} : vector<8x4xf32> to vector<3x4xf32>
    %590 = tpu.concatenate %587, %588, %587, %589 in 0 : vector<1x4xf32>, vector<3x4xf32>, vector<1x4xf32>, vector<3x4xf32> -> vector<8x4xf32>
    %591 = tpu.concatenate %590, %585, %586 in 1 : vector<8x4xf32>, vector<8x4xf32>, vector<8x4xf32> -> vector<8x12xf32>
    %cst_128 = arith.constant dense<0.000000e+00> : vector<8x8xf32>
    %592 = tpu.matmul %591, %582, %cst_128 {dimension_numbers = #tpu.dot_dimension_numbers<[1], [0], [0], [1], [0, 0, 1, 1], [], []>} : vector<8x12xf32>, vector<12x8xf32>, vector<8x8xf32> -> vector<8x8xf32>
    %593 = vector.broadcast %583 : vector<1x8xf32> to vector<8x8xf32>
    %594 = arith.addf %592, %593 : vector<8x8xf32>
    %c112 = arith.constant 112 : index
    %c0_129 = arith.constant 0 : index
    %595 = vector.load %arg1[%c112, %c0_129] : memref<406x128xf32, #tpu.memory_space<vmem>>, vector<1x8xf32>
    %c113 = arith.constant 113 : index
    %c0_130 = arith.constant 0 : index
    %596 = vector.load %arg1[%c113, %c0_130] : memref<406x128xf32, #tpu.memory_space<vmem>>, vector<1x8xf32>
    %cst_131 = arith.constant dense<0.000000e+00> : vector<8xf32>
    %597 = vector.multi_reduction <add>, %594, %cst_131 [0] : vector<8x8xf32> to vector<8xf32>
    %598 = vector.shape_cast %597 : vector<8xf32> to vector<1x8xf32>
    %599 = arith.mulf %594, %594 : vector<8x8xf32>
    %cst_132 = arith.constant dense<0.000000e+00> : vector<8xf32>
    %600 = vector.multi_reduction <add>, %599, %cst_132 [0] : vector<8x8xf32> to vector<8xf32>
    %601 = vector.shape_cast %600 : vector<8xf32> to vector<1x8xf32>
    %cst_133 = arith.constant 1.250000e-01 : f32
    %602 = vector.broadcast %cst_133 : f32 to vector<1x8xf32>
    %603 = arith.mulf %598, %602 : vector<1x8xf32>
    %cst_134 = arith.constant 1.250000e-01 : f32
    %604 = vector.broadcast %cst_134 : f32 to vector<1x8xf32>
    %605 = arith.mulf %601, %604 : vector<1x8xf32>
    %606 = arith.mulf %603, %603 : vector<1x8xf32>
    %607 = arith.subf %605, %606 : vector<1x8xf32>
    %cst_135 = arith.constant 9.99999974E-6 : f32
    %608 = vector.broadcast %cst_135 : f32 to vector<1x8xf32>
    %609 = arith.addf %607, %608 : vector<1x8xf32>
    %610 = math.rsqrt %609 : vector<1x8xf32>
    %611 = arith.mulf %595, %610 : vector<1x8xf32>
    %612 = arith.mulf %603, %611 : vector<1x8xf32>
    %613 = arith.subf %596, %612 : vector<1x8xf32>
    %614 = vector.broadcast %611 : vector<1x8xf32> to vector<8x8xf32>
    %615 = arith.mulf %594, %614 : vector<8x8xf32>
    %616 = vector.broadcast %613 : vector<1x8xf32> to vector<8x8xf32>
    %617 = arith.addf %615, %616 : vector<8x8xf32>
    %cst_136 = arith.constant 0.000000e+00 : f32
    %618 = vector.broadcast %cst_136 : f32 to vector<8x8xf32>
    %619 = arith.maximumf %617, %618 : vector<8x8xf32>
    %c114 = arith.constant 114 : index
    %c0_137 = arith.constant 0 : index
    %620 = vector.load %arg1[%c114, %c0_137] : memref<406x128xf32, #tpu.memory_space<vmem>>, vector<24x8xf32>
    %c138 = arith.constant 138 : index
    %c0_138 = arith.constant 0 : index
    %621 = vector.load %arg1[%c138, %c0_138] : memref<406x128xf32, #tpu.memory_space<vmem>>, vector<1x8xf32>
    %cst_139 = arith.constant 0.000000e+00 : f32
    %622 = vector.broadcast %cst_139 : f32 to vector<1x8xf32>
    %cst_140 = arith.constant 0.000000e+00 : f32
    %623 = vector.broadcast %cst_140 : f32 to vector<2x8xf32>
    %624 = vector.extract_strided_slice %619 {offsets = [0, 0], sizes = [4, 8], strides = [1, 1]} : vector<8x8xf32> to vector<4x8xf32>
    %625 = vector.extract_strided_slice %619 {offsets = [4, 0], sizes = [4, 8], strides = [1, 1]} : vector<8x8xf32> to vector<4x8xf32>
    %626 = tpu.concatenate %622, %624, %623, %625, %622 in 0 : vector<1x8xf32>, vector<4x8xf32>, vector<2x8xf32>, vector<4x8xf32>, vector<1x8xf32> -> vector<12x8xf32>
    %627 = vector.extract_strided_slice %626 {offsets = [0, 0], sizes = [10, 8], strides = [1, 1]} : vector<12x8xf32> to vector<10x8xf32>
    %628 = vector.extract_strided_slice %626 {offsets = [1, 0], sizes = [10, 8], strides = [1, 1]} : vector<12x8xf32> to vector<10x8xf32>
    %629 = vector.extract_strided_slice %626 {offsets = [2, 0], sizes = [10, 8], strides = [1, 1]} : vector<12x8xf32> to vector<10x8xf32>
    %630 = tpu.concatenate %627, %628, %629 in 1 : vector<10x8xf32>, vector<10x8xf32>, vector<10x8xf32> -> vector<10x24xf32>
    %cst_141 = arith.constant dense<0.000000e+00> : vector<10x8xf32>
    %631 = tpu.matmul %630, %620, %cst_141 {dimension_numbers = #tpu.dot_dimension_numbers<[1], [0], [0], [1], [0, 0, 1, 1], [], []>} : vector<10x24xf32>, vector<24x8xf32>, vector<10x8xf32> -> vector<10x8xf32>
    %632 = vector.broadcast %621 : vector<1x8xf32> to vector<10x8xf32>
    %633 = arith.addf %631, %632 : vector<10x8xf32>
    %634 = vector.extract_strided_slice %633 {offsets = [0, 0], sizes = [4, 8], strides = [1, 1]} : vector<10x8xf32> to vector<4x8xf32>
    %635 = vector.extract_strided_slice %633 {offsets = [6, 0], sizes = [4, 8], strides = [1, 1]} : vector<10x8xf32> to vector<4x8xf32>
    %636 = tpu.concatenate %634, %635 in 0 : vector<4x8xf32>, vector<4x8xf32> -> vector<8x8xf32>
    %c139 = arith.constant 139 : index
    %c0_142 = arith.constant 0 : index
    %637 = vector.load %arg1[%c139, %c0_142] : memref<406x128xf32, #tpu.memory_space<vmem>>, vector<1x8xf32>
    %c140 = arith.constant 140 : index
    %c0_143 = arith.constant 0 : index
    %638 = vector.load %arg1[%c140, %c0_143] : memref<406x128xf32, #tpu.memory_space<vmem>>, vector<1x8xf32>
    %cst_144 = arith.constant dense<0.000000e+00> : vector<8xf32>
    %639 = vector.multi_reduction <add>, %636, %cst_144 [0] : vector<8x8xf32> to vector<8xf32>
    %640 = vector.shape_cast %639 : vector<8xf32> to vector<1x8xf32>
    %641 = arith.mulf %636, %636 : vector<8x8xf32>
    %cst_145 = arith.constant dense<0.000000e+00> : vector<8xf32>
    %642 = vector.multi_reduction <add>, %641, %cst_145 [0] : vector<8x8xf32> to vector<8xf32>
    %643 = vector.shape_cast %642 : vector<8xf32> to vector<1x8xf32>
    %cst_146 = arith.constant 1.250000e-01 : f32
    %644 = vector.broadcast %cst_146 : f32 to vector<1x8xf32>
    %645 = arith.mulf %640, %644 : vector<1x8xf32>
    %cst_147 = arith.constant 1.250000e-01 : f32
    %646 = vector.broadcast %cst_147 : f32 to vector<1x8xf32>
    %647 = arith.mulf %643, %646 : vector<1x8xf32>
    %648 = arith.mulf %645, %645 : vector<1x8xf32>
    %649 = arith.subf %647, %648 : vector<1x8xf32>
    %cst_148 = arith.constant 9.99999974E-6 : f32
    %650 = vector.broadcast %cst_148 : f32 to vector<1x8xf32>
    %651 = arith.addf %649, %650 : vector<1x8xf32>
    %652 = math.rsqrt %651 : vector<1x8xf32>
    %653 = arith.mulf %637, %652 : vector<1x8xf32>
    %654 = arith.mulf %645, %653 : vector<1x8xf32>
    %655 = arith.subf %638, %654 : vector<1x8xf32>
    %656 = vector.broadcast %653 : vector<1x8xf32> to vector<8x8xf32>
    %657 = arith.mulf %636, %656 : vector<8x8xf32>
    %658 = vector.broadcast %655 : vector<1x8xf32> to vector<8x8xf32>
    %659 = arith.addf %657, %658 : vector<8x8xf32>
    %c141 = arith.constant 141 : index
    %c0_149 = arith.constant 0 : index
    %660 = vector.load %arg1[%c141, %c0_149] : memref<406x128xf32, #tpu.memory_space<vmem>>, vector<4x8xf32>
    %c145 = arith.constant 145 : index
    %c0_150 = arith.constant 0 : index
    %661 = vector.load %arg1[%c145, %c0_150] : memref<406x128xf32, #tpu.memory_space<vmem>>, vector<1x8xf32>
    %662 = vector.extract_strided_slice %585 {offsets = [0, 0], sizes = [8, 1], strides = [1, 1]} : vector<8x4xf32> to vector<8x1xf32>
    %663 = vector.extract_strided_slice %660 {offsets = [0, 0], sizes = [1, 8], strides = [1, 1]} : vector<4x8xf32> to vector<1x8xf32>
    %664 = vector.broadcast %662 : vector<8x1xf32> to vector<8x8xf32>
    %665 = vector.broadcast %663 : vector<1x8xf32> to vector<8x8xf32>
    %666 = arith.mulf %664, %665 : vector<8x8xf32>
    %667 = vector.extract_strided_slice %585 {offsets = [0, 1], sizes = [8, 1], strides = [1, 1]} : vector<8x4xf32> to vector<8x1xf32>
    %668 = vector.extract_strided_slice %660 {offsets = [1, 0], sizes = [1, 8], strides = [1, 1]} : vector<4x8xf32> to vector<1x8xf32>
    %669 = vector.broadcast %667 : vector<8x1xf32> to vector<8x8xf32>
    %670 = vector.broadcast %668 : vector<1x8xf32> to vector<8x8xf32>
    %671 = arith.mulf %669, %670 : vector<8x8xf32>
    %672 = arith.addf %666, %671 : vector<8x8xf32>
    %673 = vector.extract_strided_slice %585 {offsets = [0, 2], sizes = [8, 1], strides = [1, 1]} : vector<8x4xf32> to vector<8x1xf32>
    %674 = vector.extract_strided_slice %660 {offsets = [2, 0], sizes = [1, 8], strides = [1, 1]} : vector<4x8xf32> to vector<1x8xf32>
    %675 = vector.broadcast %673 : vector<8x1xf32> to vector<8x8xf32>
    %676 = vector.broadcast %674 : vector<1x8xf32> to vector<8x8xf32>
    %677 = arith.mulf %675, %676 : vector<8x8xf32>
    %678 = arith.addf %672, %677 : vector<8x8xf32>
    %679 = vector.extract_strided_slice %585 {offsets = [0, 3], sizes = [8, 1], strides = [1, 1]} : vector<8x4xf32> to vector<8x1xf32>
    %680 = vector.extract_strided_slice %660 {offsets = [3, 0], sizes = [1, 8], strides = [1, 1]} : vector<4x8xf32> to vector<1x8xf32>
    %681 = vector.broadcast %679 : vector<8x1xf32> to vector<8x8xf32>
    %682 = vector.broadcast %680 : vector<1x8xf32> to vector<8x8xf32>
    %683 = arith.mulf %681, %682 : vector<8x8xf32>
    %684 = arith.addf %678, %683 : vector<8x8xf32>
    %685 = vector.broadcast %661 : vector<1x8xf32> to vector<8x8xf32>
    %686 = arith.addf %684, %685 : vector<8x8xf32>
    %687 = arith.addf %659, %686 : vector<8x8xf32>
    %cst_151 = arith.constant 0.000000e+00 : f32
    %688 = vector.broadcast %cst_151 : f32 to vector<8x8xf32>
    %689 = arith.maximumf %687, %688 : vector<8x8xf32>
    %c146 = arith.constant 146 : index
    %c0_152 = arith.constant 0 : index
    %690 = vector.load %arg1[%c146, %c0_152] : memref<406x128xf32, #tpu.memory_space<vmem>>, vector<24x8xf32>
    %c170 = arith.constant 170 : index
    %c0_153 = arith.constant 0 : index
    %691 = vector.load %arg1[%c170, %c0_153] : memref<406x128xf32, #tpu.memory_space<vmem>>, vector<1x8xf32>
    %cst_154 = arith.constant 0.000000e+00 : f32
    %692 = vector.broadcast %cst_154 : f32 to vector<1x8xf32>
    %cst_155 = arith.constant 0.000000e+00 : f32
    %693 = vector.broadcast %cst_155 : f32 to vector<2x8xf32>
    %694 = vector.extract_strided_slice %689 {offsets = [0, 0], sizes = [4, 8], strides = [1, 1]} : vector<8x8xf32> to vector<4x8xf32>
    %695 = vector.extract_strided_slice %689 {offsets = [4, 0], sizes = [4, 8], strides = [1, 1]} : vector<8x8xf32> to vector<4x8xf32>
    %696 = tpu.concatenate %692, %694, %693, %695, %692 in 0 : vector<1x8xf32>, vector<4x8xf32>, vector<2x8xf32>, vector<4x8xf32>, vector<1x8xf32> -> vector<12x8xf32>
    %697 = vector.extract_strided_slice %696 {offsets = [0, 0], sizes = [10, 8], strides = [1, 1]} : vector<12x8xf32> to vector<10x8xf32>
    %698 = vector.extract_strided_slice %696 {offsets = [1, 0], sizes = [10, 8], strides = [1, 1]} : vector<12x8xf32> to vector<10x8xf32>
    %699 = vector.extract_strided_slice %696 {offsets = [2, 0], sizes = [10, 8], strides = [1, 1]} : vector<12x8xf32> to vector<10x8xf32>
    %700 = tpu.concatenate %697, %698, %699 in 1 : vector<10x8xf32>, vector<10x8xf32>, vector<10x8xf32> -> vector<10x24xf32>
    %cst_156 = arith.constant dense<0.000000e+00> : vector<10x8xf32>
    %701 = tpu.matmul %700, %690, %cst_156 {dimension_numbers = #tpu.dot_dimension_numbers<[1], [0], [0], [1], [0, 0, 1, 1], [], []>} : vector<10x24xf32>, vector<24x8xf32>, vector<10x8xf32> -> vector<10x8xf32>
    %702 = vector.broadcast %691 : vector<1x8xf32> to vector<10x8xf32>
    %703 = arith.addf %701, %702 : vector<10x8xf32>
    %704 = vector.extract_strided_slice %703 {offsets = [0, 0], sizes = [4, 8], strides = [1, 1]} : vector<10x8xf32> to vector<4x8xf32>
    %705 = vector.extract_strided_slice %703 {offsets = [6, 0], sizes = [4, 8], strides = [1, 1]} : vector<10x8xf32> to vector<4x8xf32>
    %706 = tpu.concatenate %704, %705 in 0 : vector<4x8xf32>, vector<4x8xf32> -> vector<8x8xf32>
    %c171 = arith.constant 171 : index
    %c0_157 = arith.constant 0 : index
    %707 = vector.load %arg1[%c171, %c0_157] : memref<406x128xf32, #tpu.memory_space<vmem>>, vector<1x8xf32>
    %c172 = arith.constant 172 : index
    %c0_158 = arith.constant 0 : index
    %708 = vector.load %arg1[%c172, %c0_158] : memref<406x128xf32, #tpu.memory_space<vmem>>, vector<1x8xf32>
    %cst_159 = arith.constant dense<0.000000e+00> : vector<8xf32>
    %709 = vector.multi_reduction <add>, %706, %cst_159 [0] : vector<8x8xf32> to vector<8xf32>
    %710 = vector.shape_cast %709 : vector<8xf32> to vector<1x8xf32>
    %711 = arith.mulf %706, %706 : vector<8x8xf32>
    %cst_160 = arith.constant dense<0.000000e+00> : vector<8xf32>
    %712 = vector.multi_reduction <add>, %711, %cst_160 [0] : vector<8x8xf32> to vector<8xf32>
    %713 = vector.shape_cast %712 : vector<8xf32> to vector<1x8xf32>
    %cst_161 = arith.constant 1.250000e-01 : f32
    %714 = vector.broadcast %cst_161 : f32 to vector<1x8xf32>
    %715 = arith.mulf %710, %714 : vector<1x8xf32>
    %cst_162 = arith.constant 1.250000e-01 : f32
    %716 = vector.broadcast %cst_162 : f32 to vector<1x8xf32>
    %717 = arith.mulf %713, %716 : vector<1x8xf32>
    %718 = arith.mulf %715, %715 : vector<1x8xf32>
    %719 = arith.subf %717, %718 : vector<1x8xf32>
    %cst_163 = arith.constant 9.99999974E-6 : f32
    %720 = vector.broadcast %cst_163 : f32 to vector<1x8xf32>
    %721 = arith.addf %719, %720 : vector<1x8xf32>
    %722 = math.rsqrt %721 : vector<1x8xf32>
    %723 = arith.mulf %707, %722 : vector<1x8xf32>
    %724 = arith.mulf %715, %723 : vector<1x8xf32>
    %725 = arith.subf %708, %724 : vector<1x8xf32>
    %726 = vector.broadcast %723 : vector<1x8xf32> to vector<8x8xf32>
    %727 = arith.mulf %706, %726 : vector<8x8xf32>
    %728 = vector.broadcast %725 : vector<1x8xf32> to vector<8x8xf32>
    %729 = arith.addf %727, %728 : vector<8x8xf32>
    %cst_164 = arith.constant 0.000000e+00 : f32
    %730 = vector.broadcast %cst_164 : f32 to vector<8x8xf32>
    %731 = arith.maximumf %729, %730 : vector<8x8xf32>
    %c173 = arith.constant 173 : index
    %c0_165 = arith.constant 0 : index
    %732 = vector.load %arg1[%c173, %c0_165] : memref<406x128xf32, #tpu.memory_space<vmem>>, vector<24x8xf32>
    %c197 = arith.constant 197 : index
    %c0_166 = arith.constant 0 : index
    %733 = vector.load %arg1[%c197, %c0_166] : memref<406x128xf32, #tpu.memory_space<vmem>>, vector<1x8xf32>
    %cst_167 = arith.constant 0.000000e+00 : f32
    %734 = vector.broadcast %cst_167 : f32 to vector<1x8xf32>
    %cst_168 = arith.constant 0.000000e+00 : f32
    %735 = vector.broadcast %cst_168 : f32 to vector<2x8xf32>
    %736 = vector.extract_strided_slice %731 {offsets = [0, 0], sizes = [4, 8], strides = [1, 1]} : vector<8x8xf32> to vector<4x8xf32>
    %737 = vector.extract_strided_slice %731 {offsets = [4, 0], sizes = [4, 8], strides = [1, 1]} : vector<8x8xf32> to vector<4x8xf32>
    %738 = tpu.concatenate %734, %736, %735, %737, %734 in 0 : vector<1x8xf32>, vector<4x8xf32>, vector<2x8xf32>, vector<4x8xf32>, vector<1x8xf32> -> vector<12x8xf32>
    %739 = vector.extract_strided_slice %738 {offsets = [0, 0], sizes = [10, 8], strides = [1, 1]} : vector<12x8xf32> to vector<10x8xf32>
    %740 = vector.extract_strided_slice %738 {offsets = [1, 0], sizes = [10, 8], strides = [1, 1]} : vector<12x8xf32> to vector<10x8xf32>
    %741 = vector.extract_strided_slice %738 {offsets = [2, 0], sizes = [10, 8], strides = [1, 1]} : vector<12x8xf32> to vector<10x8xf32>
    %742 = tpu.concatenate %739, %740, %741 in 1 : vector<10x8xf32>, vector<10x8xf32>, vector<10x8xf32> -> vector<10x24xf32>
    %cst_169 = arith.constant dense<0.000000e+00> : vector<10x8xf32>
    %743 = tpu.matmul %742, %732, %cst_169 {dimension_numbers = #tpu.dot_dimension_numbers<[1], [0], [0], [1], [0, 0, 1, 1], [], []>} : vector<10x24xf32>, vector<24x8xf32>, vector<10x8xf32> -> vector<10x8xf32>
    %744 = vector.broadcast %733 : vector<1x8xf32> to vector<10x8xf32>
    %745 = arith.addf %743, %744 : vector<10x8xf32>
    %746 = vector.extract_strided_slice %745 {offsets = [0, 0], sizes = [4, 8], strides = [1, 1]} : vector<10x8xf32> to vector<4x8xf32>
    %747 = vector.extract_strided_slice %745 {offsets = [6, 0], sizes = [4, 8], strides = [1, 1]} : vector<10x8xf32> to vector<4x8xf32>
    %748 = tpu.concatenate %746, %747 in 0 : vector<4x8xf32>, vector<4x8xf32> -> vector<8x8xf32>
    %c198 = arith.constant 198 : index
    %c0_170 = arith.constant 0 : index
    %749 = vector.load %arg1[%c198, %c0_170] : memref<406x128xf32, #tpu.memory_space<vmem>>, vector<1x8xf32>
    %c199 = arith.constant 199 : index
    %c0_171 = arith.constant 0 : index
    %750 = vector.load %arg1[%c199, %c0_171] : memref<406x128xf32, #tpu.memory_space<vmem>>, vector<1x8xf32>
    %cst_172 = arith.constant dense<0.000000e+00> : vector<8xf32>
    %751 = vector.multi_reduction <add>, %748, %cst_172 [0] : vector<8x8xf32> to vector<8xf32>
    %752 = vector.shape_cast %751 : vector<8xf32> to vector<1x8xf32>
    %753 = arith.mulf %748, %748 : vector<8x8xf32>
    %cst_173 = arith.constant dense<0.000000e+00> : vector<8xf32>
    %754 = vector.multi_reduction <add>, %753, %cst_173 [0] : vector<8x8xf32> to vector<8xf32>
    %755 = vector.shape_cast %754 : vector<8xf32> to vector<1x8xf32>
    %cst_174 = arith.constant 1.250000e-01 : f32
    %756 = vector.broadcast %cst_174 : f32 to vector<1x8xf32>
    %757 = arith.mulf %752, %756 : vector<1x8xf32>
    %cst_175 = arith.constant 1.250000e-01 : f32
    %758 = vector.broadcast %cst_175 : f32 to vector<1x8xf32>
    %759 = arith.mulf %755, %758 : vector<1x8xf32>
    %760 = arith.mulf %757, %757 : vector<1x8xf32>
    %761 = arith.subf %759, %760 : vector<1x8xf32>
    %cst_176 = arith.constant 9.99999974E-6 : f32
    %762 = vector.broadcast %cst_176 : f32 to vector<1x8xf32>
    %763 = arith.addf %761, %762 : vector<1x8xf32>
    %764 = math.rsqrt %763 : vector<1x8xf32>
    %765 = arith.mulf %749, %764 : vector<1x8xf32>
    %766 = arith.mulf %757, %765 : vector<1x8xf32>
    %767 = arith.subf %750, %766 : vector<1x8xf32>
    %768 = vector.broadcast %765 : vector<1x8xf32> to vector<8x8xf32>
    %769 = arith.mulf %748, %768 : vector<8x8xf32>
    %770 = vector.broadcast %767 : vector<1x8xf32> to vector<8x8xf32>
    %771 = arith.addf %769, %770 : vector<8x8xf32>
    %772 = arith.addf %771, %689 : vector<8x8xf32>
    %cst_177 = arith.constant 0.000000e+00 : f32
    %773 = vector.broadcast %cst_177 : f32 to vector<8x8xf32>
    %774 = arith.maximumf %772, %773 : vector<8x8xf32>
    %c200 = arith.constant 200 : index
    %c0_178 = arith.constant 0 : index
    %775 = vector.load %arg1[%c200, %c0_178] : memref<406x128xf32, #tpu.memory_space<vmem>>, vector<24x16xf32>
    %c224 = arith.constant 224 : index
    %c0_179 = arith.constant 0 : index
    %776 = vector.load %arg1[%c224, %c0_179] : memref<406x128xf32, #tpu.memory_space<vmem>>, vector<1x16xf32>
    %c0_180 = arith.constant 0 : index
    %c0_181 = arith.constant 0 : index
    %777 = vector.load %arg5[%c0_180, %c0_181] : memref<8x8xf32, #tpu.memory_space<vmem>>, vector<8x8xf32>
    tpu.vector_store %arg5[%c0_180, %c0_181], %774 {strides = array<i32>} : memref<8x8xf32, #tpu.memory_space<vmem>>, vector<8x8xf32>,
    %c0_182 = arith.constant 0 : index
    %c0_183 = arith.constant 0 : index
    %778 = tpu.strided_load %arg5[%c0_182, %c0_183] {strides = array<i32: 2, 1>} : memref<8x8xf32, #tpu.memory_space<vmem>>, vector<4x8xf32>
    %c1_184 = arith.constant 1 : index
    %c0_185 = arith.constant 0 : index
    %779 = tpu.strided_load %arg5[%c1_184, %c0_185] {strides = array<i32: 2, 1>} : memref<8x8xf32, #tpu.memory_space<vmem>>, vector<4x8xf32>
    %cst_186 = arith.constant 0.000000e+00 : f32
    %780 = vector.broadcast %cst_186 : f32 to vector<1x8xf32>
    %781 = vector.extract_strided_slice %779 {offsets = [0, 0], sizes = [1, 8], strides = [1, 1]} : vector<4x8xf32> to vector<1x8xf32>
    %782 = vector.extract_strided_slice %779 {offsets = [2, 0], sizes = [1, 8], strides = [1, 1]} : vector<4x8xf32> to vector<1x8xf32>
    %783 = tpu.concatenate %780, %781, %780, %782 in 0 : vector<1x8xf32>, vector<1x8xf32>, vector<1x8xf32>, vector<1x8xf32> -> vector<4x8xf32>
    %784 = tpu.concatenate %783, %778, %779 in 1 : vector<4x8xf32>, vector<4x8xf32>, vector<4x8xf32> -> vector<4x24xf32>
    %cst_187 = arith.constant dense<0.000000e+00> : vector<4x16xf32>
    %785 = tpu.matmul %784, %775, %cst_187 {dimension_numbers = #tpu.dot_dimension_numbers<[1], [0], [0], [1], [0, 0, 1, 1], [], []>} : vector<4x24xf32>, vector<24x16xf32>, vector<4x16xf32> -> vector<4x16xf32>
    %786 = vector.broadcast %776 : vector<1x16xf32> to vector<4x16xf32>
    %787 = arith.addf %785, %786 : vector<4x16xf32>
    %c225 = arith.constant 225 : index
    %c0_188 = arith.constant 0 : index
    %788 = vector.load %arg1[%c225, %c0_188] : memref<406x128xf32, #tpu.memory_space<vmem>>, vector<1x16xf32>
    %c226 = arith.constant 226 : index
    %c0_189 = arith.constant 0 : index
    %789 = vector.load %arg1[%c226, %c0_189] : memref<406x128xf32, #tpu.memory_space<vmem>>, vector<1x16xf32>
    %cst_190 = arith.constant dense<0.000000e+00> : vector<16xf32>
    %790 = vector.multi_reduction <add>, %787, %cst_190 [0] : vector<4x16xf32> to vector<16xf32>
    %791 = vector.shape_cast %790 : vector<16xf32> to vector<1x16xf32>
    %792 = arith.mulf %787, %787 : vector<4x16xf32>
    %cst_191 = arith.constant dense<0.000000e+00> : vector<16xf32>
    %793 = vector.multi_reduction <add>, %792, %cst_191 [0] : vector<4x16xf32> to vector<16xf32>
    %794 = vector.shape_cast %793 : vector<16xf32> to vector<1x16xf32>
    %cst_192 = arith.constant 2.500000e-01 : f32
    %795 = vector.broadcast %cst_192 : f32 to vector<1x16xf32>
    %796 = arith.mulf %791, %795 : vector<1x16xf32>
    %cst_193 = arith.constant 2.500000e-01 : f32
    %797 = vector.broadcast %cst_193 : f32 to vector<1x16xf32>
    %798 = arith.mulf %794, %797 : vector<1x16xf32>
    %799 = arith.mulf %796, %796 : vector<1x16xf32>
    %800 = arith.subf %798, %799 : vector<1x16xf32>
    %cst_194 = arith.constant 9.99999974E-6 : f32
    %801 = vector.broadcast %cst_194 : f32 to vector<1x16xf32>
    %802 = arith.addf %800, %801 : vector<1x16xf32>
    %803 = math.rsqrt %802 : vector<1x16xf32>
    %804 = arith.mulf %788, %803 : vector<1x16xf32>
    %805 = arith.mulf %796, %804 : vector<1x16xf32>
    %806 = arith.subf %789, %805 : vector<1x16xf32>
    %807 = vector.broadcast %804 : vector<1x16xf32> to vector<4x16xf32>
    %808 = arith.mulf %787, %807 : vector<4x16xf32>
    %809 = vector.broadcast %806 : vector<1x16xf32> to vector<4x16xf32>
    %810 = arith.addf %808, %809 : vector<4x16xf32>
    %cst_195 = arith.constant 0.000000e+00 : f32
    %811 = vector.broadcast %cst_195 : f32 to vector<4x16xf32>
    %812 = arith.maximumf %810, %811 : vector<4x16xf32>
    %c227 = arith.constant 227 : index
    %c0_196 = arith.constant 0 : index
    %813 = vector.load %arg1[%c227, %c0_196] : memref<406x128xf32, #tpu.memory_space<vmem>>, vector<48x16xf32>
    %c275 = arith.constant 275 : index
    %c0_197 = arith.constant 0 : index
    %814 = vector.load %arg1[%c275, %c0_197] : memref<406x128xf32, #tpu.memory_space<vmem>>, vector<1x16xf32>
    %cst_198 = arith.constant 0.000000e+00 : f32
    %815 = vector.broadcast %cst_198 : f32 to vector<1x16xf32>
    %cst_199 = arith.constant 0.000000e+00 : f32
    %816 = vector.broadcast %cst_199 : f32 to vector<2x16xf32>
    %817 = vector.extract_strided_slice %812 {offsets = [0, 0], sizes = [2, 16], strides = [1, 1]} : vector<4x16xf32> to vector<2x16xf32>
    %818 = vector.extract_strided_slice %812 {offsets = [2, 0], sizes = [2, 16], strides = [1, 1]} : vector<4x16xf32> to vector<2x16xf32>
    %819 = tpu.concatenate %815, %817, %816, %818, %815 in 0 : vector<1x16xf32>, vector<2x16xf32>, vector<2x16xf32>, vector<2x16xf32>, vector<1x16xf32> -> vector<8x16xf32>
    %820 = vector.extract_strided_slice %819 {offsets = [0, 0], sizes = [6, 16], strides = [1, 1]} : vector<8x16xf32> to vector<6x16xf32>
    %821 = vector.extract_strided_slice %819 {offsets = [1, 0], sizes = [6, 16], strides = [1, 1]} : vector<8x16xf32> to vector<6x16xf32>
    %822 = vector.extract_strided_slice %819 {offsets = [2, 0], sizes = [6, 16], strides = [1, 1]} : vector<8x16xf32> to vector<6x16xf32>
    %823 = tpu.concatenate %820, %821, %822 in 1 : vector<6x16xf32>, vector<6x16xf32>, vector<6x16xf32> -> vector<6x48xf32>
    %cst_200 = arith.constant dense<0.000000e+00> : vector<6x16xf32>
    %824 = tpu.matmul %823, %813, %cst_200 {dimension_numbers = #tpu.dot_dimension_numbers<[1], [0], [0], [1], [0, 0, 1, 1], [], []>} : vector<6x48xf32>, vector<48x16xf32>, vector<6x16xf32> -> vector<6x16xf32>
    %825 = vector.broadcast %814 : vector<1x16xf32> to vector<6x16xf32>
    %826 = arith.addf %824, %825 : vector<6x16xf32>
    %827 = vector.extract_strided_slice %826 {offsets = [0, 0], sizes = [2, 16], strides = [1, 1]} : vector<6x16xf32> to vector<2x16xf32>
    %828 = vector.extract_strided_slice %826 {offsets = [4, 0], sizes = [2, 16], strides = [1, 1]} : vector<6x16xf32> to vector<2x16xf32>
    %829 = tpu.concatenate %827, %828 in 0 : vector<2x16xf32>, vector<2x16xf32> -> vector<4x16xf32>
    %c276 = arith.constant 276 : index
    %c0_201 = arith.constant 0 : index
    %830 = vector.load %arg1[%c276, %c0_201] : memref<406x128xf32, #tpu.memory_space<vmem>>, vector<1x16xf32>
    %c277 = arith.constant 277 : index
    %c0_202 = arith.constant 0 : index
    %831 = vector.load %arg1[%c277, %c0_202] : memref<406x128xf32, #tpu.memory_space<vmem>>, vector<1x16xf32>
    %cst_203 = arith.constant dense<0.000000e+00> : vector<16xf32>
    %832 = vector.multi_reduction <add>, %829, %cst_203 [0] : vector<4x16xf32> to vector<16xf32>
    %833 = vector.shape_cast %832 : vector<16xf32> to vector<1x16xf32>
    %834 = arith.mulf %829, %829 : vector<4x16xf32>
    %cst_204 = arith.constant dense<0.000000e+00> : vector<16xf32>
    %835 = vector.multi_reduction <add>, %834, %cst_204 [0] : vector<4x16xf32> to vector<16xf32>
    %836 = vector.shape_cast %835 : vector<16xf32> to vector<1x16xf32>
    %cst_205 = arith.constant 2.500000e-01 : f32
    %837 = vector.broadcast %cst_205 : f32 to vector<1x16xf32>
    %838 = arith.mulf %833, %837 : vector<1x16xf32>
    %cst_206 = arith.constant 2.500000e-01 : f32
    %839 = vector.broadcast %cst_206 : f32 to vector<1x16xf32>
    %840 = arith.mulf %836, %839 : vector<1x16xf32>
    %841 = arith.mulf %838, %838 : vector<1x16xf32>
    %842 = arith.subf %840, %841 : vector<1x16xf32>
    %cst_207 = arith.constant 9.99999974E-6 : f32
    %843 = vector.broadcast %cst_207 : f32 to vector<1x16xf32>
    %844 = arith.addf %842, %843 : vector<1x16xf32>
    %845 = math.rsqrt %844 : vector<1x16xf32>
    %846 = arith.mulf %830, %845 : vector<1x16xf32>
    %847 = arith.mulf %838, %846 : vector<1x16xf32>
    %848 = arith.subf %831, %847 : vector<1x16xf32>
    %849 = vector.broadcast %846 : vector<1x16xf32> to vector<4x16xf32>
    %850 = arith.mulf %829, %849 : vector<4x16xf32>
    %851 = vector.broadcast %848 : vector<1x16xf32> to vector<4x16xf32>
    %852 = arith.addf %850, %851 : vector<4x16xf32>
    %c278 = arith.constant 278 : index
    %c0_208 = arith.constant 0 : index
    %853 = vector.load %arg1[%c278, %c0_208] : memref<406x128xf32, #tpu.memory_space<vmem>>, vector<8x16xf32>
    %c286 = arith.constant 286 : index
    %c0_209 = arith.constant 0 : index
    %854 = vector.load %arg1[%c286, %c0_209] : memref<406x128xf32, #tpu.memory_space<vmem>>, vector<1x16xf32>
    %cst_210 = arith.constant dense<0.000000e+00> : vector<4x16xf32>
    %855 = tpu.matmul %778, %853, %cst_210 {dimension_numbers = #tpu.dot_dimension_numbers<[1], [0], [0], [1], [0, 0, 1, 1], [], []>} : vector<4x8xf32>, vector<8x16xf32>, vector<4x16xf32> -> vector<4x16xf32>
    %856 = vector.broadcast %854 : vector<1x16xf32> to vector<4x16xf32>
    %857 = arith.addf %855, %856 : vector<4x16xf32>
    %858 = arith.addf %852, %857 : vector<4x16xf32>
    %cst_211 = arith.constant 0.000000e+00 : f32
    %859 = vector.broadcast %cst_211 : f32 to vector<4x16xf32>
    %860 = arith.maximumf %858, %859 : vector<4x16xf32>
    %c287 = arith.constant 287 : index
    %c0_212 = arith.constant 0 : index
    %861 = vector.load %arg1[%c287, %c0_212] : memref<406x128xf32, #tpu.memory_space<vmem>>, vector<48x16xf32>
    %c335 = arith.constant 335 : index
    %c0_213 = arith.constant 0 : index
    %862 = vector.load %arg1[%c335, %c0_213] : memref<406x128xf32, #tpu.memory_space<vmem>>, vector<1x16xf32>
    %cst_214 = arith.constant 0.000000e+00 : f32
    %863 = vector.broadcast %cst_214 : f32 to vector<1x16xf32>
    %cst_215 = arith.constant 0.000000e+00 : f32
    %864 = vector.broadcast %cst_215 : f32 to vector<2x16xf32>
    %865 = vector.extract_strided_slice %860 {offsets = [0, 0], sizes = [2, 16], strides = [1, 1]} : vector<4x16xf32> to vector<2x16xf32>
    %866 = vector.extract_strided_slice %860 {offsets = [2, 0], sizes = [2, 16], strides = [1, 1]} : vector<4x16xf32> to vector<2x16xf32>
    %867 = tpu.concatenate %863, %865, %864, %866, %863 in 0 : vector<1x16xf32>, vector<2x16xf32>, vector<2x16xf32>, vector<2x16xf32>, vector<1x16xf32> -> vector<8x16xf32>
    %868 = vector.extract_strided_slice %867 {offsets = [0, 0], sizes = [6, 16], strides = [1, 1]} : vector<8x16xf32> to vector<6x16xf32>
    %869 = vector.extract_strided_slice %867 {offsets = [1, 0], sizes = [6, 16], strides = [1, 1]} : vector<8x16xf32> to vector<6x16xf32>
    %870 = vector.extract_strided_slice %867 {offsets = [2, 0], sizes = [6, 16], strides = [1, 1]} : vector<8x16xf32> to vector<6x16xf32>
    %871 = tpu.concatenate %868, %869, %870 in 1 : vector<6x16xf32>, vector<6x16xf32>, vector<6x16xf32> -> vector<6x48xf32>
    %cst_216 = arith.constant dense<0.000000e+00> : vector<6x16xf32>
    %872 = tpu.matmul %871, %861, %cst_216 {dimension_numbers = #tpu.dot_dimension_numbers<[1], [0], [0], [1], [0, 0, 1, 1], [], []>} : vector<6x48xf32>, vector<48x16xf32>, vector<6x16xf32> -> vector<6x16xf32>
    %873 = vector.broadcast %862 : vector<1x16xf32> to vector<6x16xf32>
    %874 = arith.addf %872, %873 : vector<6x16xf32>
    %875 = vector.extract_strided_slice %874 {offsets = [0, 0], sizes = [2, 16], strides = [1, 1]} : vector<6x16xf32> to vector<2x16xf32>
    %876 = vector.extract_strided_slice %874 {offsets = [4, 0], sizes = [2, 16], strides = [1, 1]} : vector<6x16xf32> to vector<2x16xf32>
    %877 = tpu.concatenate %875, %876 in 0 : vector<2x16xf32>, vector<2x16xf32> -> vector<4x16xf32>
    %c336 = arith.constant 336 : index
    %c0_217 = arith.constant 0 : index
    %878 = vector.load %arg1[%c336, %c0_217] : memref<406x128xf32, #tpu.memory_space<vmem>>, vector<1x16xf32>
    %c337 = arith.constant 337 : index
    %c0_218 = arith.constant 0 : index
    %879 = vector.load %arg1[%c337, %c0_218] : memref<406x128xf32, #tpu.memory_space<vmem>>, vector<1x16xf32>
    %cst_219 = arith.constant dense<0.000000e+00> : vector<16xf32>
    %880 = vector.multi_reduction <add>, %877, %cst_219 [0] : vector<4x16xf32> to vector<16xf32>
    %881 = vector.shape_cast %880 : vector<16xf32> to vector<1x16xf32>
    %882 = arith.mulf %877, %877 : vector<4x16xf32>
    %cst_220 = arith.constant dense<0.000000e+00> : vector<16xf32>
    %883 = vector.multi_reduction <add>, %882, %cst_220 [0] : vector<4x16xf32> to vector<16xf32>
    %884 = vector.shape_cast %883 : vector<16xf32> to vector<1x16xf32>
    %cst_221 = arith.constant 2.500000e-01 : f32
    %885 = vector.broadcast %cst_221 : f32 to vector<1x16xf32>
    %886 = arith.mulf %881, %885 : vector<1x16xf32>
    %cst_222 = arith.constant 2.500000e-01 : f32
    %887 = vector.broadcast %cst_222 : f32 to vector<1x16xf32>
    %888 = arith.mulf %884, %887 : vector<1x16xf32>
    %889 = arith.mulf %886, %886 : vector<1x16xf32>
    %890 = arith.subf %888, %889 : vector<1x16xf32>
    %cst_223 = arith.constant 9.99999974E-6 : f32
    %891 = vector.broadcast %cst_223 : f32 to vector<1x16xf32>
    %892 = arith.addf %890, %891 : vector<1x16xf32>
    %893 = math.rsqrt %892 : vector<1x16xf32>
    %894 = arith.mulf %878, %893 : vector<1x16xf32>
    %895 = arith.mulf %886, %894 : vector<1x16xf32>
    %896 = arith.subf %879, %895 : vector<1x16xf32>
    %897 = vector.broadcast %894 : vector<1x16xf32> to vector<4x16xf32>
    %898 = arith.mulf %877, %897 : vector<4x16xf32>
    %899 = vector.broadcast %896 : vector<1x16xf32> to vector<4x16xf32>
    %900 = arith.addf %898, %899 : vector<4x16xf32>
    %cst_224 = arith.constant 0.000000e+00 : f32
    %901 = vector.broadcast %cst_224 : f32 to vector<4x16xf32>
    %902 = arith.maximumf %900, %901 : vector<4x16xf32>
    %c338 = arith.constant 338 : index
    %c0_225 = arith.constant 0 : index
    %903 = vector.load %arg1[%c338, %c0_225] : memref<406x128xf32, #tpu.memory_space<vmem>>, vector<48x16xf32>
    %c386 = arith.constant 386 : index
    %c0_226 = arith.constant 0 : index
    %904 = vector.load %arg1[%c386, %c0_226] : memref<406x128xf32, #tpu.memory_space<vmem>>, vector<1x16xf32>
    %cst_227 = arith.constant 0.000000e+00 : f32
    %905 = vector.broadcast %cst_227 : f32 to vector<1x16xf32>
    %cst_228 = arith.constant 0.000000e+00 : f32
    %906 = vector.broadcast %cst_228 : f32 to vector<2x16xf32>
    %907 = vector.extract_strided_slice %902 {offsets = [0, 0], sizes = [2, 16], strides = [1, 1]} : vector<4x16xf32> to vector<2x16xf32>
    %908 = vector.extract_strided_slice %902 {offsets = [2, 0], sizes = [2, 16], strides = [1, 1]} : vector<4x16xf32> to vector<2x16xf32>
    %909 = tpu.concatenate %905, %907, %906, %908, %905 in 0 : vector<1x16xf32>, vector<2x16xf32>, vector<2x16xf32>, vector<2x16xf32>, vector<1x16xf32> -> vector<8x16xf32>
    %910 = vector.extract_strided_slice %909 {offsets = [0, 0], sizes = [6, 16], strides = [1, 1]} : vector<8x16xf32> to vector<6x16xf32>
    %911 = vector.extract_strided_slice %909 {offsets = [1, 0], sizes = [6, 16], strides = [1, 1]} : vector<8x16xf32> to vector<6x16xf32>
    %912 = vector.extract_strided_slice %909 {offsets = [2, 0], sizes = [6, 16], strides = [1, 1]} : vector<8x16xf32> to vector<6x16xf32>
    %913 = tpu.concatenate %910, %911, %912 in 1 : vector<6x16xf32>, vector<6x16xf32>, vector<6x16xf32> -> vector<6x48xf32>
    %cst_229 = arith.constant dense<0.000000e+00> : vector<6x16xf32>
    %914 = tpu.matmul %913, %903, %cst_229 {dimension_numbers = #tpu.dot_dimension_numbers<[1], [0], [0], [1], [0, 0, 1, 1], [], []>} : vector<6x48xf32>, vector<48x16xf32>, vector<6x16xf32> -> vector<6x16xf32>
    %915 = vector.broadcast %904 : vector<1x16xf32> to vector<6x16xf32>
    %916 = arith.addf %914, %915 : vector<6x16xf32>
    %917 = vector.extract_strided_slice %916 {offsets = [0, 0], sizes = [2, 16], strides = [1, 1]} : vector<6x16xf32> to vector<2x16xf32>
    %918 = vector.extract_strided_slice %916 {offsets = [4, 0], sizes = [2, 16], strides = [1, 1]} : vector<6x16xf32> to vector<2x16xf32>
    %919 = tpu.concatenate %917, %918 in 0 : vector<2x16xf32>, vector<2x16xf32> -> vector<4x16xf32>
    %c387 = arith.constant 387 : index
    %c0_230 = arith.constant 0 : index
    %920 = vector.load %arg1[%c387, %c0_230] : memref<406x128xf32, #tpu.memory_space<vmem>>, vector<1x16xf32>
    %c388 = arith.constant 388 : index
    %c0_231 = arith.constant 0 : index
    %921 = vector.load %arg1[%c388, %c0_231] : memref<406x128xf32, #tpu.memory_space<vmem>>, vector<1x16xf32>
    %cst_232 = arith.constant dense<0.000000e+00> : vector<16xf32>
    %922 = vector.multi_reduction <add>, %919, %cst_232 [0] : vector<4x16xf32> to vector<16xf32>
    %923 = vector.shape_cast %922 : vector<16xf32> to vector<1x16xf32>
    %924 = arith.mulf %919, %919 : vector<4x16xf32>
    %cst_233 = arith.constant dense<0.000000e+00> : vector<16xf32>
    %925 = vector.multi_reduction <add>, %924, %cst_233 [0] : vector<4x16xf32> to vector<16xf32>
    %926 = vector.shape_cast %925 : vector<16xf32> to vector<1x16xf32>
    %cst_234 = arith.constant 2.500000e-01 : f32
    %927 = vector.broadcast %cst_234 : f32 to vector<1x16xf32>
    %928 = arith.mulf %923, %927 : vector<1x16xf32>
    %cst_235 = arith.constant 2.500000e-01 : f32
    %929 = vector.broadcast %cst_235 : f32 to vector<1x16xf32>
    %930 = arith.mulf %926, %929 : vector<1x16xf32>
    %931 = arith.mulf %928, %928 : vector<1x16xf32>
    %932 = arith.subf %930, %931 : vector<1x16xf32>
    %cst_236 = arith.constant 9.99999974E-6 : f32
    %933 = vector.broadcast %cst_236 : f32 to vector<1x16xf32>
    %934 = arith.addf %932, %933 : vector<1x16xf32>
    %935 = math.rsqrt %934 : vector<1x16xf32>
    %936 = arith.mulf %920, %935 : vector<1x16xf32>
    %937 = arith.mulf %928, %936 : vector<1x16xf32>
    %938 = arith.subf %921, %937 : vector<1x16xf32>
    %939 = vector.broadcast %936 : vector<1x16xf32> to vector<4x16xf32>
    %940 = arith.mulf %919, %939 : vector<4x16xf32>
    %941 = vector.broadcast %938 : vector<1x16xf32> to vector<4x16xf32>
    %942 = arith.addf %940, %941 : vector<4x16xf32>
    %943 = arith.addf %942, %860 : vector<4x16xf32>
    %cst_237 = arith.constant 0.000000e+00 : f32
    %944 = vector.broadcast %cst_237 : f32 to vector<4x16xf32>
    %945 = arith.maximumf %943, %944 : vector<4x16xf32>
    %946 = vector.extract_strided_slice %945 {offsets = [0, 0], sizes = [2, 16], strides = [1, 1]} : vector<4x16xf32> to vector<2x16xf32>
    %cst_238 = arith.constant dense<0.000000e+00> : vector<16xf32>
    %947 = vector.multi_reduction <add>, %946, %cst_238 [0] : vector<2x16xf32> to vector<16xf32>
    %948 = vector.shape_cast %947 : vector<16xf32> to vector<1x16xf32>
    %cst_239 = arith.constant 2.000000e+00 : f32
    %949 = vector.broadcast %cst_239 : f32 to vector<1x16xf32>
    %950 = arith.divf %948, %949 : vector<1x16xf32>
    %951 = vector.extract_strided_slice %945 {offsets = [2, 0], sizes = [2, 16], strides = [1, 1]} : vector<4x16xf32> to vector<2x16xf32>
    %cst_240 = arith.constant dense<0.000000e+00> : vector<16xf32>
    %952 = vector.multi_reduction <add>, %951, %cst_240 [0] : vector<2x16xf32> to vector<16xf32>
    %953 = vector.shape_cast %952 : vector<16xf32> to vector<1x16xf32>
    %cst_241 = arith.constant 2.000000e+00 : f32
    %954 = vector.broadcast %cst_241 : f32 to vector<1x16xf32>
    %955 = arith.divf %953, %954 : vector<1x16xf32>
    %956 = tpu.concatenate %950, %955 in 0 : vector<1x16xf32>, vector<1x16xf32> -> vector<2x16xf32>
    %c389 = arith.constant 389 : index
    %c0_242 = arith.constant 0 : index
    %957 = vector.load %arg1[%c389, %c0_242] : memref<406x128xf32, #tpu.memory_space<vmem>>, vector<16x5xf32>
    %cst_243 = arith.constant dense<0.000000e+00> : vector<2x5xf32>
    %958 = tpu.matmul %956, %957, %cst_243 {dimension_numbers = #tpu.dot_dimension_numbers<[1], [0], [0], [1], [0, 0, 1, 1], [], []>} : vector<2x16xf32>, vector<16x5xf32>, vector<2x5xf32> -> vector<2x5xf32>
    %c405 = arith.constant 405 : index
    %c0_244 = arith.constant 0 : index
    %959 = vector.load %arg1[%c405, %c0_244] : memref<406x128xf32, #tpu.memory_space<vmem>>, vector<1x5xf32>
    %960 = vector.broadcast %959 : vector<1x5xf32> to vector<2x5xf32>
    %961 = arith.addf %958, %960 : vector<2x5xf32>
    %c0_245 = arith.constant 0 : index
    %c0_246 = arith.constant 0 : index
    %962 = vector.load %arg2[%c0_245, %c0_246] : memref<2x5xf32, #tpu.memory_space<vmem>>, vector<2x5xf32>
    tpu.vector_store %arg2[%c0_245, %c0_246], %961 {strides = array<i32>} : memref<2x5xf32, #tpu.memory_space<vmem>>, vector<2x5xf32>,
    return
  }
}

</mosaic_0001>

<bundles_post_ra>
// kernel: forward.1
= control target key start
LH: loop header
LB: loop body
LE: loop exit
PB: predicated region body
PF: predicated region fallthrough
CT: control target
= control target key end

     0   :  { %7 = vsyncpa [#allocation6], 0  ;;  %s5053_s0 = inlined_call_operand.vmem [shape: f32[32,1], index: 0, kind: input, shape index: {}]   ;;  %s5054_s1 = inlined_call_operand.hbm [shape: f32[406,128], index: 1, kind: input, shape index: {}]   ;;  %s5055_s2 = inlined_call_operand.hbm [shape: f32[2,5], index: 2, kind: output, shape index: {}]  }
   0x1   :  { %8 = vsyncpa [#allocation7], 0  ;;  %s4189_s9 = smov [#allocation5]   ;;  %s4141_s13 = scalar_lea.hbm %s5054_s1, 6528 }
   0x2   :  { %s16_s10 = sshll.u32 %s4189_s9, 4  ;;  %p4142_p0 = scmp.ne.s32.totalorder %s5054_s1, %s4141_s13  ;;  %s17_s10 = int_to_ptr.vmem [resolvable:$true] %s16_s10 }
   0x3   :  { %p4145_p1 = scmp.lt.u32.totalorder %s4141_s13, %s5054_s1 }
   0x5   :  { %p4147_p2 = pnand %p4145_p1, %p4142_p0 }
   0x7   :  { %4150 = shalt.err (!%p4147_p2)
}
   0x8   :  { %s4151_s18 = scalar_lea.vmem %s17_s10, 6528  ;;  %p4156_p4 = scmp.lt.s32.totalorder %s17_s10, %s17_s10 }
   0x9   :  { %p4152_p3 = scmp.ne.s32.totalorder %s17_s10, %s4151_s18  ;;  %p4157_p5 = scmp.lt.s32.totalorder %s4151_s18, %s4151_s18 }
   0xb   :  { %p4158_p6 = por %p4157_p5, %p4156_p4 }
   0xd   :  { %p4159_p7 = pnand %p4158_p6, %p4152_p3 }
   0xf   :  { %4162 = shalt.err (!%p4159_p7)
}
  0x10   :  { %s4190_s19 = smov 128   ;;  %s4191_s20 = smov 8  }
  0x11   :  { %22 = dma.hbm_to_vmem [thread:$0]  %s5054_s1, 6528, %s17_s10, [#allocation6], %s4190_s19, %s4190_s19, %s4191_s20  }
  0x12   :  { %4185 = dma.done.wait [#allocation6], 6528  }
  0x13   :  { %4186 = vsyncadd [#allocation6], 4294960768  ;;  %v4192_v0 = vmov 0   ;;  %v29_v1 = vld [vmem:[%s5053_s0 + $0x18] sm:$0xff]  ;;  %vm42_vm0 = vcmask 1042432   ;;  %v28_v2 = vld [vmem:[%s5053_s0 + $0x10] sm:$0xff]  ;;  %v75_v16 = vlaneseq }
  0x14   :  { %4079 = vset.pattern.permute.xlu1 %v4192_v0  ;;  %4078 = vset.pattern.permute.xlu0 %v4192_v0  ;;  %v27_v3 = vld [vmem:[%s5053_s0 + $0x8] sm:$0xff]  ;;  %vm34_vm1 = vcmask 1040384   ;;  %v44_v4 = vrot.slane %v29_v1, 5  ;;  %v43_v5 = vrot.slane %v28_v2, 5  ;;  %v26_v7 = vld [vmem:[%s5053_s0] sm:$0xff]  ;;  %v4193_v15 = vmov 1  }
  0x15   :  { %v36_v6 = vrot.slane %v27_v3, 7  ;;  %v35_v8 = vrot.slane %v26_v7, 7  ;;  %v4253_v17 = vshrl.u32 %v75_v16, 7  ;;  %v30_v20 = vld [vmem:[#allocation5] sm:$0x7]  ;;  %vm98_vm2 = vcmask 1046528  }
  0x16   :  { %v51_v9 = vsel %vm42_vm0, %v44_v4, 0.0  ;;  %v45_v10 = vsel %vm42_vm0, %v43_v5, %v44_v4  ;;  %vm132_vm3 = vcmask 1045504   ;;  %v3753_v53 = vld [vmem:[#allocation5 + $0x3] ss:$0 sm:$0xff]  ;;  %vm173_vm4 = vcmask 15360   ;;  %s4198_s0 = smov 4  }
  0x17   :  { %v49_v11 = vsel %vm34_vm1, %v36_v6, 0.0  ;;  %72 = vperm.xlu1 %4079, %v51_v9   ;;  %67 = vperm.xlu0 %4078, %v45_v10   ;;  %v48_v13 = vsel %vm34_vm1, 0.0, %v35_v8  ;;  %v37_v14 = vsel %vm34_vm1, %v35_v8, %v36_v6  ;;  %v4256_v18 = vsub.s32 1, %v4253_v17  ;;  %s4199_s30 = smov 16   ;;  %s4202_s3 = smov 32  }
  0x18   :  { %v50_v12 = vsel %vm42_vm0, %v49_v11, %v43_v5  ;;  %v4259_v19 = vsub.s32 2, %v4253_v17  ;;  %v4262_v21 = vsub.s32 0, %v4253_v17  ;;  %vm1625_vm5 = vcmask 31744   ;;  %s4203_s4 = smov [#allocation8]  }
  0x19   :  { %v87_v22 = vrot.slane %v30_v20, %v4256_v18  ;;  %vm1734_vm6 = vcmask 1043456   ;;  %vm4195_vm7 = vmmov 1   ;;  %vm4196_vm9 = vmmov 0   ;;  %s3744_s5 = sshll.u32 %s4203_s4, 4  ;;  %s3745_s5 = int_to_ptr.vmem [resolvable:$true] %s3744_s5 }
  0x1a   :  { %v121_v23 = vrot.slane %v30_v20, %v4259_v19  ;;  %v78_v24 = vrot.slane %v30_v20, %v4262_v21  ;;  %vm4713_vm8 = vmpackc.low %vm1734_vm6, %vm4195_vm7  ;;  %vm1716_vm10 = vcmask 64512   ;;  %vm1724_vm11 = vcmask 97280   ;;  %s4163_s6 = scalar_lea.vmem %s3745_s5, 32  ;;  %p4168_p9 = scmp.lt.s32.totalorder %s3745_s5, %s3745_s5 }
  0x1b   :  { %63 = vperm.xlu0 %4078, %v50_v12   ;;  %54 = vperm.xlu1 %4079, %v48_v13   ;;  %vm2302_vm12 = vcmask 1044480   ;;  %vm2465_vm13 = vcmask 130048   ;;  %vm2472_vm14 = vcmask 195584   ;;  %vm2990_vm15 = vcmask 1041408   ;;  %p4164_p8 = scmp.ne.s32.totalorder %s3745_s5, %s4163_s6  ;;  %p4169_p10 = scmp.lt.s32.totalorder %s4163_s6, %s4163_s6 }
  0x1d   :  { %p4170_p11 = por %p4169_p10, %p4168_p9 }
  0x1f   :  { %58 = vperm.xlu0 %4078, %v37_v14   ;;  %4080 = vset.pattern.permute.xlu1 %v4193_v15  ;;  %p4171_p12 = pnand %p4170_p11, %p4164_p8 }
  0x96   :  { %v73_v25 = vpop.permute.xlu1 %72  ;;  %v68_v26 = vpop.permute.xlu0 %67 }
  0x97   :  { %v83_v27 = vmul.f32 %v78_v24, %v73_v25  ;;  %v92_v28 = vmul.f32 %v87_v22, %v73_v25  ;;  %v126_v29 = vmul.f32 %v121_v23, %v73_v25  ;;  %v91_v30 = vmul.f32 %v87_v22, %v68_v26 }
  0x98   :  { %v125_v31 = vmul.f32 %v121_v23, %v68_v26  ;;  %v82_v38 = vmul.f32 %v78_v24, %v68_v26 }
  0x99   :  { %v106_v32 = vrot.slane %v92_v28, 1  ;;  %v140_v33 = vrot.slane %v126_v29, 2  ;;  %v104_v34 = vrot.slane %v91_v30, 1 }
  0x9a   :  { %v138_v35 = vrot.slane %v125_v31, 2  ;;  %v64_v36 = vpop.permute.xlu0 %63  ;;  %v55_v41 = vpop.permute.xlu1 %54 }
  0x9b   :  { %v117_v37 = vadd.f32 %v106_v32, %v83_v27  ;;  %v90_v39 = vmul.f32 %v87_v22, %v64_v36  ;;  %v124_v40 = vmul.f32 %v121_v23, %v64_v36  ;;  %v107_v42 = vsel %vm98_vm2, %v104_v34, %v106_v32 }
  0x9c   :  { %v116_v43 = vadd.f32 %v107_v42, %v82_v38  ;;  %v141_v46 = vsel %vm132_vm3, %v138_v35, %v140_v33  ;;  %v81_v47 = vmul.f32 %v78_v24, %v64_v36  ;;  %v88_v48 = vmul.f32 %v87_v22, %v55_v41 }
  0x9d   :  { %v102_v44 = vrot.slane %v90_v39, 1  ;;  %v136_v45 = vrot.slane %v124_v40, 2  ;;  %v151_v50 = vadd.f32 %v140_v33, %v117_v37  ;;  %v122_v55 = vmul.f32 %v121_v23, %v55_v41 }
  0x9e   :  { %v59_v49 = vpop.permute.xlu0 %58  ;;  %v150_v51 = vadd.f32 %v141_v46, %v116_v43  ;;  %v79_v60 = vmul.f32 %v78_v24, %v55_v41  ;;  %v99_v61 = vrot.slane %v88_v48, 1 }
  0x9f   :  { %v105_v52 = vsel %vm98_vm2, %v102_v44, %v104_v34  ;;  %v89_v56 = vmul.f32 %v87_v22, %v59_v49  ;;  %v139_v57 = vsel %vm132_vm3, %v136_v45, %v138_v35  ;;  %v123_v58 = vmul.f32 %v121_v23, %v59_v49 }
  0xa0   :  { %v115_v54 = vadd.f32 %v105_v52, %v81_v47  ;;  %v160_v63 = vadd.f32 %v3753_v53, %v151_v50  ;;  %v159_v1 = vadd.f32 %v3753_v53, %v150_v51  ;;  %v80_v2 = vmul.f32 %v78_v24, %v59_v49 }
  0xa1   :  { %v100_v62 = vrot.slane %v89_v56, 1  ;;  %v134_v3 = vrot.slane %v123_v58, 2  ;;  %v133_v5 = vrot.slane %v122_v55, 2 }
  0xa2   :  { %v149_v59 = vadd.f32 %v139_v57, %v115_v54  ;;  %v167_v13 = vrot.slane %v160_v63, 2  ;;  %v165_v14 = vrot.slane %v159_v1, 2  ;;  %v172_v1 = vld [vmem:[#allocation5 + $0x5] sm:$0x1] }
  0xa3   :  { %v101_v6 = vsel %vm98_vm2, %v99_v61, %v100_v62  ;;  %v103_v7 = vsel %vm98_vm2, %v100_v62, %v102_v44  ;;  %v135_v11 = vsel %vm132_vm3, %v133_v5, %v134_v3  ;;  %v137_v12 = vsel %vm132_vm3, %v134_v3, %v136_v45  ;;  %v171_v61 = vld [vmem:[#allocation5 + $0x4] sm:$0x1] }
  0xa4   :  { %v158_v4 = vadd.f32 %v3753_v53, %v149_v59  ;;  %v113_v8 = vadd.f32 %v101_v6, %v79_v60  ;;  %v114_v9 = vadd.f32 %v103_v7, %v80_v2  ;;  %v168_v25 = vsel %vm132_vm3, %v165_v14, %v167_v13 }
  0xa5   :  { %v190_v34 = vmul.f32 %v168_v25, %v168_v25  ;;  %v179_v37 = vsel %vm173_vm4, %v168_v25, 0.0 }
  0xa6   :  { %v164_v10 = vrot.slane %v158_v4, 2  ;;  %v147_v16 = vadd.f32 %v135_v11, %v113_v8  ;;  %v148_v20 = vadd.f32 %v137_v12, %v114_v9 }
  0xa7   :  { %v196_v42 = vsel %vm173_vm4, %v190_v34, 0.0 }
  0xa8   :  { %v166_v22 = vsel %vm132_vm3, %v164_v10, %v165_v14  ;;  %v156_v23 = vadd.f32 %v3753_v53, %v147_v16  ;;  %v157_v24 = vadd.f32 %v3753_v53, %v148_v20 }
  0xa9   :  { %v189_v29 = vmul.f32 %v166_v22, %v166_v22  ;;  %v177_v32 = vsel %vm173_vm4, %v166_v22, 0.0 }
  0xaa   :  { %v174_v26 = vsel %vm173_vm4, %v156_v23, 0.0  ;;  %v175_v27 = vsel %vm173_vm4, %v157_v24, 0.0  ;;  %v187_v28 = vmul.f32 %v156_v23, %v156_v23  ;;  %v188_v31 = vmul.f32 %v157_v24, %v157_v24 }
  0xab   :  { %v176_v30 = vadd.f32 %v175_v27, %v174_v26  ;;  %v194_v39 = vsel %vm173_vm4, %v189_v29, 0.0 }
  0xac   :  { %v191_v33 = vsel %vm173_vm4, %v187_v28, 0.0  ;;  %v192_v36 = vsel %vm173_vm4, %v188_v31, 0.0 }
  0xad   :  { %v178_v35 = vadd.f32 %v177_v32, %v176_v30  ;;  %v193_v38 = vadd.f32 %v192_v36, %v191_v33 }
  0xaf   :  { %v180_v40 = vadd.f32 %v179_v37, %v178_v35  ;;  %v195_v41 = vadd.f32 %v194_v39, %v193_v38 }
  0xb1   :  { %v181_v43 = vrot.slane %v180_v40, 4  ;;  %v197_v44 = vadd.f32 %v196_v42, %v195_v41 }
  0xb3   :  { %v182_v45 = vadd.f32 %v181_v43, %v180_v40  ;;  %v198_v46 = vrot.slane %v197_v44, 4 }
  0xb5   :  { %v183_v47 = vrot.slane %v182_v45, 2  ;;  %v199_v48 = vadd.f32 %v198_v46, %v197_v44 }
  0xb7   :  { %v184_v49 = vadd.f32 %v183_v47, %v182_v45  ;;  %v200_v50 = vrot.slane %v199_v48, 2 }
  0xb9   :  { %v185_v51 = vrot.slane %v184_v49, 1  ;;  %v201_v52 = vadd.f32 %v200_v50, %v199_v48 }
  0xbb   :  { %v186_v53 = vadd.f32 %v185_v51, %v184_v49  ;;  %v202_v54 = vrot.slane %v201_v52, 1 }
  0xbd   :  { %v204_v55 = vmul.f32 0.03125, %v186_v53  ;;  %v203_v56 = vadd.f32 %v202_v54, %v201_v52 }
  0xbf   :  { %v206_v57 = vmul.f32 %v204_v55, %v204_v55  ;;  %v205_v58 = vmul.f32 0.03125, %v203_v56 }
  0xc1   :  { %v207_v59 = vsub.f32 %v205_v58, %v206_v57 }
  0xc3   :  { %v208_v60 = vadd.f32 1e-05, %v207_v59 }
  0xc5   :  { %4107 = vrsqrt.f32 %v208_v60 }
  0xcf   :  { %v4108_v62 = vpop.eup %4107 }
  0xd0   :  { %v210_v63 = vmul.f32 %v4108_v62, %v171_v61 }
  0xd2   :  { %v211_v2 = vmul.f32 %v210_v63, %v204_v55  ;;  %v216_v3 = vrot.slane %v210_v63, %v4262_v21 }
  0xd4   :  { %v212_v4 = vsub.f32 %v172_v1, %v211_v2  ;;  %v218_v5 = vmul.f32 %v216_v3, %v157_v24  ;;  %v217_v7 = vmul.f32 %v216_v3, %v156_v23  ;;  %v219_v8 = vmul.f32 %v216_v3, %v166_v22 }
  0xd5   :  { %v220_v9 = vmul.f32 %v216_v3, %v168_v25 }
  0xd6   :  { %v224_v6 = vrot.slane %v212_v4, %v4262_v21 }
  0xd8   :  { %v226_v10 = vadd.f32 %v224_v6, %v218_v5  ;;  %v225_v11 = vadd.f32 %v224_v6, %v217_v7  ;;  %v227_v12 = vadd.f32 %v224_v6, %v219_v8  ;;  %v228_v13 = vadd.f32 %v224_v6, %v220_v9 }
  0xd9   :  { %v4327_v9 = vsub.s32 3, %v4253_v17 }
  0xda   :  { %v232_v14 = vrot.slane %v226_v10, 7  ;;  %v231_v16 = vrot.slane %v225_v11, 7  ;;  %v239_v20 = vrot.slane %v227_v12, 5  ;;  %v240_v26 = vrot.slane %v228_v13, 5  ;;  %v300_v10 = vld [vmem:[#allocation5 + $0x6] sm:$0x3f] }
  0xdb   :  { %v4330_v11 = vsub.s32 5, %v4253_v17  ;;  %v4333_v13 = vsub.s32 4, %v4253_v17 }
  0xdc   :  { %v246_v27 = vsel %vm34_vm1, %v232_v14, -inf  ;;  %v233_v28 = vsel %vm34_vm1, %v231_v16, %v232_v14  ;;  %v245_v29 = vsel %vm34_vm1, -inf, %v231_v16  ;;  %v241_v24 = vsel %vm42_vm0, %v239_v20, %v240_v26 }
  0xdd   :  { %v252_v30 = vrot.slane %v245_v29, 1  ;;  %v253_v23 = vrot.slane %v233_v28, 1  ;;  %v271_v22 = vrot.slane %v245_v29, 2  ;;  %v272_v25 = vrot.slane %v233_v28, 2 }
  0xde   :  { %v247_v31 = vsel %vm42_vm0, %v246_v27, %v239_v20  ;;  %v248_v32 = vsel %vm42_vm0, %v240_v26, -inf  ;;  %v257_v33 = vrot.slane %v241_v24, 1  ;;  %v276_v37 = vrot.slane %v241_v24, 2 }
  0xdf   :  { %v254_v34 = vsel %vm98_vm2, %v252_v30, %v253_v23  ;;  %v255_v35 = vrot.slane %v247_v31, 1  ;;  %v259_v36 = vrot.slane %v248_v32, 1  ;;  %v273_v39 = vsel %vm132_vm3, %v271_v22, %v272_v25 }
  0xe0   :  { %v266_v38 = vmax.f32 %v245_v29, %v254_v34  ;;  %v274_v40 = vrot.slane %v247_v31, 2  ;;  %v278_v41 = vrot.slane %v248_v32, 2  ;;  %v4336_v16 = vrot.slane %v300_v10, %v4256_v18 }
  0xe1   :  { %v258_v42 = vsel %vm98_vm2, %v255_v35, %v257_v33  ;;  %v260_v43 = vsel %vm98_vm2, %v257_v33, %v259_v36  ;;  %v270_v44 = vmax.f32 %v248_v32, %v259_v36  ;;  %v256_v45 = vsel %vm98_vm2, %v253_v23, %v255_v35 }
  0xe2   :  { %v4298_v46 = vmax.f32 %v266_v38, %v273_v39  ;;  %v268_v47 = vmax.f32 %v247_v31, %v258_v42  ;;  %v269_v48 = vmax.f32 %v241_v24, %v260_v43  ;;  %v277_v49 = vsel %vm132_vm3, %v274_v40, %v276_v37 }
  0xe3   :  { %v279_v50 = vsel %vm132_vm3, %v276_v37, %v278_v41  ;;  %v289_v51 = vmax.f32 %v270_v44, %v278_v41  ;;  %v267_v52 = vmax.f32 %v233_v28, %v256_v45  ;;  %v275_v56 = vsel %vm132_vm3, %v272_v25, %v274_v40 }
  0xe4   :  { %v304_v53 = vrot.slane %v4298_v46, 7  ;;  %v287_v54 = vmax.f32 %v268_v47, %v277_v49  ;;  %v288_v55 = vmax.f32 %v269_v48, %v279_v50  ;;  %v4339_v20 = vrot.slane %v300_v10, %v4327_v9 }
  0xe5   :  { %v296_v57 = vrot.slane %v289_v51, 2  ;;  %v4304_v58 = vmax.f32 %v267_v52, %v275_v56  ;;  %v4342_v26 = vrot.slane %v300_v10, %v4330_v11  ;;  %v344_v27 = vrot.slane %v300_v10, %v4262_v21 }
  0xe6   :  { %v314_v59 = vsel %vm34_vm1, 0.0, %v304_v53  ;;  %v293_v60 = vrot.slane %v287_v54, 2  ;;  %v294_v61 = vrot.slane %v288_v55, 2  ;;  %v387_v28 = vrot.slane %v300_v10, %v4259_v19 }
  0xe7   :  { %351 = vperm.xlu1 %4080, %v314_v59   ;;  %320 = vperm.xlu0 %4078, %v314_v59   ;;  %v305_v62 = vrot.slane %v4304_v58, 7  ;;  %v453_v29 = vrot.slane %v300_v10, %v4333_v13 }
  0xe8   :  { %v4309_v63 = vsel %vm132_vm3, %v293_v60, %v294_v61  ;;  %v4312_v1 = vsel %vm132_vm3, %v294_v61, %v296_v57 }
  0xe9   :  { %v309_v2 = vrot.slane %v4309_v63, 5  ;;  %v310_v3 = vrot.slane %v4312_v1, 5  ;;  %v306_v5 = vsel %vm34_vm1, %v304_v53, %v305_v62  ;;  %v315_v6 = vsel %vm34_vm1, %v305_v62, 0.0 }
  0xeb   :  { %4081 = vset.pattern.permute.xlu1 %v4192_v0  ;;  %v311_v4 = vsel %vm42_vm0, %v309_v2, %v310_v3  ;;  %v317_v7 = vsel %vm42_vm0, %v310_v3, 0.0  ;;  %v316_v8 = vsel %vm42_vm0, %v315_v6, %v309_v2 }
  0xec   :  { %333 = vperm.xlu0 %4078, %v311_v4   ;;  %324 = vperm.xlu1 %4081, %v306_v5  }
  0xf0   :  { %4082 = vset.pattern.permute.xlu0 %v4193_v15  ;;  %338 = vperm.xlu1 %4081, %v317_v7  }
  0xf1   :  { %359 = vperm.xlu0 %4082, %v316_v8  }
  0xf4   :  { %329 = vperm.xlu1 %4081, %v316_v8  }
  0xf5   :  { %355 = vperm.xlu0 %4082, %v306_v5  }
  0xf8   :  { %4083 = vset.pattern.permute.xlu1 %v4193_v15 }
  0xf9   :  { %363 = vperm.xlu1 %4083, %v311_v4   ;;  %4085 = vset.pattern.permute.xlu0 %v4192_v0 }
  0xfd   :  { %367 = vperm.xlu1 %4083, %v317_v7  }
 0x101   :  { %4084 = vset.pattern.permute.xlu1 %v4192_v0 }
 0x166   :  { %v352_v12 = vpop.permute.xlu1 %351  ;;  %v321_v14 = vpop.permute.xlu0 %320 }
 0x167   :  { %v374_v17 = vmul.f32 %v4336_v16, %v352_v12  ;;  %v421_v23 = vmul.f32 %v4339_v20, %v352_v12  ;;  %v4350_v25 = vmul.f32 %v4342_v26, %v352_v12  ;;  %v345_v31 = vmul.f32 %v344_v27, %v321_v14 }
 0x168   :  { %v388_v32 = vmul.f32 %v387_v28, %v321_v14  ;;  %v454_v33 = vmul.f32 %v453_v29, %v321_v14 }
 0x169   :  { %v431_v40 = vrot.slane %v421_v23, 1  ;;  %v497_v41 = vrot.slane %v4350_v25, 2  ;;  %v379_v42 = vadd.f32 %v374_v17, %v345_v31 }
 0x16a   :  { %v398_v43 = vrot.slane %v388_v32, 1  ;;  %v464_v44 = vrot.slane %v454_v33, 2 }
 0x16b   :  { %v334_v24 = vpop.permute.xlu0 %333  ;;  %v325_v30 = vpop.permute.xlu1 %324 }
 0x16c   :  { %v389_v22 = vmul.f32 %v387_v28, %v325_v30  ;;  %v4352_v34 = vmul.f32 %v387_v28, %v334_v24  ;;  %v455_v35 = vmul.f32 %v453_v29, %v325_v30  ;;  %v4354_v37 = vmul.f32 %v453_v29, %v334_v24 }
 0x16d   :  { %v348_v45 = vmul.f32 %v344_v27, %v334_v24  ;;  %v346_v48 = vmul.f32 %v344_v27, %v325_v30 }
 0x16e   :  { %v399_v38 = vrot.slane %v389_v22, 1  ;;  %v403_v47 = vrot.slane %v4352_v34, 1  ;;  %v465_v49 = vrot.slane %v455_v35, 2  ;;  %v469_v51 = vrot.slane %v4354_v37, 2 }
 0x16f   :  { %v339_v36 = vpop.permute.xlu1 %338 }
 0x170   :  { %v360_v39 = vpop.permute.xlu0 %359  ;;  %v400_v52 = vsel %vm98_vm2, %v398_v43, %v399_v38  ;;  %v349_v61 = vmul.f32 %v344_v27, %v339_v36  ;;  %v392_v62 = vmul.f32 %v387_v28, %v339_v36  ;;  %v458_v2 = vmul.f32 %v453_v29, %v339_v36 }
 0x171   :  { %v423_v53 = vmul.f32 %v4339_v20, %v360_v39  ;;  %v466_v4 = vsel %vm132_vm3, %v464_v44, %v465_v49  ;;  %v376_v5 = vmul.f32 %v4336_v16, %v360_v39  ;;  %v489_v8 = vmul.f32 %v4342_v26, %v360_v39 }
 0x172   :  { %v412_v10 = vadd.f32 %v400_v52, %v379_v42  ;;  %v405_v17 = vrot.slane %v392_v62, 1 }
 0x173   :  { %v330_v50 = vpop.permute.xlu1 %329  ;;  %v434_v30 = vrot.slane %v423_v53, 1  ;;  %v500_v36 = vrot.slane %v489_v8, 2 }
 0x174   :  { %v356_v54 = vpop.permute.xlu0 %355  ;;  %v390_v55 = vmul.f32 %v387_v28, %v330_v50  ;;  %v347_v59 = vmul.f32 %v344_v27, %v330_v50  ;;  %v456_v60 = vmul.f32 %v453_v29, %v330_v50 }
 0x175   :  { %v375_v56 = vmul.f32 %v4336_v16, %v356_v54  ;;  %v422_v57 = vmul.f32 %v4339_v20, %v356_v54  ;;  %v488_v12 = vmul.f32 %v4342_v26, %v356_v54 }
 0x176   :  { %v401_v3 = vrot.slane %v390_v55, 1  ;;  %v381_v28 = vadd.f32 %v376_v5, %v347_v59  ;;  %v467_v29 = vrot.slane %v456_v60, 2 }
 0x177   :  { %v380_v6 = vadd.f32 %v375_v56, %v346_v48  ;;  %v432_v7 = vrot.slane %v422_v57, 1  ;;  %v498_v39 = vrot.slane %v488_v12, 2 }
 0x178   :  { %v402_v14 = vsel %vm98_vm2, %v399_v38, %v401_v3  ;;  %v364_v24 = vpop.permute.xlu1 %363  ;;  %v404_v22 = vsel %vm98_vm2, %v401_v3, %v403_v47  ;;  %v471_v38 = vrot.slane %v458_v2, 2  ;;  %v468_v44 = vsel %vm132_vm3, %v465_v49, %v467_v29 }
 0x179   :  { %v433_v27 = vsel %vm98_vm2, %v431_v40, %v432_v7  ;;  %v413_v31 = vadd.f32 %v402_v14, %v380_v6  ;;  %v435_v32 = vsel %vm98_vm2, %v432_v7, %v434_v30  ;;  %v377_v33 = vmul.f32 %v4336_v16, %v364_v24 }
 0x17a   :  { %v445_v23 = vadd.f32 %v433_v27, %v412_v10  ;;  %v424_v34 = vmul.f32 %v4339_v20, %v364_v24  ;;  %v490_v35 = vmul.f32 %v4342_v26, %v364_v24  ;;  %v414_v43 = vadd.f32 %v404_v22, %v381_v28 }
 0x17b   :  { %v446_v42 = vadd.f32 %v435_v32, %v413_v31  ;;  %v382_v54 = vadd.f32 %v377_v33, %v348_v45  ;;  %v501_v62 = vsel %vm132_vm3, %v498_v39, %v500_v36  ;;  %v406_v2 = vsel %vm98_vm2, %v403_v47, %v405_v17 }
 0x17c   :  { %v368_v40 = vpop.permute.xlu1 %367  ;;  %v436_v48 = vrot.slane %v424_v34, 1  ;;  %v478_v52 = vadd.f32 %v466_v4, %v445_v23  ;;  %v502_v57 = vrot.slane %v490_v35, 2 }
 0x17d   :  { %v378_v50 = vmul.f32 %v4336_v16, %v368_v40  ;;  %v479_v53 = vadd.f32 %v468_v44, %v446_v42  ;;  %v425_v55 = vmul.f32 %v4339_v20, %v368_v40  ;;  %v491_v60 = vmul.f32 %v4342_v26, %v368_v40  ;;  %v3754_v26 = vld [vmem:[#allocation5 + $0xc] ss:$0 sm:$0xff] }
 0x17e   :  { %v437_v56 = vsel %vm98_vm2, %v434_v30, %v436_v48  ;;  %v499_v16 = vsel %vm132_vm3, %v497_v41, %v498_v39  ;;  %v470_v20 = vsel %vm132_vm3, %v467_v29, %v469_v51  ;;  %v503_v7 = vsel %vm132_vm3, %v500_v36, %v502_v57 }
 0x17f   :  { %v383_v59 = vadd.f32 %v378_v50, %v349_v61  ;;  %v447_v3 = vadd.f32 %v437_v56, %v414_v43  ;;  %v438_v49 = vrot.slane %v425_v55, 1  ;;  %v512_v45 = vadd.f32 %v501_v62, %v479_v53 }
 0x180   :  { %v511_v5 = vadd.f32 %v499_v16, %v478_v52  ;;  %v415_v61 = vadd.f32 %v406_v2, %v382_v54  ;;  %v504_v10 = vrot.slane %v491_v60, 2  ;;  %v472_v41 = vsel %vm132_vm3, %v469_v51, %v471_v38 }
 0x181   :  { %v416_v4 = vadd.f32 %v405_v17, %v383_v59  ;;  %v480_v6 = vadd.f32 %v470_v20, %v447_v3  ;;  %v439_v47 = vsel %vm98_vm2, %v436_v48, %v438_v49  ;;  %v521_v14 = vadd.f32 %v3754_v26, %v512_v45 }
 0x182   :  { %v448_v25 = vadd.f32 %v439_v47, %v415_v61  ;;  %v520_v30 = vadd.f32 %v3754_v26, %v511_v5  ;;  %v505_v28 = vsel %vm132_vm3, %v502_v57, %v504_v10 }
 0x183   :  { %v449_v8 = vadd.f32 %v438_v49, %v416_v4  ;;  %v513_v12 = vadd.f32 %v503_v7, %v480_v6  ;;  %v551_v22 = vmul.f32 %v521_v14, %v521_v14  ;;  %v538_v35 = vsel %vm173_vm4, %v521_v14, 0.0 }
 0x184   :  { %v481_v27 = vadd.f32 %v472_v41, %v448_v25  ;;  %v550_v32 = vmul.f32 %v520_v30, %v520_v30  ;;  %v537_v51 = vsel %vm173_vm4, %v520_v30, 0.0  ;;  %v535_v25 = vld [vmem:[#allocation5 + $0xd] sm:$0x1] }
 0x185   :  { %v482_v24 = vadd.f32 %v471_v38, %v449_v8  ;;  %v522_v17 = vadd.f32 %v3754_v26, %v513_v12  ;;  %v555_v38 = vsel %vm173_vm4, %v551_v22, 0.0  ;;  %v539_v43 = vadd.f32 %v538_v35, %v537_v51 }
 0x186   :  { %v514_v23 = vadd.f32 %v505_v28, %v481_v27  ;;  %v554_v39 = vsel %vm173_vm4, %v550_v32, 0.0  ;;  %v536_v27 = vld [vmem:[#allocation5 + $0xe] sm:$0x1] }
 0x187   :  { %v515_v29 = vadd.f32 %v504_v10, %v482_v24  ;;  %v528_v36 = vrot.slane %v522_v17, 2  ;;  %v556_v54 = vadd.f32 %v555_v38, %v554_v39 }
 0x188   :  { %v523_v33 = vadd.f32 %v3754_v26, %v514_v23 }
 0x189   :  { %v524_v31 = vadd.f32 %v3754_v26, %v515_v29 }
 0x18a   :  { %v529_v37 = vrot.slane %v523_v33, 2 }
 0x18b   :  { %v531_v34 = vrot.slane %v524_v31, 2 }
 0x18c   :  { %v530_v42 = vsel %vm132_vm3, %v528_v36, %v529_v37 }
 0x18d   :  { %v532_v40 = vsel %vm132_vm3, %v529_v37, %v531_v34  ;;  %v540_v44 = vsel %vm173_vm4, %v530_v42, 0.0  ;;  %v552_v50 = vmul.f32 %v530_v42, %v530_v42 }
 0x18e   :  { %v542_v48 = vsel %vm173_vm4, %v532_v40, 0.0  ;;  %v553_v52 = vmul.f32 %v532_v40, %v532_v40  ;;  %v541_v53 = vadd.f32 %v540_v44, %v539_v43 }
 0x18f   :  { %v557_v55 = vsel %vm173_vm4, %v552_v50, 0.0 }
 0x190   :  { %v559_v56 = vsel %vm173_vm4, %v553_v52, 0.0  ;;  %v543_v57 = vadd.f32 %v542_v48, %v541_v53  ;;  %v558_v59 = vadd.f32 %v557_v55, %v556_v54  ;;  %v596_v55 = vld [vmem:[#allocation5 + $0xf] sm:$0x3f] }
 0x192   :  { %v544_v60 = vrot.slane %v543_v57, 4  ;;  %v560_v62 = vadd.f32 %v559_v56, %v558_v59  ;;  %v685_v59 = vrot.slane %v596_v55, %v4259_v19 }
 0x194   :  { %v545_v2 = vadd.f32 %v544_v60, %v543_v57  ;;  %v561_v3 = vrot.slane %v560_v62, 4  ;;  %v751_v60 = vrot.slane %v596_v55, %v4333_v13 }
 0x196   :  { %v546_v49 = vrot.slane %v545_v2, 2  ;;  %v562_v16 = vadd.f32 %v561_v3, %v560_v62  ;;  %v642_v3 = vrot.slane %v596_v55, %v4262_v21 }
 0x198   :  { %v547_v20 = vadd.f32 %v546_v49, %v545_v2  ;;  %v563_v45 = vrot.slane %v562_v16, 2 }
 0x19a   :  { %v548_v4 = vrot.slane %v547_v20, 1  ;;  %v564_v5 = vadd.f32 %v563_v45, %v562_v16 }
 0x19c   :  { %v549_v61 = vadd.f32 %v548_v4, %v547_v20  ;;  %v565_v6 = vrot.slane %v564_v5, 1  ;;  %v4421_v4 = vrot.slane %v596_v55, %v4256_v18 }
 0x19e   :  { %v566_v26 = vadd.f32 %v565_v6, %v564_v5  ;;  %v567_v7 = vmul.f32 0.03125, %v549_v61 }
 0x1a0   :  { %v568_v47 = vmul.f32 0.03125, %v566_v26  ;;  %v569_v8 = vmul.f32 %v567_v7, %v567_v7  ;;  %v4426_v26 = vrot.slane %v596_v55, %v4327_v9 }
 0x1a2   :  { %v570_v10 = vsub.f32 %v568_v47, %v569_v8  ;;  %v4429_v47 = vrot.slane %v596_v55, %v4330_v11 }
 0x1a4   :  { %v571_v12 = vadd.f32 1e-05, %v570_v10 }
 0x1a6   :  { %4109 = vrsqrt.f32 %v571_v12 }
 0x1b0   :  { %v4110_v41 = vpop.eup %4109 }
 0x1b1   :  { %v573_v24 = vmul.f32 %v4110_v41, %v535_v25 }
 0x1b3   :  { %v574_v28 = vmul.f32 %v573_v24, %v567_v7  ;;  %v579_v29 = vrot.slane %v573_v24, %v4262_v21 }
 0x1b5   :  { %v575_v17 = vsub.f32 %v536_v27, %v574_v28  ;;  %v582_v23 = vmul.f32 %v579_v29, %v530_v42  ;;  %v583_v22 = vmul.f32 %v579_v29, %v532_v40  ;;  %v580_v32 = vmul.f32 %v579_v29, %v520_v30 }
 0x1b6   :  { %v581_v33 = vmul.f32 %v579_v29, %v521_v14 }
 0x1b7   :  { %v587_v31 = vrot.slane %v575_v17, %v4262_v21 }
 0x1b9   :  { %v590_v34 = vadd.f32 %v587_v31, %v582_v23  ;;  %v591_v35 = vadd.f32 %v587_v31, %v583_v22  ;;  %v588_v36 = vadd.f32 %v587_v31, %v580_v32  ;;  %v589_v37 = vadd.f32 %v587_v31, %v581_v33 }
 0x1bb   :  { %v594_v51 = vmax.f32 %v590_v34, 0.0  ;;  %v595_v38 = vmax.f32 %v591_v35, 0.0  ;;  %v592_v39 = vmax.f32 %v588_v36, 0.0  ;;  %v593_v43 = vmax.f32 %v589_v37, 0.0 }
 0x1bd   :  { %v607_v44 = vrot.slane %v594_v51, 5  ;;  %v608_v48 = vrot.slane %v595_v38, 5  ;;  %v600_v50 = vrot.slane %v592_v39, 7  ;;  %v601_v52 = vrot.slane %v593_v43, 7 }
 0x1bf   :  { %v609_v53 = vsel %vm42_vm0, %v607_v44, %v608_v48  ;;  %v612_v42 = vsel %vm34_vm1, 0.0, %v600_v50  ;;  %v613_v14 = vsel %vm34_vm1, %v601_v52, 0.0  ;;  %v615_v30 = vsel %vm42_vm0, %v608_v48, 0.0 }
 0x1c0   :  { %631 = vperm.xlu1 %4084, %v609_v53   ;;  %618 = vperm.xlu0 %4085, %v612_v42   ;;  %v614_v40 = vsel %vm42_vm0, %v613_v14, %v607_v44  ;;  %v602_v54 = vsel %vm34_vm1, %v600_v50, %v601_v52 }
 0x1c4   :  { %636 = vperm.xlu1 %4084, %v615_v30   ;;  %627 = vperm.xlu0 %4085, %v614_v40  }
 0x1c8   :  { %4087 = vset.pattern.permute.xlu0 %v4193_v15  ;;  %622 = vperm.xlu1 %4084, %v602_v54  }
 0x1c9   :  { %657 = vperm.xlu0 %4087, %v614_v40  }
 0x1cc   :  { %4086 = vset.pattern.permute.xlu1 %v4193_v15 }
 0x1cd   :  { %653 = vperm.xlu0 %4087, %v602_v54   ;;  %661 = vperm.xlu1 %4086, %v609_v53  }
 0x1d1   :  { %649 = vperm.xlu1 %4086, %v612_v42   ;;  %4089 = vset.pattern.permute.xlu0 %v4192_v0 }
 0x1d5   :  { %665 = vperm.xlu1 %4086, %v615_v30  }
 0x1d9   :  { %4088 = vset.pattern.permute.xlu1 %v4192_v0 }
 0x23f   :  { %v632_v56 = vpop.permute.xlu1 %631  ;;  %v619_v57 = vpop.permute.xlu0 %618 }
 0x240   :  { %v689_v49 = vmul.f32 %v685_v59, %v632_v56  ;;  %v4418_v16 = vmul.f32 %v751_v60, %v632_v56  ;;  %v686_v5 = vmul.f32 %v685_v59, %v619_v57  ;;  %v4423_v61 = vmul.f32 %v751_v60, %v619_v57 }
 0x241   :  { %v646_v10 = vmul.f32 %v642_v3, %v632_v56  ;;  %v643_v25 = vmul.f32 %v642_v3, %v619_v57 }
 0x242   :  { %v701_v12 = vrot.slane %v689_v49, 1  ;;  %v767_v24 = vrot.slane %v4418_v16, 2  ;;  %v696_v17 = vrot.slane %v686_v5, 1  ;;  %v762_v23 = vrot.slane %v4423_v61, 2 }
 0x243   :  { %v637_v62 = vpop.permute.xlu1 %636  ;;  %v628_v2 = vpop.permute.xlu0 %627 }
 0x244   :  { %v688_v20 = vmul.f32 %v685_v59, %v628_v2  ;;  %v754_v45 = vmul.f32 %v751_v60, %v628_v2  ;;  %v4431_v41 = vmul.f32 %v685_v59, %v637_v62  ;;  %v647_v32 = vmul.f32 %v642_v3, %v637_v62 }
 0x245   :  { %v4437_v33 = vmul.f32 %v751_v60, %v637_v62  ;;  %v645_v34 = vmul.f32 %v642_v3, %v628_v2 }
 0x246   :  { %v699_v27 = vrot.slane %v688_v20, 1  ;;  %v765_v28 = vrot.slane %v754_v45, 2  ;;  %v703_v51 = vrot.slane %v4431_v41, 1 }
 0x247   :  { %v623_v6 = vpop.permute.xlu1 %622 }
 0x248   :  { %v687_v7 = vmul.f32 %v685_v59, %v623_v6  ;;  %v658_v8 = vpop.permute.xlu0 %657  ;;  %v753_v22 = vmul.f32 %v751_v60, %v623_v6  ;;  %v644_v38 = vmul.f32 %v642_v3, %v623_v6  ;;  %v768_v44 = vsel %vm132_vm3, %v765_v28, %v767_v24 }
 0x249   :  { %v674_v29 = vmul.f32 %v4421_v4, %v658_v8  ;;  %v721_v31 = vmul.f32 %v4426_v26, %v658_v8  ;;  %v702_v48 = vsel %vm98_vm2, %v699_v27, %v701_v12  ;;  %v787_v40 = vmul.f32 %v4429_v47, %v658_v8 }
 0x24a   :  { %v697_v35 = vrot.slane %v687_v7, 1  ;;  %v763_v53 = vrot.slane %v753_v22, 2  ;;  %v704_v49 = vsel %vm98_vm2, %v701_v12, %v703_v51 }
 0x24b   :  { %v679_v50 = vadd.f32 %v674_v29, %v645_v34  ;;  %v732_v42 = vrot.slane %v721_v31, 1 }
 0x24c   :  { %v654_v36 = vpop.permute.xlu0 %653  ;;  %v662_v37 = vpop.permute.xlu1 %661  ;;  %v700_v54 = vsel %vm98_vm2, %v697_v35, %v699_v27  ;;  %v766_v8 = vsel %vm132_vm3, %v763_v53, %v765_v28  ;;  %v698_v27 = vsel %vm98_vm2, %v696_v17, %v697_v35  ;;  %v764_v17 = vsel %vm132_vm3, %v762_v23, %v763_v53 }
 0x24d   :  { %v673_v39 = vmul.f32 %v4421_v4, %v654_v36  ;;  %v720_v43 = vmul.f32 %v4426_v26, %v654_v36  ;;  %v722_v52 = vmul.f32 %v4426_v26, %v662_v37  ;;  %v786_v55 = vmul.f32 %v4429_v47, %v654_v36 }
 0x24e   :  { %v675_v62 = vmul.f32 %v4421_v4, %v662_v37  ;;  %v712_v3 = vadd.f32 %v702_v48, %v679_v50  ;;  %v788_v61 = vmul.f32 %v4429_v47, %v662_v37  ;;  %v798_v37 = vrot.slane %v787_v40, 2 }
 0x24f   :  { %v678_v14 = vadd.f32 %v673_v39, %v644_v38  ;;  %v730_v30 = vrot.slane %v720_v43, 1  ;;  %v734_v56 = vrot.slane %v722_v52, 1  ;;  %v796_v34 = vrot.slane %v786_v55, 2 }
 0x250   :  { %v650_v57 = vpop.permute.xlu1 %649  ;;  %v680_v12 = vadd.f32 %v675_v62, %v646_v10  ;;  %v800_v48 = vrot.slane %v788_v61, 2  ;;  %v769_v10 = vrot.slane %v4437_v33, 2 }
 0x251   :  { %v711_v59 = vadd.f32 %v700_v54, %v678_v14  ;;  %v733_v60 = vsel %vm98_vm2, %v730_v30, %v732_v42  ;;  %v672_v2 = vmul.f32 %v4421_v4, %v650_v57  ;;  %v735_v20 = vsel %vm98_vm2, %v732_v42, %v734_v56 }
 0x252   :  { %v719_v45 = vmul.f32 %v4426_v26, %v650_v57  ;;  %v785_v7 = vmul.f32 %v4429_v47, %v650_v57  ;;  %v745_v41 = vadd.f32 %v735_v20, %v712_v3  ;;  %v799_v14 = vsel %vm132_vm3, %v796_v34, %v798_v37  ;;  %v3755_v57 = vld [vmem:[#allocation5 + $0x15] ss:$0 sm:$0xff] }
 0x253   :  { %v744_v5 = vadd.f32 %v733_v60, %v711_v59  ;;  %v677_v6 = vadd.f32 %v672_v2, %v643_v25  ;;  %v770_v33 = vsel %vm132_vm3, %v767_v24, %v769_v10 }
 0x254   :  { %v729_v29 = vrot.slane %v719_v45, 1  ;;  %v666_v22 = vpop.permute.xlu1 %665  ;;  %v795_v39 = vrot.slane %v785_v7, 2  ;;  %v778_v35 = vadd.f32 %v768_v44, %v745_v41 }
 0x255   :  { %v777_v31 = vadd.f32 %v766_v8, %v744_v5  ;;  %v710_v36 = vadd.f32 %v698_v27, %v677_v6  ;;  %v676_v43 = vmul.f32 %v4421_v4, %v666_v22  ;;  %v723_v25 = vmul.f32 %v4426_v26, %v666_v22 }
 0x256   :  { %v731_v38 = vsel %vm98_vm2, %v729_v29, %v730_v30  ;;  %v789_v28 = vmul.f32 %v4429_v47, %v666_v22  ;;  %v713_v30 = vadd.f32 %v704_v49, %v680_v12  ;;  %v797_v4 = vsel %vm132_vm3, %v795_v39, %v796_v34 }
 0x257   :  { %v743_v50 = vadd.f32 %v731_v38, %v710_v36  ;;  %v681_v52 = vadd.f32 %v676_v43, %v647_v32  ;;  %v736_v42 = vrot.slane %v723_v25, 1  ;;  %v810_v55 = vadd.f32 %v799_v14, %v777_v31 }
 0x258   :  { %v801_v47 = vsel %vm132_vm3, %v798_v37, %v800_v48  ;;  %v802_v23 = vrot.slane %v789_v28, 2 }
 0x259   :  { %v776_v54 = vadd.f32 %v764_v17, %v743_v50  ;;  %v714_v26 = vadd.f32 %v703_v51, %v681_v52  ;;  %v737_v40 = vsel %vm98_vm2, %v734_v56, %v736_v42  ;;  %v811_v44 = vadd.f32 %v801_v47, %v778_v35 }
 0x25a   :  { %v746_v32 = vadd.f32 %v737_v40, %v713_v30  ;;  %v819_v62 = vadd.f32 %v3755_v57, %v810_v55  ;;  %v803_v51 = vsel %vm132_vm3, %v800_v48, %v802_v23 }
 0x25b   :  { %v809_v59 = vadd.f32 %v797_v4, %v776_v54  ;;  %v747_v53 = vadd.f32 %v736_v42, %v714_v26  ;;  %v820_v49 = vadd.f32 %v3755_v57, %v811_v44 }
 0x25c   :  { %v779_v2 = vadd.f32 %v770_v33, %v746_v32  ;;  %v849_v5 = vmul.f32 %v819_v62, %v819_v62  ;;  %v836_v24 = vsel %vm173_vm4, %v819_v62, 0.0 }
 0x25d   :  { %v818_v60 = vadd.f32 %v3755_v57, %v809_v59  ;;  %v780_v3 = vadd.f32 %v769_v10, %v747_v53  ;;  %v826_v8 = vrot.slane %v820_v49, 2  ;;  %v833_v53 = vld [vmem:[#allocation5 + $0x16] sm:$0x1] }
 0x25e   :  { %v812_v56 = vadd.f32 %v803_v51, %v779_v2  ;;  %v853_v29 = vsel %vm173_vm4, %v849_v5, 0.0 }
 0x25f   :  { %v813_v20 = vadd.f32 %v802_v23, %v780_v3  ;;  %v848_v45 = vmul.f32 %v818_v60, %v818_v60  ;;  %v835_v7 = vsel %vm173_vm4, %v818_v60, 0.0  ;;  %v834_v3 = vld [vmem:[#allocation5 + $0x17] sm:$0x1] }
 0x260   :  { %v821_v61 = vadd.f32 %v3755_v57, %v812_v56  ;;  %v837_v22 = vadd.f32 %v836_v24, %v835_v7 }
 0x261   :  { %v822_v6 = vadd.f32 %v3755_v57, %v813_v20  ;;  %v852_v27 = vsel %vm173_vm4, %v848_v45, 0.0 }
 0x262   :  { %v827_v41 = vrot.slane %v821_v61, 2  ;;  %v854_v43 = vadd.f32 %v853_v29, %v852_v27 }
 0x263   :  { %v829_v16 = vrot.slane %v822_v6, 2 }
 0x264   :  { %v828_v34 = vsel %vm132_vm3, %v826_v8, %v827_v41 }
 0x265   :  { %v830_v31 = vsel %vm132_vm3, %v827_v41, %v829_v16  ;;  %v838_v38 = vsel %vm173_vm4, %v828_v34, 0.0  ;;  %v850_v39 = vmul.f32 %v828_v34, %v828_v34 }
 0x266   :  { %v840_v12 = vsel %vm173_vm4, %v830_v31, 0.0  ;;  %v851_v36 = vmul.f32 %v830_v31, %v830_v31  ;;  %v839_v25 = vadd.f32 %v838_v38, %v837_v22 }
 0x267   :  { %v855_v48 = vsel %vm173_vm4, %v850_v39, 0.0 }
 0x268   :  { %v857_v37 = vsel %vm173_vm4, %v851_v36, 0.0  ;;  %v841_v50 = vadd.f32 %v840_v12, %v839_v25  ;;  %v856_v28 = vadd.f32 %v855_v48, %v854_v43 }
 0x26a   :  { %v842_v17 = vrot.slane %v841_v50, 4  ;;  %v858_v35 = vadd.f32 %v857_v37, %v856_v28  ;;  %v898_v37 = vld [vmem:[#allocation5 + $0x18] sm:$0x3f] }
 0x26b   :  { %v987_v28 = vrot.slane %v898_v37, %v4259_v19 }
 0x26c   :  { %v843_v52 = vadd.f32 %v842_v17, %v841_v50  ;;  %v859_v42 = vrot.slane %v858_v35, 4  ;;  %v1053_v17 = vrot.slane %v898_v37, %v4333_v13 }
 0x26e   :  { %v844_v10 = vrot.slane %v843_v52, 2  ;;  %v860_v14 = vadd.f32 %v859_v42, %v858_v35  ;;  %v944_v42 = vrot.slane %v898_v37, %v4262_v21 }
 0x270   :  { %v845_v30 = vadd.f32 %v844_v10, %v843_v52  ;;  %v861_v54 = vrot.slane %v860_v14, 2 }
 0x272   :  { %v846_v55 = vrot.slane %v845_v30, 1  ;;  %v862_v4 = vadd.f32 %v861_v54, %v860_v14 }
 0x274   :  { %v847_v26 = vadd.f32 %v846_v55, %v845_v30  ;;  %v863_v40 = vrot.slane %v862_v4, 1  ;;  %v4526_v55 = vrot.slane %v898_v37, %v4256_v18 }
 0x276   :  { %v864_v57 = vadd.f32 %v863_v40, %v862_v4  ;;  %v865_v47 = vmul.f32 0.03125, %v847_v26 }
 0x278   :  { %v866_v59 = vmul.f32 0.03125, %v864_v57  ;;  %v867_v23 = vmul.f32 %v865_v47, %v865_v47  ;;  %v4531_v57 = vrot.slane %v898_v37, %v4327_v9 }
 0x27a   :  { %v868_v44 = vsub.f32 %v866_v59, %v867_v23  ;;  %v4534_v59 = vrot.slane %v898_v37, %v4330_v11 }
 0x27c   :  { %v869_v32 = vadd.f32 1e-05, %v868_v44 }
 0x27e   :  { %4111 = vrsqrt.f32 %v869_v32 }
 0x288   :  { %v4112_v33 = vpop.eup %4111 }
 0x289   :  { %v871_v2 = vmul.f32 %v4112_v33, %v833_v53 }
 0x28b   :  { %v872_v51 = vmul.f32 %v871_v2, %v865_v47  ;;  %v877_v49 = vrot.slane %v871_v2, %v4262_v21 }
 0x28d   :  { %v873_v56 = vsub.f32 %v834_v3, %v872_v51  ;;  %v880_v20 = vmul.f32 %v877_v49, %v828_v34  ;;  %v881_v45 = vmul.f32 %v877_v49, %v830_v31  ;;  %v878_v61 = vmul.f32 %v877_v49, %v818_v60 }
 0x28e   :  { %v879_v6 = vmul.f32 %v877_v49, %v819_v62 }
 0x28f   :  { %v885_v5 = vrot.slane %v873_v56, %v4262_v21 }
 0x291   :  { %v888_v7 = vadd.f32 %v885_v5, %v880_v20  ;;  %v889_v8 = vadd.f32 %v885_v5, %v881_v45  ;;  %v886_v41 = vadd.f32 %v885_v5, %v878_v61  ;;  %v887_v16 = vadd.f32 %v885_v5, %v879_v6 }
 0x293   :  { %v4487_v24 = vadd.f32 %v888_v7, %v4309_v63  ;;  %v4490_v27 = vadd.f32 %v889_v8, %v4312_v1  ;;  %v4493_v29 = vadd.f32 %v886_v41, %v4298_v46  ;;  %v4496_v22 = vadd.f32 %v887_v16, %v4304_v58 }
 0x295   :  { %v896_v31 = vmax.f32 %v4487_v24, 0.0  ;;  %v897_v60 = vmax.f32 %v4490_v27, 0.0  ;;  %v894_v62 = vmax.f32 %v4493_v29, 0.0  ;;  %v895_v34 = vmax.f32 %v4496_v22, 0.0 }
 0x297   :  { %v909_v63 = vrot.slane %v896_v31, 5  ;;  %v910_v1 = vrot.slane %v897_v60, 5  ;;  %v902_v46 = vrot.slane %v894_v62, 7  ;;  %v903_v58 = vrot.slane %v895_v34, 7 }
 0x299   :  { %v911_v12 = vsel %vm42_vm0, %v909_v63, %v910_v1  ;;  %v914_v36 = vsel %vm34_vm1, 0.0, %v902_v46  ;;  %v915_v38 = vsel %vm34_vm1, %v903_v58, 0.0  ;;  %v917_v39 = vsel %vm42_vm0, %v910_v1, 0.0 }
 0x29a   :  { %933 = vperm.xlu1 %4088, %v911_v12   ;;  %920 = vperm.xlu0 %4089, %v914_v36   ;;  %v916_v43 = vsel %vm42_vm0, %v915_v38, %v909_v63  ;;  %v904_v25 = vsel %vm34_vm1, %v902_v46, %v903_v58 }
 0x29e   :  { %938 = vperm.xlu1 %4088, %v917_v39   ;;  %929 = vperm.xlu0 %4089, %v916_v43  }
 0x2a2   :  { %4091 = vset.pattern.permute.xlu0 %v4193_v15  ;;  %924 = vperm.xlu1 %4088, %v904_v25  }
 0x2a3   :  { %959 = vperm.xlu0 %4091, %v916_v43  }
 0x2a6   :  { %4090 = vset.pattern.permute.xlu1 %v4193_v15 }
 0x2a7   :  { %955 = vperm.xlu0 %4091, %v904_v25   ;;  %963 = vperm.xlu1 %4090, %v911_v12  }
 0x2ab   :  { %951 = vperm.xlu1 %4090, %v914_v36   ;;  %4093 = vset.pattern.permute.xlu0 %v4192_v0 }
 0x2af   :  { %967 = vperm.xlu1 %4090, %v917_v39  }
 0x2b3   :  { %4092 = vset.pattern.permute.xlu1 %v4192_v0 }
 0x319   :  { %v934_v48 = vpop.permute.xlu1 %933  ;;  %v921_v50 = vpop.permute.xlu0 %920 }
 0x31a   :  { %v991_v10 = vmul.f32 %v987_v28, %v934_v48  ;;  %v4523_v14 = vmul.f32 %v1053_v17, %v934_v48  ;;  %v988_v4 = vmul.f32 %v987_v28, %v921_v50  ;;  %v4528_v26 = vmul.f32 %v1053_v17, %v921_v50 }
 0x31b   :  { %v948_v44 = vmul.f32 %v944_v42, %v934_v48  ;;  %v945_v53 = vmul.f32 %v944_v42, %v921_v50 }
 0x31c   :  { %v1003_v32 = vrot.slane %v991_v10, 1  ;;  %v1069_v2 = vrot.slane %v4523_v14, 2  ;;  %v998_v56 = vrot.slane %v988_v4, 1  ;;  %v1064_v20 = vrot.slane %v4528_v26, 2 }
 0x31d   :  { %v939_v35 = vpop.permute.xlu1 %938  ;;  %v930_v52 = vpop.permute.xlu0 %929 }
 0x31e   :  { %v990_v30 = vmul.f32 %v987_v28, %v930_v52  ;;  %v1056_v54 = vmul.f32 %v1053_v17, %v930_v52  ;;  %v4536_v33 = vmul.f32 %v987_v28, %v939_v35  ;;  %v949_v61 = vmul.f32 %v944_v42, %v939_v35 }
 0x31f   :  { %v4542_v6 = vmul.f32 %v1053_v17, %v939_v35  ;;  %v947_v7 = vmul.f32 %v944_v42, %v930_v52 }
 0x320   :  { %v1001_v3 = vrot.slane %v990_v30, 1  ;;  %v1067_v51 = vrot.slane %v1056_v54, 2  ;;  %v1005_v63 = vrot.slane %v4536_v33, 1 }
 0x321   :  { %v925_v40 = vpop.permute.xlu1 %924 }
 0x322   :  { %v989_v47 = vmul.f32 %v987_v28, %v925_v40  ;;  %v960_v23 = vpop.permute.xlu0 %959  ;;  %v1055_v45 = vmul.f32 %v1053_v17, %v925_v40  ;;  %v946_v1 = vmul.f32 %v944_v42, %v925_v40  ;;  %v1070_v12 = vsel %vm132_vm3, %v1067_v51, %v1069_v2 }
 0x323   :  { %v976_v49 = vmul.f32 %v4526_v55, %v960_v23  ;;  %v1023_v5 = vmul.f32 %v4531_v57, %v960_v23  ;;  %v1004_v36 = vsel %vm98_vm2, %v1001_v3, %v1003_v32  ;;  %v1089_v50 = vmul.f32 %v4534_v59, %v960_v23 }
 0x324   :  { %v999_v8 = vrot.slane %v989_v47, 1  ;;  %v1065_v43 = vrot.slane %v1055_v45, 2  ;;  %v1006_v26 = vsel %vm98_vm2, %v1003_v32, %v1005_v63 }
 0x325   :  { %v981_v38 = vadd.f32 %v976_v49, %v947_v7  ;;  %v1034_v25 = vrot.slane %v1023_v5, 1 }
 0x326   :  { %v956_v41 = vpop.permute.xlu0 %955  ;;  %v964_v16 = vpop.permute.xlu1 %963  ;;  %v1002_v28 = vsel %vm98_vm2, %v999_v8, %v1001_v3  ;;  %v1068_v45 = vsel %vm132_vm3, %v1065_v43, %v1067_v51  ;;  %v1000_v7 = vsel %vm98_vm2, %v998_v56, %v999_v8  ;;  %v1066_v56 = vsel %vm132_vm3, %v1064_v20, %v1065_v43 }
 0x327   :  { %v975_v46 = vmul.f32 %v4526_v55, %v956_v41  ;;  %v1022_v58 = vmul.f32 %v4531_v57, %v956_v41  ;;  %v1024_v39 = vmul.f32 %v4531_v57, %v964_v16  ;;  %v1088_v17 = vmul.f32 %v4534_v59, %v956_v41 }
 0x328   :  { %v977_v30 = vmul.f32 %v4526_v55, %v964_v16  ;;  %v1014_v4 = vadd.f32 %v1004_v36, %v981_v38  ;;  %v1090_v33 = vmul.f32 %v4534_v59, %v964_v16  ;;  %v1100_v16 = vrot.slane %v1089_v50, 2 }
 0x329   :  { %v980_v37 = vadd.f32 %v975_v46, %v946_v1  ;;  %v1032_v48 = vrot.slane %v1022_v58, 1  ;;  %v1036_v35 = vrot.slane %v1024_v39, 1  ;;  %v1098_v58 = vrot.slane %v1088_v17, 2 }
 0x32a   :  { %v952_v52 = vpop.permute.xlu1 %951  ;;  %v982_v32 = vadd.f32 %v977_v30, %v948_v44  ;;  %v1071_v44 = vrot.slane %v4542_v6, 2 }
 0x32b   :  { %v1013_v42 = vadd.f32 %v1002_v28, %v980_v37  ;;  %v1035_v10 = vsel %vm98_vm2, %v1032_v48, %v1034_v25  ;;  %v974_v54 = vmul.f32 %v4526_v55, %v952_v52  ;;  %v1037_v40 = vsel %vm98_vm2, %v1034_v25, %v1036_v35 }
 0x32c   :  { %v1021_v47 = vmul.f32 %v4531_v57, %v952_v52  ;;  %v1087_v49 = vmul.f32 %v4534_v59, %v952_v52  ;;  %v1047_v5 = vadd.f32 %v1037_v40, %v1014_v4  ;;  %v1102_v37 = vrot.slane %v1090_v33, 2 }
 0x32d   :  { %v1046_v23 = vadd.f32 %v1035_v10, %v1013_v42  ;;  %v979_v3 = vadd.f32 %v974_v54, %v945_v53  ;;  %v1101_v17 = vsel %vm132_vm3, %v1098_v58, %v1100_v16  ;;  %v3756_v54 = vld [vmem:[#allocation5 + $0x1e] ss:$0 sm:$0xff]  ;;  %v1072_v6 = vsel %vm132_vm3, %v1069_v2, %v1071_v44 }
 0x32e   :  { %v1031_v41 = vrot.slane %v1021_v47, 1  ;;  %v968_v1 = vpop.permute.xlu1 %967  ;;  %v1097_v39 = vrot.slane %v1087_v49, 2  ;;  %v1080_v8 = vadd.f32 %v1070_v12, %v1047_v5 }
 0x32f   :  { %v1079_v46 = vadd.f32 %v1068_v45, %v1046_v23  ;;  %v1012_v36 = vadd.f32 %v1000_v7, %v979_v3  ;;  %v978_v25 = vmul.f32 %v4526_v55, %v968_v1  ;;  %v1025_v53 = vmul.f32 %v4531_v57, %v968_v1 }
 0x330   :  { %v1033_v38 = vsel %vm98_vm2, %v1031_v41, %v1032_v48  ;;  %v1091_v51 = vmul.f32 %v4534_v59, %v968_v1  ;;  %v1015_v48 = vadd.f32 %v1006_v26, %v982_v32  ;;  %v1099_v55 = vsel %vm132_vm3, %v1097_v39, %v1098_v58 }
 0x331   :  { %v1045_v28 = vadd.f32 %v1033_v38, %v1012_v36  ;;  %v983_v52 = vadd.f32 %v978_v25, %v949_v61  ;;  %v1038_v42 = vrot.slane %v1025_v53, 1  ;;  %v1112_v30 = vadd.f32 %v1101_v17, %v1079_v46 }
 0x332   :  { %v1103_v59 = vsel %vm132_vm3, %v1100_v16, %v1102_v37  ;;  %v1104_v20 = vrot.slane %v1091_v51, 2 }
 0x333   :  { %v1078_v10 = vadd.f32 %v1066_v56, %v1045_v28  ;;  %v1016_v57 = vadd.f32 %v1005_v63, %v983_v52  ;;  %v1039_v50 = vsel %vm98_vm2, %v1036_v35, %v1038_v42  ;;  %v1113_v12 = vadd.f32 %v1103_v59, %v1080_v8 }
 0x334   :  { %v1048_v61 = vadd.f32 %v1039_v50, %v1015_v48  ;;  %v1121_v40 = vadd.f32 %v3756_v54, %v1112_v30  ;;  %v1105_v63 = vsel %vm132_vm3, %v1102_v37, %v1104_v20 }
 0x335   :  { %v1111_v4 = vadd.f32 %v1099_v55, %v1078_v10  ;;  %v1049_v43 = vadd.f32 %v1038_v42, %v1016_v57  ;;  %v1122_v33 = vadd.f32 %v3756_v54, %v1113_v12 }
 0x336   :  { %v1081_v47 = vadd.f32 %v1072_v6, %v1048_v61  ;;  %v1151_v45 = vmul.f32 %v1121_v40, %v1121_v40  ;;  %v1138_v2 = vsel %vm173_vm4, %v1121_v40, 0.0 }
 0x337   :  { %v1120_v26 = vadd.f32 %v3756_v54, %v1111_v4  ;;  %v1082_v23 = vadd.f32 %v1071_v44, %v1049_v43  ;;  %v1128_v1 = vrot.slane %v1122_v33, 2 }
 0x338   :  { %v1114_v35 = vadd.f32 %v1105_v63, %v1081_v47  ;;  %v1155_v32 = vsel %vm173_vm4, %v1151_v45, 0.0  ;;  %v1135_v63 = vld [vmem:[#allocation5 + $0x1f] sm:$0x1] }
 0x339   :  { %v1115_v3 = vadd.f32 %v1104_v20, %v1082_v23  ;;  %v1150_v49 = vmul.f32 %v1120_v26, %v1120_v26  ;;  %v1137_v41 = vsel %vm173_vm4, %v1120_v26, 0.0 }
 0x33a   :  { %v1123_v5 = vadd.f32 %v3756_v54, %v1114_v35  ;;  %v1139_v39 = vadd.f32 %v1138_v2, %v1137_v41 }
 0x33b   :  { %v1124_v7 = vadd.f32 %v3756_v54, %v1115_v3  ;;  %v1154_v58 = vsel %vm173_vm4, %v1150_v49, 0.0  ;;  %v1136_v3 = vld [vmem:[#allocation5 + $0x20] sm:$0x1] }
 0x33c   :  { %v1129_v46 = vrot.slane %v1123_v5, 2  ;;  %v1156_v51 = vadd.f32 %v1155_v32, %v1154_v58 }
 0x33d   :  { %v1131_v14 = vrot.slane %v1124_v7, 2 }
 0x33e   :  { %v1130_v36 = vsel %vm132_vm3, %v1128_v1, %v1129_v46 }
 0x33f   :  { %v1132_v38 = vsel %vm132_vm3, %v1129_v46, %v1131_v14  ;;  %v1140_v25 = vsel %vm173_vm4, %v1130_v36, 0.0  ;;  %v1152_v16 = vmul.f32 %v1130_v36, %v1130_v36 }
 0x340   :  { %v1142_v53 = vsel %vm173_vm4, %v1132_v38, 0.0  ;;  %v1153_v37 = vmul.f32 %v1132_v38, %v1132_v38  ;;  %v1141_v28 = vadd.f32 %v1140_v25, %v1139_v39 }
 0x341   :  { %v1157_v56 = vsel %vm173_vm4, %v1152_v16, 0.0 }
 0x342   :  { %v1159_v8 = vsel %vm173_vm4, %v1153_v37, 0.0  ;;  %v1143_v52 = vadd.f32 %v1142_v53, %v1141_v28  ;;  %v1158_v42 = vadd.f32 %v1157_v56, %v1156_v51 }
 0x344   :  { %v1144_v44 = vrot.slane %v1143_v52, 4  ;;  %v1160_v17 = vadd.f32 %v1159_v8, %v1158_v42 }
 0x346   :  { %v1145_v48 = vadd.f32 %v1144_v44, %v1143_v52  ;;  %v1161_v10 = vrot.slane %v1160_v17, 4  ;;  %v1196_v44 = vld [vmem:[#allocation5 + $0x21] sm:$0x3f] }
 0x348   :  { %v1146_v30 = vrot.slane %v1145_v48, 2  ;;  %v1162_v55 = vadd.f32 %v1161_v10, %v1160_v17  ;;  %v1285_v10 = vrot.slane %v1196_v44, %v4259_v19 }
 0x34a   :  { %v1147_v57 = vadd.f32 %v1146_v30, %v1145_v48  ;;  %v1163_v50 = vrot.slane %v1162_v55, 2  ;;  %v1351_v30 = vrot.slane %v1196_v44, %v4333_v13 }
 0x34c   :  { %v1148_v54 = vrot.slane %v1147_v57, 1  ;;  %v1164_v59 = vadd.f32 %v1163_v50, %v1162_v55  ;;  %v1242_v50 = vrot.slane %v1196_v44, %v4262_v21 }
 0x34e   :  { %v1149_v4 = vadd.f32 %v1148_v54, %v1147_v57  ;;  %v1165_v20 = vrot.slane %v1164_v59, 1 }
 0x350   :  { %v1166_v12 = vadd.f32 %v1165_v20, %v1164_v59  ;;  %v1167_v61 = vmul.f32 0.03125, %v1149_v4 }
 0x352   :  { %v1168_v43 = vmul.f32 0.03125, %v1166_v12  ;;  %v1169_v6 = vmul.f32 %v1167_v61, %v1167_v61  ;;  %v4607_v12 = vrot.slane %v1196_v44, %v4256_v18 }
 0x354   :  { %v1170_v47 = vsub.f32 %v1168_v43, %v1169_v6 }
 0x356   :  { %v1171_v23 = vadd.f32 1e-05, %v1170_v47  ;;  %v4612_v47 = vrot.slane %v1196_v44, %v4327_v9 }
 0x358   :  { %4113 = vrsqrt.f32 %v1171_v23 }
 0x362   :  { %v4114_v33 = vpop.eup %4113 }
 0x363   :  { %v1173_v35 = vmul.f32 %v4114_v33, %v1135_v63  ;;  %v4615_v63 = vrot.slane %v1196_v44, %v4330_v11 }
 0x365   :  { %v1174_v49 = vmul.f32 %v1173_v35, %v1167_v61  ;;  %v1179_v45 = vrot.slane %v1173_v35, %v4262_v21 }
 0x367   :  { %v1175_v5 = vsub.f32 %v1136_v3, %v1174_v49  ;;  %v1182_v7 = vmul.f32 %v1179_v45, %v1130_v36  ;;  %v1183_v41 = vmul.f32 %v1179_v45, %v1132_v38  ;;  %v1180_v46 = vmul.f32 %v1179_v45, %v1120_v26 }
 0x368   :  { %v1181_v14 = vmul.f32 %v1179_v45, %v1121_v40 }
 0x369   :  { %v1187_v1 = vrot.slane %v1175_v5, %v4262_v21 }
 0x36b   :  { %v1190_v2 = vadd.f32 %v1187_v1, %v1182_v7  ;;  %v1191_v58 = vadd.f32 %v1187_v1, %v1183_v41  ;;  %v1188_v32 = vadd.f32 %v1187_v1, %v1180_v46  ;;  %v1189_v39 = vadd.f32 %v1187_v1, %v1181_v14 }
 0x36d   :  { %v1194_v25 = vmax.f32 %v1190_v2, 0.0  ;;  %v1195_v53 = vmax.f32 %v1191_v58, 0.0  ;;  %v1192_v16 = vmax.f32 %v1188_v32, 0.0  ;;  %v1193_v37 = vmax.f32 %v1189_v39, 0.0 }
 0x36f   :  { %v1207_v28 = vrot.slane %v1194_v25, 5  ;;  %v1208_v51 = vrot.slane %v1195_v53, 5  ;;  %v1200_v56 = vrot.slane %v1192_v16, 7  ;;  %v1201_v8 = vrot.slane %v1193_v37, 7 }
 0x371   :  { %v1209_v52 = vsel %vm42_vm0, %v1207_v28, %v1208_v51  ;;  %v1212_v36 = vsel %vm34_vm1, 0.0, %v1200_v56  ;;  %v1213_v26 = vsel %vm34_vm1, %v1201_v8, 0.0  ;;  %v1215_v40 = vsel %vm42_vm0, %v1208_v51, 0.0 }
 0x372   :  { %1231 = vperm.xlu1 %4092, %v1209_v52   ;;  %1218 = vperm.xlu0 %4093, %v1212_v36   ;;  %v1214_v38 = vsel %vm42_vm0, %v1213_v26, %v1207_v28  ;;  %v1202_v42 = vsel %vm34_vm1, %v1200_v56, %v1201_v8 }
 0x376   :  { %1236 = vperm.xlu1 %4092, %v1215_v40   ;;  %1227 = vperm.xlu0 %4093, %v1214_v38  }
 0x37a   :  { %4095 = vset.pattern.permute.xlu0 %v4193_v15  ;;  %1222 = vperm.xlu1 %4092, %v1202_v42  }
 0x37b   :  { %1257 = vperm.xlu0 %4095, %v1214_v38  }
 0x37e   :  { %4094 = vset.pattern.permute.xlu1 %v4193_v15 }
 0x37f   :  { %1253 = vperm.xlu0 %4095, %v1202_v42   ;;  %1261 = vperm.xlu1 %4094, %v1209_v52  }
 0x383   :  { %1249 = vperm.xlu1 %4094, %v1212_v36   ;;  %4098 = vset.pattern.permute.xlu0 %v4192_v0 }
 0x387   :  { %1265 = vperm.xlu1 %4094, %v1215_v40  }
 0x38b   :  { %4096 = vset.pattern.permute.xlu1 %v4192_v0 }
 0x3f1   :  { %v1232_v17 = vpop.permute.xlu1 %1231  ;;  %v1219_v48 = vpop.permute.xlu0 %1218 }
 0x3f2   :  { %v1289_v54 = vmul.f32 %v1285_v10, %v1232_v17  ;;  %v4604_v59 = vmul.f32 %v1351_v30, %v1232_v17  ;;  %v1286_v61 = vmul.f32 %v1285_v10, %v1219_v48  ;;  %v4609_v43 = vmul.f32 %v1351_v30, %v1219_v48 }
 0x3f3   :  { %v1246_v35 = vmul.f32 %v1242_v50, %v1232_v17  ;;  %v1243_v49 = vmul.f32 %v1242_v50, %v1219_v48 }
 0x3f4   :  { %v1301_v3 = vrot.slane %v1289_v54, 1  ;;  %v1367_v5 = vrot.slane %v4604_v59, 2  ;;  %v1296_v46 = vrot.slane %v1286_v61, 1  ;;  %v1362_v14 = vrot.slane %v4609_v43, 2 }
 0x3f5   :  { %v1237_v55 = vpop.permute.xlu1 %1236  ;;  %v1228_v57 = vpop.permute.xlu0 %1227 }
 0x3f6   :  { %v1288_v4 = vmul.f32 %v1285_v10, %v1228_v57  ;;  %v1354_v20 = vmul.f32 %v1351_v30, %v1228_v57  ;;  %v4617_v45 = vmul.f32 %v1285_v10, %v1237_v55  ;;  %v1247_v32 = vmul.f32 %v1242_v50, %v1237_v55 }
 0x3f7   :  { %v4623_v39 = vmul.f32 %v1351_v30, %v1237_v55  ;;  %v1245_v25 = vmul.f32 %v1242_v50, %v1228_v57 }
 0x3f8   :  { %v1299_v7 = vrot.slane %v1288_v4, 1  ;;  %v1365_v41 = vrot.slane %v1354_v20, 2  ;;  %v1303_v28 = vrot.slane %v4617_v45, 1 }
 0x3f9   :  { %v1223_v6 = vpop.permute.xlu1 %1222 }
 0x3fa   :  { %v1287_v23 = vmul.f32 %v1285_v10, %v1223_v6  ;;  %v1258_v33 = vpop.permute.xlu0 %1257  ;;  %v1353_v2 = vmul.f32 %v1351_v30, %v1223_v6  ;;  %v1244_v51 = vmul.f32 %v1242_v50, %v1223_v6  ;;  %v1368_v52 = vsel %vm132_vm3, %v1365_v41, %v1367_v5 }
 0x3fb   :  { %v1274_v1 = vmul.f32 %v4607_v12, %v1258_v33  ;;  %v1321_v58 = vmul.f32 %v4612_v47, %v1258_v33  ;;  %v1302_v36 = vsel %vm98_vm2, %v1299_v7, %v1301_v3  ;;  %v1387_v48 = vmul.f32 %v4615_v63, %v1258_v33 }
 0x3fc   :  { %v1297_v53 = vrot.slane %v1287_v23, 1  ;;  %v1363_v38 = vrot.slane %v1353_v2, 2  ;;  %v1304_v43 = vsel %vm98_vm2, %v1301_v3, %v1303_v28 }
 0x3fd   :  { %v1279_v26 = vadd.f32 %v1274_v1, %v1245_v25  ;;  %v1332_v42 = vrot.slane %v1321_v58, 1 }
 0x3fe   :  { %v1254_v16 = vpop.permute.xlu0 %1253  ;;  %v1262_v37 = vpop.permute.xlu1 %1261  ;;  %v1300_v10 = vsel %vm98_vm2, %v1297_v53, %v1299_v7  ;;  %v1366_v2 = vsel %vm132_vm3, %v1363_v38, %v1365_v41  ;;  %v1298_v25 = vsel %vm98_vm2, %v1296_v46, %v1297_v53  ;;  %v1364_v46 = vsel %vm132_vm3, %v1362_v14, %v1363_v38 }
 0x3ff   :  { %v1273_v56 = vmul.f32 %v4607_v12, %v1254_v16  ;;  %v1320_v8 = vmul.f32 %v4612_v47, %v1254_v16  ;;  %v1322_v40 = vmul.f32 %v4612_v47, %v1262_v37  ;;  %v1386_v30 = vmul.f32 %v4615_v63, %v1254_v16 }
 0x400   :  { %v1275_v4 = vmul.f32 %v4607_v12, %v1262_v37  ;;  %v1312_v61 = vadd.f32 %v1302_v36, %v1279_v26  ;;  %v1388_v45 = vmul.f32 %v4615_v63, %v1262_v37  ;;  %v1398_v37 = vrot.slane %v1387_v48, 2 }
 0x401   :  { %v1278_v44 = vadd.f32 %v1273_v56, %v1244_v51  ;;  %v1330_v17 = vrot.slane %v1320_v8, 1  ;;  %v1334_v55 = vrot.slane %v1322_v40, 1  ;;  %v1396_v8 = vrot.slane %v1386_v30, 2 }
 0x402   :  { %v1250_v57 = vpop.permute.xlu1 %1249  ;;  %v1280_v3 = vadd.f32 %v1275_v4, %v1246_v35  ;;  %v1369_v35 = vrot.slane %v4623_v39, 2 }
 0x403   :  { %v1311_v50 = vadd.f32 %v1300_v10, %v1278_v44  ;;  %v1333_v54 = vsel %vm98_vm2, %v1330_v17, %v1332_v42  ;;  %v1272_v20 = vmul.f32 %v4607_v12, %v1250_v57  ;;  %v1335_v6 = vsel %vm98_vm2, %v1332_v42, %v1334_v55 }
 0x404   :  { %v1319_v23 = vmul.f32 %v4612_v47, %v1250_v57  ;;  %v1385_v1 = vmul.f32 %v4615_v63, %v1250_v57  ;;  %v1345_v58 = vadd.f32 %v1335_v6, %v1312_v61  ;;  %v1400_v44 = vrot.slane %v1388_v45, 2 }
 0x405   :  { %v1344_v33 = vadd.f32 %v1333_v54, %v1311_v50  ;;  %v1277_v7 = vadd.f32 %v1272_v20, %v1243_v49  ;;  %v1399_v30 = vsel %vm132_vm3, %v1396_v8, %v1398_v37  ;;  %v3757_v20 = vld [vmem:[#allocation5 + $0x27] ss:$0 sm:$0xff]  ;;  %v1370_v39 = vsel %vm132_vm3, %v1367_v5, %v1369_v35 }
 0x406   :  { %v1329_v16 = vrot.slane %v1319_v23, 1  ;;  %v1266_v51 = vpop.permute.xlu1 %1265  ;;  %v1395_v40 = vrot.slane %v1385_v1, 2  ;;  %v1378_v53 = vadd.f32 %v1368_v52, %v1345_v58 }
 0x407   :  { %v1377_v56 = vadd.f32 %v1366_v2, %v1344_v33  ;;  %v1310_v36 = vadd.f32 %v1298_v25, %v1277_v7  ;;  %v1276_v42 = vmul.f32 %v4607_v12, %v1266_v51  ;;  %v1323_v49 = vmul.f32 %v4612_v47, %v1266_v51 }
 0x408   :  { %v1331_v26 = vsel %vm98_vm2, %v1329_v16, %v1330_v17  ;;  %v1389_v41 = vmul.f32 %v4615_v63, %v1266_v51  ;;  %v1313_v17 = vadd.f32 %v1304_v43, %v1280_v3  ;;  %v1397_v12 = vsel %vm132_vm3, %v1395_v40, %v1396_v8 }
 0x409   :  { %v1343_v10 = vadd.f32 %v1331_v26, %v1310_v36  ;;  %v1281_v57 = vadd.f32 %v1276_v42, %v1247_v32  ;;  %v1336_v50 = vrot.slane %v1323_v49, 1  ;;  %v1410_v4 = vadd.f32 %v1399_v30, %v1377_v56 }
 0x40a   :  { %v1401_v63 = vsel %vm132_vm3, %v1398_v37, %v1400_v44  ;;  %v1402_v14 = vrot.slane %v1389_v41, 2 }
 0x40b   :  { %v1376_v54 = vadd.f32 %v1364_v46, %v1343_v10  ;;  %v1314_v47 = vadd.f32 %v1303_v28, %v1281_v57  ;;  %v1337_v48 = vsel %vm98_vm2, %v1334_v55, %v1336_v50  ;;  %v1411_v52 = vadd.f32 %v1401_v63, %v1378_v53 }
 0x40c   :  { %v1346_v32 = vadd.f32 %v1337_v48, %v1313_v17  ;;  %v1419_v6 = vadd.f32 %v3757_v20, %v1410_v4  ;;  %v1403_v28 = vsel %vm132_vm3, %v1400_v44, %v1402_v14 }
 0x40d   :  { %v1409_v61 = vadd.f32 %v1397_v12, %v1376_v54  ;;  %v1347_v38 = vadd.f32 %v1336_v50, %v1314_v47  ;;  %v1420_v45 = vadd.f32 %v3757_v20, %v1411_v52 }
 0x40e   :  { %v1379_v23 = vadd.f32 %v1370_v39, %v1346_v32  ;;  %v1449_v2 = vmul.f32 %v1419_v6, %v1419_v6  ;;  %v1436_v5 = vsel %vm173_vm4, %v1419_v6, 0.0 }
 0x40f   :  { %v1418_v43 = vadd.f32 %v3757_v20, %v1409_v61  ;;  %v1380_v33 = vadd.f32 %v1369_v35, %v1347_v38  ;;  %v1426_v51 = vrot.slane %v1420_v45, 2 }
 0x410   :  { %v1412_v55 = vadd.f32 %v1403_v28, %v1379_v23  ;;  %v1453_v3 = vsel %vm173_vm4, %v1449_v2, 0.0  ;;  %v1433_v28 = vld [vmem:[#allocation5 + $0x28] sm:$0x1] }
 0x411   :  { %v1413_v7 = vadd.f32 %v1402_v14, %v1380_v33  ;;  %v1448_v1 = vmul.f32 %v1418_v43, %v1418_v43  ;;  %v1435_v16 = vsel %vm173_vm4, %v1418_v43, 0.0 }
 0x412   :  { %v1421_v58 = vadd.f32 %v3757_v20, %v1412_v55  ;;  %v1437_v36 = vadd.f32 %v1436_v5, %v1435_v16 }
 0x413   :  { %v1422_v25 = vadd.f32 %v3757_v20, %v1413_v7  ;;  %v1452_v8 = vsel %vm173_vm4, %v1448_v1, 0.0  ;;  %v1434_v7 = vld [vmem:[#allocation5 + $0x29] sm:$0x1] }
 0x414   :  { %v1427_v56 = vrot.slane %v1421_v58, 2  ;;  %v1454_v10 = vadd.f32 %v1453_v3, %v1452_v8 }
 0x415   :  { %v1429_v59 = vrot.slane %v1422_v25, 2 }
 0x416   :  { %v1428_v26 = vsel %vm132_vm3, %v1426_v51, %v1427_v56 }
 0x417   :  { %v1430_v40 = vsel %vm132_vm3, %v1427_v56, %v1429_v59  ;;  %v1438_v42 = vsel %vm173_vm4, %v1428_v26, 0.0  ;;  %v1450_v37 = vmul.f32 %v1428_v26, %v1428_v26 }
 0x418   :  { %v1440_v49 = vsel %vm173_vm4, %v1430_v40, 0.0  ;;  %v1451_v44 = vmul.f32 %v1430_v40, %v1430_v40  ;;  %v1439_v41 = vadd.f32 %v1438_v42, %v1437_v36 }
 0x419   :  { %v1455_v46 = vsel %vm173_vm4, %v1450_v37, 0.0 }
 0x41a   :  { %v1457_v53 = vsel %vm173_vm4, %v1451_v44, 0.0  ;;  %v1441_v57 = vadd.f32 %v1440_v49, %v1439_v41  ;;  %v1456_v50 = vadd.f32 %v1455_v46, %v1454_v10 }
 0x41c   :  { %v1442_v35 = vrot.slane %v1441_v57, 4  ;;  %v1458_v30 = vadd.f32 %v1457_v53, %v1456_v50 }
 0x41e   :  { %v1443_v17 = vadd.f32 %v1442_v35, %v1441_v57  ;;  %v1459_v54 = vrot.slane %v1458_v30, 4  ;;  %v1867_v57 = vld [vmem:[#allocation5 + $0x42] sm:$0x3] }
 0x41f   :  { %v1878_v50 = vrot.slane %v1867_v57, %v4256_v18  ;;  %v1872_v35 = vrot.slane %v1867_v57, %v4262_v21 }
 0x420   :  { %v1444_v4 = vrot.slane %v1443_v17, 2  ;;  %v1460_v12 = vadd.f32 %v1459_v54, %v1458_v30  ;;  %v1498_v54 = vld [vmem:[#allocation5 + $0x2a] sm:$0x3f] }
 0x422   :  { %v1445_v47 = vadd.f32 %v1444_v4, %v1443_v17  ;;  %v1461_v48 = vrot.slane %v1460_v12, 2 }
 0x424   :  { %v1446_v20 = vrot.slane %v1445_v47, 1  ;;  %v1462_v63 = vadd.f32 %v1461_v48, %v1460_v12 }
 0x426   :  { %v1447_v61 = vadd.f32 %v1446_v20, %v1445_v47  ;;  %v1463_v14 = vrot.slane %v1462_v63, 1 }
 0x428   :  { %v1464_v52 = vadd.f32 %v1463_v14, %v1462_v63  ;;  %v1465_v32 = vmul.f32 0.03125, %v1447_v61 }
 0x42a   :  { %v1466_v38 = vmul.f32 0.03125, %v1464_v52  ;;  %v1467_v39 = vmul.f32 %v1465_v32, %v1465_v32 }
 0x42c   :  { %v1468_v23 = vsub.f32 %v1466_v38, %v1467_v39  ;;  %v1564_v38 = vrot.slane %v1498_v54, %v4259_v19 }
 0x42e   :  { %v1469_v33 = vadd.f32 1e-05, %v1468_v23 }
 0x430   :  { %4115 = vrsqrt.f32 %v1469_v33  ;;  %v1580_v33 = vrot.slane %v1498_v54, %v4327_v9 }
 0x43a   :  { %v4116_v45 = vpop.eup %4115 }
 0x43b   :  { %v1471_v55 = vmul.f32 %v4116_v45, %v1433_v28 }
 0x43d   :  { %v1472_v1 = vmul.f32 %v1471_v55, %v1465_v32  ;;  %v1477_v2 = vrot.slane %v1471_v55, %v4262_v21 }
 0x43f   :  { %v1473_v58 = vsub.f32 %v1434_v7, %v1472_v1  ;;  %v1478_v25 = vmul.f32 %v1477_v2, %v1418_v43  ;;  %v1479_v16 = vmul.f32 %v1477_v2, %v1419_v6  ;;  %v1480_v51 = vmul.f32 %v1477_v2, %v1428_v26 }
 0x440   :  { %v1481_v56 = vmul.f32 %v1477_v2, %v1430_v40 }
 0x441   :  { %v1485_v59 = vrot.slane %v1473_v58, %v4262_v21  ;;  %v1596_v58 = vrot.slane %v1498_v54, %v4333_v13 }
 0x443   :  { %v1486_v5 = vadd.f32 %v1485_v59, %v1478_v25  ;;  %v1487_v8 = vadd.f32 %v1485_v59, %v1479_v16  ;;  %v1488_v3 = vadd.f32 %v1485_v59, %v1480_v51  ;;  %v1489_v36 = vadd.f32 %v1485_v59, %v1481_v56 }
 0x444   :  { %v1612_v16 = vrot.slane %v1498_v54, %v4330_v11 }
 0x445   :  { %v1490_v42 = vadd.f32 %v1486_v5, %v894_v62  ;;  %v1491_v49 = vadd.f32 %v1487_v8, %v895_v34  ;;  %v1492_v37 = vadd.f32 %v1488_v3, %v896_v31  ;;  %v1493_v43 = vadd.f32 %v1489_v36, %v897_v60 }
 0x447   :  { %v1494_v6 = vmax.f32 %v1490_v42, 0.0  ;;  %v1495_v26 = vmax.f32 %v1491_v49, 0.0  ;;  %v1496_v40 = vmax.f32 %v1492_v37, 0.0  ;;  %v1497_v44 = vmax.f32 %v1493_v43, 0.0  ;;  %v3758_v43 = vld [vmem:[#allocation5 + $0x30] ss:$0 sm:$0xff] }
 0x449   :  { %1502 = vst.msk [vmem:[#allocation2 + $0x10] sm:$0xff] %vm173_vm4, %v1496_v40  ;;  %1503 = vst.msk [vmem:[#allocation2 + $0x18] sm:$0xff] %vm173_vm4, %v1497_v44 }
 0x44a   :  { %1500 = vst.msk [vmem:[#allocation2] sm:$0xff] %vm173_vm4, %v1494_v6  ;;  %1501 = vst.msk [vmem:[#allocation2 + $0x8] sm:$0xff] %vm173_vm4, %v1495_v26  ;;  %vm3143_vm4 = vcmask 261120  }
 0x450   :  { %v1510_v31 = vld [vmem:[#allocation2 + $0x11] ss:$2 sm:$0xff]  ;;  %v1506_v60 = vld [vmem:[#allocation2 + $0x10] ss:$2 sm:$0xff] }
 0x451   :  { %v1508_v29 = vld [vmem:[#allocation2 + $0x1] ss:$2 sm:$0xff]  ;;  %v1504_v22 = vld [vmem:[#allocation2] ss:$2 sm:$0xff]  ;;  %v1515_v62 = vrot.slane %v1510_v31, 7 }
 0x452   :  { %1586 = vperm.xlu0 %4098, %v1508_v29   ;;  %1553 = vperm.xlu1 %4096, %v1504_v22   ;;  %v1512_v24 = vrot.slane %v1508_v29, 7 }
 0x453   :  { %v1518_v34 = vsel %vm34_vm1, 0.0, %v1515_v62 }
 0x454   :  { %v1517_v27 = vsel %vm34_vm1, 0.0, %v1512_v24 }
 0x456   :  { %1521 = vperm.xlu0 %4098, %v1517_v27   ;;  %1558 = vperm.xlu1 %4096, %v1506_v60  }
 0x45a   :  { %4101 = vset.pattern.permute.xlu0 %v4193_v15  ;;  %4097 = vset.pattern.permute.xlu1 %v4193_v15 }
 0x45b   :  { %1540 = vperm.xlu0 %4101, %v1518_v34   ;;  %1574 = vperm.xlu1 %4097, %v1506_v60  }
 0x45f   :  { %1570 = vperm.xlu0 %4101, %v1504_v22   ;;  %4099 = vset.pattern.permute.xlu1 %v4192_v0 }
 0x460   :  { %1526 = vperm.xlu1 %4099, %v1518_v34  }
 0x463   :  { %1606 = vperm.xlu0 %4101, %v1510_v31  }
 0x464   :  { %4100 = vset.pattern.permute.xlu1 %v4193_v15 }
 0x465   :  { %1536 = vperm.xlu1 %4100, %v1517_v27  }
 0x467   :  { %4104 = vset.pattern.permute.xlu0 %v4192_v0 }
 0x469   :  { %4102 = vset.pattern.permute.xlu1 %v4192_v0  ;;  %v1546_v0 = vrot.slane %v1498_v54, %v4256_v18 }
 0x46a   :  { %1590 = vperm.xlu1 %4102, %v1510_v31  }
 0x46e   :  { %4103 = vset.pattern.permute.xlu1 %v4193_v15  ;;  %v1532_v15 = vrot.slane %v1498_v54, %v4262_v21 }
 0x46f   :  { %1602 = vperm.xlu1 %4103, %v1508_v29  }
 0x4d1   :  { %v1587_v10 = vpop.permute.xlu0 %1586  ;;  %v1554_v41 = vpop.permute.xlu1 %1553 }
 0x4d2   :  { %v1873_v20 = vmul.f32 %v1872_v35, %v1554_v41  ;;  %v1565_v1 = vmul.f32 %v1564_v38, %v1554_v41  ;;  %v1597_v37 = vmul.f32 %v1596_v58, %v1587_v10 }
 0x4d5   :  { %v1522_v46 = vpop.permute.xlu0 %1521  ;;  %v1559_v53 = vpop.permute.xlu1 %1558 }
 0x4d6   :  { %v1874_v4 = vmul.f32 %v1872_v35, %v1559_v53  ;;  %v1566_v23 = vmul.f32 %v1564_v38, %v1559_v53  ;;  %v1533_v45 = vmul.f32 %v1532_v15, %v1522_v46 }
 0x4da   :  { %v1541_v30 = vpop.permute.xlu0 %1540  ;;  %v1575_v17 = vpop.permute.xlu1 %1574 }
 0x4db   :  { %v1880_v12 = vmul.f32 %v1878_v50, %v1575_v17  ;;  %v1548_v14 = vmul.f32 %v1546_v0, %v1541_v30  ;;  %v1582_v25 = vmul.f32 %v1580_v33, %v1575_v17 }
 0x4dd   :  { %v4696_v47 = vadd.f32 %v1880_v12, %v1874_v4 }
 0x4de   :  { %v1571_v48 = vpop.permute.xlu0 %1570 }
 0x4df   :  { %v1879_v63 = vmul.f32 %v1878_v50, %v1571_v48  ;;  %v1527_v61 = vpop.permute.xlu1 %1526  ;;  %v1581_v51 = vmul.f32 %v1580_v33, %v1571_v48 }
 0x4e0   :  { %v1534_v52 = vmul.f32 %v1532_v15, %v1527_v61 }
 0x4e1   :  { %v4699_v32 = vadd.f32 %v1879_v63, %v1873_v20 }
 0x4e2   :  { %v1550_v39 = vadd.f32 %v1548_v14, %v1534_v52  ;;  %v1607_v56 = vpop.permute.xlu0 %1606  ;;  %v1623_v14 = vld [vmem:[#allocation5 + $0x31] sm:$0x1] }
 0x4e3   :  { %v1614_v42 = vmul.f32 %v1612_v16, %v1607_v56 }
 0x4e4   :  { %v1537_v28 = vpop.permute.xlu1 %1536  ;;  %v1568_v7 = vadd.f32 %v1566_v23, %v1550_v39  ;;  %v1624_v39 = vld [vmem:[#allocation5 + $0x32] sm:$0x1] }
 0x4e5   :  { %v1547_v55 = vmul.f32 %v1546_v0, %v1537_v28 }
 0x4e6   :  { %v1584_v8 = vadd.f32 %v1582_v25, %v1568_v7 }
 0x4e7   :  { %v1549_v2 = vadd.f32 %v1547_v55, %v1533_v45 }
 0x4e9   :  { %v1567_v59 = vadd.f32 %v1565_v1, %v1549_v2  ;;  %v1591_v5 = vpop.permute.xlu1 %1590  ;;  %v1669_v1 = vld [vmem:[#allocation5 + $0x33] sm:$0xff]  ;;  %v1670_v2 = vld [vmem:[#allocation5 + $0x3b] sm:$0xf] }
 0x4ea   :  { %v1598_v3 = vmul.f32 %v1596_v58, %v1591_v5  ;;  %v4194_v58 = vmov 0.0|0.0   ;;  %v4003_v25 = vpack.c.bf16 %v1670_v2, %v1669_v1 }
 0x4eb   :  { %v1583_v36 = vadd.f32 %v1581_v51, %v1567_v59  ;;  %4002 = vmatprep.subr.bf16.mxu0 %v4194_v58  ;;  %4006 = vmatprep.subr.bf16.mxu1 %v4194_v58 }
 0x4ec   :  { %v1600_v49 = vadd.f32 %v1598_v3, %v1584_v8  ;;  %4005 = vmatpush3.bf16.msk.msra.mxu0 %vm4713_vm8, %v4003_v25 }
 0x4ed   :  { %v1599_v40 = vadd.f32 %v1597_v37, %v1583_v36  ;;  %4010 = vmatprep.subr.bf16.mxu0 %v4194_v58  ;;  %v4197_v36 = vmov 0.0  }
 0x4ee   :  { %v1616_v6 = vadd.f32 %v1614_v42, %v1600_v49  ;;  %v1603_v26 = vpop.permute.xlu1 %1602  ;;  %3867 = vmatprep.mubr.msk.f32.mxu0 %vm4196_vm9, %v4197_v36  ;;  %3880 = vmatprep.mubr.msk.f32.mxu1 %vm4196_vm9, %v4197_v36 }
 0x4ef   :  { %v1613_v44 = vmul.f32 %v1612_v16, %v1603_v26 }
 0x4f0   :  { %v1622_v29 = vadd.f32 %v3758_v43, %v1616_v6 }
 0x4f1   :  { %v1615_v13 = vadd.f32 %v1613_v44, %v1599_v40 }
 0x4f2   :  { %v1636_v22 = vmul.f32 %v1622_v29, %v1622_v29  ;;  %v1627_v24 = vsel %vm1625_vm5, %v1622_v29, 0.0 }
 0x4f3   :  { %v1621_v11 = vadd.f32 %v3758_v43, %v1615_v13 }
 0x4f4   :  { %v1638_v62 = vsel %vm1625_vm5, %v1636_v22, 0.0 }
 0x4f5   :  { %v1626_v31 = vsel %vm1625_vm5, %v1621_v11, 0.0  ;;  %v1635_v27 = vmul.f32 %v1621_v11, %v1621_v11 }
 0x4f6   :  { %v1628_v60 = vadd.f32 %v1627_v24, %v1626_v31 }
 0x4f7   :  { %v1637_v34 = vsel %vm1625_vm5, %v1635_v27, 0.0 }
 0x4f8   :  { %v1629_v10 = vrot.slane %v1628_v60, 4  ;;  %v1639_v41 = vadd.f32 %v1638_v62, %v1637_v34 }
 0x4fa   :  { %v1630_v46 = vadd.f32 %v1629_v10, %v1628_v60  ;;  %v1640_v53 = vrot.slane %v1639_v41, 4 }
 0x4fc   :  { %v1631_v57 = vrot.slane %v1630_v46, 2  ;;  %v1641_v50 = vadd.f32 %v1640_v53, %v1639_v41 }
 0x4fe   :  { %v1632_v35 = vadd.f32 %v1631_v57, %v1630_v46  ;;  %v1642_v30 = vrot.slane %v1641_v50, 2 }
 0x500   :  { %v1633_v17 = vrot.slane %v1632_v35, 1  ;;  %v1643_v54 = vadd.f32 %v1642_v30, %v1641_v50 }
 0x502   :  { %v1634_v4 = vadd.f32 %v1633_v17, %v1632_v35  ;;  %v1644_v12 = vrot.slane %v1643_v54, 1  ;;  %v1893_v17 = vld [vmem:[#allocation5 + $0x45] sm:$0xff] }
 0x504   :  { %v1645_v0 = vadd.f32 %v1644_v12, %v1643_v54  ;;  %v1646_v15 = vmul.f32 0.0625, %v1634_v4  ;;  %v1894_v54 = vld [vmem:[#allocation5 + $0x4d] sm:$0xf] }
 0x505   :  { %v4007_v4 = vpack.c.bf16 %v1894_v54, %v1893_v17 }
 0x506   :  { %v1647_v48 = vmul.f32 0.0625, %v1645_v0  ;;  %v1648_v20 = vmul.f32 %v1646_v15, %v1646_v15 }
 0x507   :  { %4009 = vmatpush3.bf16.msk.msra.mxu1 %vm4713_vm8, %v4007_v4 }
 0x508   :  { %v1649_v63 = vsub.f32 %v1647_v48, %v1648_v20  ;;  %4014 = vmatprep.subr.bf16.mxu1 %v4194_v58  ;;  %v3759_v48 = vld [vmem:[#allocation5 + $0x3f] ss:$0 sm:$0xff] }
 0x50a   :  { %v1650_v61 = vadd.f32 1e-05, %v1649_v63 }
 0x50c   :  { %4117 = vrsqrt.f32 %v1650_v61 }
 0x516   :  { %v4118_v52 = vpop.eup %4117 }
 0x517   :  { %v1652_v38 = vmul.f32 %v4118_v52, %v1623_v14 }
 0x519   :  { %v1653_v23 = vmul.f32 %v1652_v38, %v1646_v15  ;;  %v1658_v33 = vrot.slane %v1652_v38, %v4262_v21 }
 0x51b   :  { %v1654_v28 = vsub.f32 %v1624_v39, %v1653_v23  ;;  %v1659_v45 = vmul.f32 %v1658_v33, %v1621_v11  ;;  %v1660_v55 = vmul.f32 %v1658_v33, %v1622_v29 }
 0x51d   :  { %v1664_v7 = vrot.slane %v1654_v28, %v4262_v21 }
 0x51f   :  { %v1665_v51 = vadd.f32 %v1664_v7, %v1659_v45  ;;  %v1666_v56 = vadd.f32 %v1664_v7, %v1660_v55 }
 0x521   :  { %v1667_v59 = vmax.f32 %v1665_v51, 0.0  ;;  %v1668_v5 = vmax.f32 %v1666_v56, 0.0 }
 0x523   :  { %v1673_v8 = vrot.slane %v1667_v59, 7  ;;  %v1676_v3 = vrot.slane %v1668_v5, 5 }
 0x525   :  { %v1679_v42 = vsel %vm34_vm1, %v1673_v8, 0.0  ;;  %v1681_v49 = vsel %vm42_vm0, %v1676_v3, 0.0  ;;  %v1678_v37 = vsel %vm34_vm1, 0.0, %v1673_v8 }
 0x526   :  { %v1680_v43 = vsel %vm42_vm0, %v1679_v42, %v1676_v3  ;;  %v1688_v6 = vrot.slane %v1681_v49, 1  ;;  %v1685_v26 = vrot.slane %v1678_v37, 1  ;;  %v1699_v13 = vrot.slane %v1678_v37, 2 }
 0x527   :  { %v1686_v40 = vrot.slane %v1680_v43, 1  ;;  %v1700_v22 = vrot.slane %v1680_v43, 2  ;;  %v1702_v24 = vrot.slane %v1681_v49, 2 }
 0x529   :  { %v1689_v44 = vsel %vm98_vm2, %v1686_v40, %v1688_v6  ;;  %v1687_v29 = vsel %vm98_vm2, %v1685_v26, %v1686_v40  ;;  %v1701_v11 = vsel %vm132_vm3, %v1699_v13, %v1700_v22  ;;  %v1703_v31 = vsel %vm132_vm3, %v1700_v22, %v1702_v24 }
 0x52a   :  { %1692 = vrot.lane.b32.xlu0 %v1689_v44, %s4198_s0  ;;  %1690 = vrot.lane.b32.xlu1 %v1687_v29, %s4198_s0 }
 0x52e   :  { %1694 = vrot.lane.b32.xlu0 %v1688_v6, %s4198_s0  ;;  %1704 = vrot.lane.b32.xlu1 %v1701_v11, %s4191_s20 }
 0x532   :  { %1706 = vrot.lane.b32.xlu1 %v1703_v31, %s4191_s20 }
 0x536   :  { %1708 = vrot.lane.b32.xlu1 %v1702_v24, %s4191_s20  ;;  %v1824_v24 = vld [vmem:[#allocation5 + $0x40] sm:$0x1] }
 0x59c   :  { %v1691_v27 = vpop.permute.xlu1 %1690  ;;  %v1693_v60 = vpop.permute.xlu0 %1692 }
 0x59d   :  { %v1713_v62 = vsel %vm1625_vm5, %v1678_v37, %v1691_v27  ;;  %v1714_v41 = vsel %vm1625_vm5, %v1680_v43, %v1693_v60  ;;  %v1825_v60 = vld [vmem:[#allocation5 + $0x41] sm:$0x1] }
 0x5a0   :  { %v1705_v34 = vpop.permute.xlu1 %1704  ;;  %v1695_v53 = vpop.permute.xlu0 %1694 }
 0x5a1   :  { %v1717_v10 = vsel %vm1716_vm10, %v1713_v62, %v1705_v34  ;;  %v1715_v50 = vsel %vm1625_vm5, %v1681_v49, %v1695_v53  ;;  %v3764_v53 = vld [vmem:[#allocation5 + $0x44] ss:$0 sm:$0xff] }
 0x5a2   :  { %3868 = vmatmul.mubr.msk.f32.vlgmr.msra.gmra.mrb[0].mxu0 %vm1724_vm11, %v1717_v10 }
 0x5a3   :  { %3870 = vmatprep.mubr.msk.f32.mxu0 %vm4196_vm9, %v4197_v36 }
 0x5a4   :  { %v1707_v46 = vpop.permute.xlu1 %1706 }
 0x5a5   :  { %v1718_v57 = vsel %vm1716_vm10, %v1714_v41, %v1707_v46 }
 0x5a6   :  { %3871 = vmatmul.mubr.msk.f32.gmra.mrb[2].mxu0 %vm1724_vm11, %v1718_v57 }
 0x5a7   :  { %3873 = vmatprep.mubr.msk.f32.mxu0 %vm4196_vm9, %v4197_v36 }
 0x5a8   :  { %v1709_v35 = vpop.permute.xlu1 %1708 }
 0x5a9   :  { %v1719_v30 = vsel %vm1716_vm10, %v1715_v50, %v1709_v35  ;;  %v1888_v50 = vadd.f32 %v3764_v53, %v4696_v47  ;;  %v1887_v35 = vadd.f32 %v3764_v53, %v4699_v32 }
 0x5aa   :  { %3874 = vmatmul.mubr.msk.f32.gmra.mrb[4].mxu0 %vm1724_vm11, %v1719_v30 }
 0x5ab   :  { %3893 = vmatprep.mubr.msk.f32.mxu0 %vm4196_vm9, %v4197_v36 }
 0x675   :  { %v1804_v12 = vpop.f32.mrb[0].mxu0 }
 0x676   :  { %v3869_v0 = vpop.f32.mrb[1].mxu0  ;;  %v1805_v61 = vadd.f32 %v3759_v48, %v1804_v12 }
 0x678   :  { %v1835_v33 = vmul.f32 %v1805_v61, %v1805_v61  ;;  %v1826_v45 = vsel %vm1625_vm5, %v1805_v61, 0.0 }
 0x679   :  { %v1809_v15 = vpop.f32.mrb[2].mxu0 }
 0x67a   :  { %v3872_v20 = vpop.f32.mrb[3].mxu0  ;;  %v1810_v63 = vadd.f32 %v3759_v48, %v1809_v15  ;;  %v1837_v2 = vsel %vm1625_vm5, %v1835_v33, 0.0 }
 0x67c   :  { %v1820_v39 = vrot.slane %v1810_v63, 2 }
 0x67d   :  { %v1814_v14 = vpop.f32.mrb[4].mxu0 }
 0x67e   :  { %v1815_v52 = vadd.f32 %v3759_v48, %v1814_v14  ;;  %v3875_v38 = vpop.f32.mrb[5].mxu0 }
 0x680   :  { %v1821_v23 = vrot.slane %v1815_v52, 2 }
 0x682   :  { %v1822_v28 = vsel %vm132_vm3, %v1820_v39, %v1821_v23 }
 0x683   :  { %v1827_v55 = vsel %vm1625_vm5, %v1822_v28, 0.0  ;;  %v1836_v7 = vmul.f32 %v1822_v28, %v1822_v28 }
 0x684   :  { %v1828_v1 = vadd.f32 %v1827_v55, %v1826_v45 }
 0x685   :  { %v1838_v25 = vsel %vm1625_vm5, %v1836_v7, 0.0 }
 0x686   :  { %v1829_v51 = vrot.slane %v1828_v1, 4  ;;  %v1839_v56 = vadd.f32 %v1838_v25, %v1837_v2 }
 0x688   :  { %v1830_v59 = vadd.f32 %v1829_v51, %v1828_v1  ;;  %v1840_v5 = vrot.slane %v1839_v56, 4 }
 0x68a   :  { %v1831_v8 = vrot.slane %v1830_v59, 2  ;;  %v1841_v3 = vadd.f32 %v1840_v5, %v1839_v56 }
 0x68c   :  { %v1832_v42 = vadd.f32 %v1831_v8, %v1830_v59  ;;  %v1842_v49 = vrot.slane %v1841_v3, 2 }
 0x68e   :  { %v1833_v37 = vrot.slane %v1832_v42, 1  ;;  %v1843_v43 = vadd.f32 %v1842_v49, %v1841_v3 }
 0x690   :  { %v1834_v6 = vadd.f32 %v1833_v37, %v1832_v42  ;;  %v1844_v26 = vrot.slane %v1843_v43, 1  ;;  %v2090_v37 = vld [vmem:[#allocation5 + $0x54] sm:$0xff] }
 0x692   :  { %v1845_v40 = vadd.f32 %v1844_v26, %v1843_v43  ;;  %v1846_v44 = vmul.f32 0.0625, %v1834_v6  ;;  %v2091_v43 = vld [vmem:[#allocation5 + $0x5c] sm:$0xf] }
 0x693   :  { %v4011_v6 = vpack.c.bf16 %v2091_v43, %v2090_v37 }
 0x694   :  { %v1847_v29 = vmul.f32 0.0625, %v1845_v40  ;;  %v1848_v13 = vmul.f32 %v1846_v44, %v1846_v44 }
 0x695   :  { %4013 = vmatpush3.bf16.msk.msra.mxu0 %vm4713_vm8, %v4011_v6 }
 0x696   :  { %v1849_v22 = vsub.f32 %v1847_v29, %v1848_v13  ;;  %v3765_v29 = vld [vmem:[#allocation5 + $0x51] ss:$0 sm:$0xff] }
 0x698   :  { %v1850_v11 = vadd.f32 1e-05, %v1849_v22 }
 0x69a   :  { %4119 = vrsqrt.f32 %v1850_v11 }
 0x6a4   :  { %v4120_v31 = vpop.eup %4119 }
 0x6a5   :  { %v1852_v27 = vmul.f32 %v4120_v31, %v1824_v24 }
 0x6a7   :  { %v1853_v62 = vmul.f32 %v1852_v27, %v1846_v44  ;;  %v1858_v34 = vrot.slane %v1852_v27, %v4262_v21 }
 0x6a9   :  { %v1854_v10 = vsub.f32 %v1825_v60, %v1853_v62  ;;  %v1859_v41 = vmul.f32 %v1858_v34, %v1805_v61  ;;  %v1860_v46 = vmul.f32 %v1858_v34, %v1822_v28 }
 0x6ab   :  { %v1864_v57 = vrot.slane %v1854_v10, %v4262_v21 }
 0x6ad   :  { %v1866_v30 = vadd.f32 %v1864_v57, %v1860_v46  ;;  %v1865_v17 = vadd.f32 %v1864_v57, %v1859_v41 }
 0x6af   :  { %v4766_v54 = vadd.f32 %v1888_v50, %v1866_v30  ;;  %v4768_v4 = vadd.f32 %v1887_v35, %v1865_v17 }
 0x6b1   :  { %v1892_v12 = vmax.f32 %v4766_v54, 0.0  ;;  %v1891_v0 = vmax.f32 %v4768_v4, 0.0 }
 0x6b3   :  { %v1897_v15 = vrot.slane %v1891_v0, 7  ;;  %v1900_v48 = vrot.slane %v1892_v12, 5 }
 0x6b5   :  { %v1902_v47 = vsel %vm34_vm1, 0.0, %v1897_v15  ;;  %v1903_v32 = vsel %vm34_vm1, %v1897_v15, 0.0  ;;  %v1905_v14 = vsel %vm42_vm0, %v1900_v48, 0.0 }
 0x6b6   :  { %v1904_v20 = vsel %vm42_vm0, %v1903_v32, %v1900_v48  ;;  %v1923_v63 = vrot.slane %v1902_v47, 2  ;;  %v1909_v61 = vrot.slane %v1902_v47, 1  ;;  %v1926_v33 = vrot.slane %v1905_v14, 2 }
 0x6b7   :  { %v1924_v52 = vrot.slane %v1904_v20, 2  ;;  %v1910_v38 = vrot.slane %v1904_v20, 1  ;;  %v1912_v28 = vrot.slane %v1905_v14, 1 }
 0x6b9   :  { %v1925_v39 = vsel %vm132_vm3, %v1923_v63, %v1924_v52  ;;  %v1911_v23 = vsel %vm98_vm2, %v1909_v61, %v1910_v38  ;;  %v1927_v45 = vsel %vm132_vm3, %v1924_v52, %v1926_v33  ;;  %v1913_v55 = vsel %vm98_vm2, %v1910_v38, %v1912_v28 }
 0x6ba   :  { %1928 = vrot.lane.b32.xlu1 %v1925_v39, %s4191_s20  ;;  %1914 = vrot.lane.b32.xlu0 %v1911_v23, %s4198_s0 }
 0x6be   :  { %1930 = vrot.lane.b32.xlu1 %v1927_v45, %s4191_s20  ;;  %1916 = vrot.lane.b32.xlu0 %v1913_v55, %s4198_s0 }
 0x6c2   :  { %1932 = vrot.lane.b32.xlu1 %v1926_v33, %s4191_s20  ;;  %1918 = vrot.lane.b32.xlu0 %v1912_v28, %s4198_s0 }
 0x72c   :  { %v1929_v7 = vpop.permute.xlu1 %1928  ;;  %v1915_v1 = vpop.permute.xlu0 %1914 }
 0x72d   :  { %v1937_v2 = vsel %vm1625_vm5, %v1902_v47, %v1915_v1 }
 0x72e   :  { %v1940_v25 = vsel %vm1716_vm10, %v1937_v2, %v1929_v7  ;;  %v2045_v7 = vld [vmem:[#allocation5 + $0x52] sm:$0x1] }
 0x72f   :  { %3881 = vmatmul.mubr.msk.f32.vlgmr.msra.gmra.mrb[0].mxu1 %vm1724_vm11, %v1940_v25  ;;  %v2046_v25 = vld [vmem:[#allocation5 + $0x53] sm:$0x1] }
 0x730   :  { %v1931_v51 = vpop.permute.xlu1 %1930  ;;  %v1917_v56 = vpop.permute.xlu0 %1916  ;;  %3883 = vmatprep.mubr.msk.f32.mxu1 %vm4196_vm9, %v4197_v36 }
 0x731   :  { %v1938_v59 = vsel %vm1625_vm5, %v1904_v20, %v1917_v56 }
 0x732   :  { %v1941_v5 = vsel %vm1716_vm10, %v1938_v59, %v1931_v51 }
 0x733   :  { %3884 = vmatmul.mubr.msk.f32.gmra.mrb[2].mxu1 %vm1724_vm11, %v1941_v5 }
 0x734   :  { %v1933_v8 = vpop.permute.xlu1 %1932  ;;  %v1919_v3 = vpop.permute.xlu0 %1918  ;;  %3886 = vmatprep.mubr.msk.f32.mxu1 %vm4196_vm9, %v4197_v36 }
 0x735   :  { %v1939_v42 = vsel %vm1625_vm5, %v1905_v14, %v1919_v3 }
 0x736   :  { %v1942_v49 = vsel %vm1716_vm10, %v1939_v42, %v1933_v8 }
 0x737   :  { %3887 = vmatmul.mubr.msk.f32.gmra.mrb[4].mxu1 %vm1724_vm11, %v1942_v49 }
 0x738   :  { %3906 = vmatprep.mubr.msk.f32.mxu1 %vm4196_vm9, %v4197_v36 }
 0x802   :  { %v2025_v26 = vpop.f32.mrb[0].mxu1 }
 0x803   :  { %v3882_v40 = vpop.f32.mrb[1].mxu1  ;;  %v2026_v11 = vadd.f32 %v3765_v29, %v2025_v26 }
 0x805   :  { %v2056_v34 = vmul.f32 %v2026_v11, %v2026_v11  ;;  %v2047_v41 = vsel %vm1625_vm5, %v2026_v11, 0.0 }
 0x806   :  { %v2030_v44 = vpop.f32.mrb[2].mxu1 }
 0x807   :  { %v3885_v13 = vpop.f32.mrb[3].mxu1  ;;  %v2031_v22 = vadd.f32 %v3765_v29, %v2030_v44  ;;  %v2058_v50 = vsel %vm1625_vm5, %v2056_v34, 0.0 }
 0x809   :  { %v2041_v60 = vrot.slane %v2031_v22, 2 }
 0x80a   :  { %v2035_v24 = vpop.f32.mrb[4].mxu1 }
 0x80b   :  { %v2036_v31 = vadd.f32 %v3765_v29, %v2035_v24  ;;  %v3888_v27 = vpop.f32.mrb[5].mxu1 }
 0x80d   :  { %v2042_v62 = vrot.slane %v2036_v31, 2 }
 0x80f   :  { %v2043_v10 = vsel %vm132_vm3, %v2041_v60, %v2042_v62 }
 0x810   :  { %v2048_v46 = vsel %vm1625_vm5, %v2043_v10, 0.0  ;;  %v2057_v53 = vmul.f32 %v2043_v10, %v2043_v10 }
 0x811   :  { %v2049_v57 = vadd.f32 %v2048_v46, %v2047_v41 }
 0x812   :  { %v2059_v35 = vsel %vm1625_vm5, %v2057_v53, 0.0 }
 0x813   :  { %v2050_v30 = vrot.slane %v2049_v57, 4  ;;  %v2060_v17 = vadd.f32 %v2059_v35, %v2058_v50 }
 0x815   :  { %v2051_v15 = vadd.f32 %v2050_v30, %v2049_v57  ;;  %v2061_v48 = vrot.slane %v2060_v17, 4 }
 0x817   :  { %v2052_v47 = vrot.slane %v2051_v15, 2  ;;  %v2062_v32 = vadd.f32 %v2061_v48, %v2060_v17 }
 0x819   :  { %v2053_v20 = vadd.f32 %v2052_v47, %v2051_v15  ;;  %v2063_v63 = vrot.slane %v2062_v32, 2 }
 0x81b   :  { %v2054_v61 = vrot.slane %v2053_v20, 1  ;;  %v2064_v14 = vadd.f32 %v2063_v63, %v2062_v32  ;;  %v2289_v63 = vld [vmem:[#allocation5 + $0x63] sm:$0xff] }
 0x81d   :  { %v2055_v52 = vadd.f32 %v2054_v61, %v2053_v20  ;;  %v2065_v38 = vrot.slane %v2064_v14, 1  ;;  %v2290_v61 = vld [vmem:[#allocation5 + $0x6b] sm:$0xf] }
 0x81f   :  { %v2066_v39 = vadd.f32 %v2065_v38, %v2064_v14  ;;  %v2067_v23 = vmul.f32 0.0625, %v2055_v52  ;;  %v4015_v14 = vpack.c.bf16 %v2290_v61, %v2289_v63 }
 0x821   :  { %v2068_v33 = vmul.f32 0.0625, %v2066_v39  ;;  %v2069_v28 = vmul.f32 %v2067_v23, %v2067_v23  ;;  %4017 = vmatpush3.bf16.msk.msra.mxu1 %vm4713_vm8, %v4015_v14 }
 0x823   :  { %v2070_v45 = vsub.f32 %v2068_v33, %v2069_v28 }
 0x825   :  { %v2071_v55 = vadd.f32 1e-05, %v2070_v45 }
 0x827   :  { %4121 = vrsqrt.f32 %v2071_v55 }
 0x831   :  { %v4122_v1 = vpop.eup %4121 }
 0x832   :  { %v2073_v2 = vmul.f32 %v4122_v1, %v2045_v7 }
 0x834   :  { %v2074_v51 = vmul.f32 %v2073_v2, %v2067_v23  ;;  %v2079_v56 = vrot.slane %v2073_v2, %v4262_v21  ;;  %v3770_v23 = vld [vmem:[#allocation5 + $0x60] ss:$0 sm:$0xff] }
 0x836   :  { %v2075_v59 = vsub.f32 %v2046_v25, %v2074_v51  ;;  %v2080_v5 = vmul.f32 %v2079_v56, %v2026_v11  ;;  %v2081_v8 = vmul.f32 %v2079_v56, %v2043_v10 }
 0x838   :  { %v2085_v3 = vrot.slane %v2075_v59, %v4262_v21 }
 0x83a   :  { %v2087_v42 = vadd.f32 %v2085_v3, %v2081_v8  ;;  %v2086_v49 = vadd.f32 %v2085_v3, %v2080_v5 }
 0x83c   :  { %v2089_v37 = vmax.f32 %v2087_v42, 0.0  ;;  %v2088_v43 = vmax.f32 %v2086_v49, 0.0 }
 0x83e   :  { %v2097_v6 = vrot.slane %v2089_v37, 5  ;;  %v2094_v26 = vrot.slane %v2088_v43, 7 }
 0x840   :  { %v2099_v40 = vsel %vm34_vm1, 0.0, %v2094_v26  ;;  %v2100_v44 = vsel %vm34_vm1, %v2094_v26, 0.0  ;;  %v2102_v24 = vsel %vm42_vm0, %v2097_v6, 0.0 }
 0x841   :  { %v2101_v29 = vsel %vm42_vm0, %v2100_v44, %v2097_v6  ;;  %v2120_v13 = vrot.slane %v2099_v40, 2  ;;  %v2106_v22 = vrot.slane %v2099_v40, 1  ;;  %v2123_v62 = vrot.slane %v2102_v24, 2 }
 0x842   :  { %v2121_v11 = vrot.slane %v2101_v29, 2  ;;  %v2107_v31 = vrot.slane %v2101_v29, 1  ;;  %v2109_v34 = vrot.slane %v2102_v24, 1 }
 0x844   :  { %v2122_v27 = vsel %vm132_vm3, %v2120_v13, %v2121_v11  ;;  %v2108_v60 = vsel %vm98_vm2, %v2106_v22, %v2107_v31  ;;  %v2124_v10 = vsel %vm132_vm3, %v2121_v11, %v2123_v62  ;;  %v2110_v41 = vsel %vm98_vm2, %v2107_v31, %v2109_v34 }
 0x845   :  { %2125 = vrot.lane.b32.xlu1 %v2122_v27, %s4191_s20  ;;  %2111 = vrot.lane.b32.xlu0 %v2108_v60, %s4198_s0 }
 0x849   :  { %2127 = vrot.lane.b32.xlu1 %v2124_v10, %s4191_s20  ;;  %2113 = vrot.lane.b32.xlu0 %v2110_v41, %s4198_s0  ;;  %v2242_v41 = vld [vmem:[#allocation5 + $0x61] sm:$0x1] }
 0x84d   :  { %2129 = vrot.lane.b32.xlu1 %v2123_v62, %s4191_s20  ;;  %2115 = vrot.lane.b32.xlu0 %v2109_v34, %s4198_s0 }
 0x8b7   :  { %v2126_v46 = vpop.permute.xlu1 %2125  ;;  %v2112_v53 = vpop.permute.xlu0 %2111 }
 0x8b8   :  { %v2134_v57 = vsel %vm1625_vm5, %v2099_v40, %v2112_v53 }
 0x8b9   :  { %v2137_v50 = vsel %vm1716_vm10, %v2134_v57, %v2126_v46  ;;  %v2243_v57 = vld [vmem:[#allocation5 + $0x62] sm:$0x1] }
 0x8ba   :  { %3894 = vmatmul.mubr.msk.f32.vlgmr.msra.gmra.mrb[6].mxu0 %vm1724_vm11, %v2137_v50 }
 0x8bb   :  { %v2128_v35 = vpop.permute.xlu1 %2127  ;;  %v2114_v30 = vpop.permute.xlu0 %2113  ;;  %3896 = vmatprep.mubr.msk.f32.mxu0 %vm4196_vm9, %v4197_v36 }
 0x8bc   :  { %v2135_v17 = vsel %vm1625_vm5, %v2101_v29, %v2114_v30 }
 0x8bd   :  { %v2138_v15 = vsel %vm1716_vm10, %v2135_v17, %v2128_v35 }
 0x8be   :  { %3897 = vmatmul.mubr.msk.f32.gmra.mrb[8].mxu0 %vm1724_vm11, %v2138_v15 }
 0x8bf   :  { %v2130_v48 = vpop.permute.xlu1 %2129  ;;  %v2116_v47 = vpop.permute.xlu0 %2115  ;;  %3899 = vmatprep.mubr.msk.f32.mxu0 %vm4196_vm9, %v4197_v36 }
 0x8c0   :  { %v2136_v32 = vsel %vm1625_vm5, %v2102_v24, %v2116_v47 }
 0x8c1   :  { %v2139_v20 = vsel %vm1716_vm10, %v2136_v32, %v2130_v48 }
 0x8c2   :  { %3900 = vmatmul.mubr.msk.f32.gmra.mrb[10].mxu0 %vm1724_vm11, %v2139_v20 }
 0x98d   :  { %v2222_v52 = vpop.f32.mrb[6].mxu0 }
 0x98e   :  { %v3895_v38 = vpop.f32.mrb[7].mxu0  ;;  %v2223_v45 = vadd.f32 %v3770_v23, %v2222_v52 }
 0x990   :  { %v2253_v51 = vmul.f32 %v2223_v45, %v2223_v45  ;;  %v2244_v59 = vsel %vm1625_vm5, %v2223_v45, 0.0 }
 0x991   :  { %v2227_v39 = vpop.f32.mrb[8].mxu0 }
 0x992   :  { %v3898_v33 = vpop.f32.mrb[9].mxu0  ;;  %v2228_v28 = vadd.f32 %v3770_v23, %v2227_v39  ;;  %v2255_v3 = vsel %vm1625_vm5, %v2253_v51, 0.0 }
 0x994   :  { %v2238_v2 = vrot.slane %v2228_v28, 2 }
 0x995   :  { %v2232_v55 = vpop.f32.mrb[10].mxu0 }
 0x996   :  { %v2233_v7 = vadd.f32 %v3770_v23, %v2232_v55  ;;  %v3901_v1 = vpop.f32.mrb[11].mxu0 }
 0x998   :  { %v2239_v25 = vrot.slane %v2233_v7, 2 }
 0x99a   :  { %v2240_v56 = vsel %vm132_vm3, %v2238_v2, %v2239_v25 }
 0x99b   :  { %v2245_v16 = vsel %vm1625_vm5, %v2240_v56, 0.0  ;;  %v2254_v5 = vmul.f32 %v2240_v56, %v2240_v56 }
 0x99c   :  { %v2246_v8 = vadd.f32 %v2245_v16, %v2244_v59 }
 0x99d   :  { %v2256_v42 = vsel %vm1625_vm5, %v2254_v5, 0.0 }
 0x99e   :  { %v2247_v49 = vrot.slane %v2246_v8, 4  ;;  %v2257_v37 = vadd.f32 %v2256_v42, %v2255_v3 }
 0x9a0   :  { %v2248_v43 = vadd.f32 %v2247_v49, %v2246_v8  ;;  %v2258_v6 = vrot.slane %v2257_v37, 4 }
 0x9a2   :  { %v2249_v26 = vrot.slane %v2248_v43, 2  ;;  %v2259_v40 = vadd.f32 %v2258_v6, %v2257_v37 }
 0x9a4   :  { %v2250_v44 = vadd.f32 %v2249_v26, %v2248_v43  ;;  %v2260_v29 = vrot.slane %v2259_v40, 2 }
 0x9a6   :  { %v2251_v13 = vrot.slane %v2250_v44, 1  ;;  %v2261_v22 = vadd.f32 %v2260_v29, %v2259_v40 }
 0x9a8   :  { %v2252_v24 = vadd.f32 %v2251_v13, %v2250_v44  ;;  %v2262_v11 = vrot.slane %v2261_v22, 1 }
 0x9aa   :  { %v2263_v31 = vadd.f32 %v2262_v11, %v2261_v22  ;;  %v2264_v27 = vmul.f32 0.0625, %v2252_v24  ;;  %v2393_v24 = vld [vmem:[#allocation5 + $0x70] sm:$0x1] }
 0x9ac   :  { %v2265_v60 = vmul.f32 0.0625, %v2263_v31  ;;  %v2266_v62 = vmul.f32 %v2264_v27, %v2264_v27 }
 0x9ae   :  { %v2267_v34 = vsub.f32 %v2265_v60, %v2266_v62 }
 0x9b0   :  { %v2268_v10 = vadd.f32 1e-05, %v2267_v34 }
 0x9b2   :  { %4123 = vrsqrt.f32 %v2268_v10  ;;  %v2430_v10 = vld [vmem:[#allocation5 + $0x72] sm:$0xff] }
 0x9bc   :  { %v4124_v46 = vpop.eup %4123 }
 0x9bd   :  { %v2270_v53 = vmul.f32 %v4124_v46, %v2242_v41  ;;  %v2431_v41 = vld [vmem:[#allocation5 + $0x7a] sm:$0xff] }
 0x9be   :  { %v4018_v46 = vpack.c.bf16 %v2431_v41, %v2430_v10 }
 0x9bf   :  { %v2271_v50 = vmul.f32 %v2270_v53, %v2264_v27  ;;  %v2276_v35 = vrot.slane %v2270_v53, %v4262_v21  ;;  %v2394_v27 = vld [vmem:[#allocation5 + $0x71] sm:$0x1] }
 0x9c0   :  { %4019 = vmatprep.subr.bf16.mxu1 %v4018_v46 }
 0x9c1   :  { %v2272_v30 = vsub.f32 %v2243_v57, %v2271_v50  ;;  %v2277_v17 = vmul.f32 %v2276_v35, %v2223_v45  ;;  %v2278_v15 = vmul.f32 %v2276_v35, %v2240_v56  ;;  %v3775_v45 = vld [vmem:[#allocation5 + $0x6f] ss:$0 sm:$0xff]  ;;  %v2432_v35 = vld [vmem:[#allocation5 + $0x82] sm:$0xff] }
 0x9c3   :  { %v2282_v48 = vrot.slane %v2272_v30, %v4262_v21 }
 0x9c5   :  { %v2283_v47 = vadd.f32 %v2282_v48, %v2277_v17  ;;  %v2284_v32 = vadd.f32 %v2282_v48, %v2278_v15 }
 0x9c7   :  { %v2285_v20 = vadd.f32 %v2283_v47, %v1891_v0  ;;  %v2286_v63 = vadd.f32 %v2284_v32, %v1892_v12 }
 0x9c9   :  { %v2287_v61 = vmax.f32 %v2285_v20, 0.0  ;;  %v2288_v14 = vmax.f32 %v2286_v63, 0.0 }
 0x9cb   :  { %2292 = vst.msk [vmem:[#allocation3] sm:$0xff] %vm1625_vm5, %v2287_v61  ;;  %2293 = vst.msk [vmem:[#allocation3 + $0x8] sm:$0xff] %vm1625_vm5, %v2288_v14 }
 0x9d2   :  { %v2296_v52 = vld [vmem:[#allocation3 + $0x1] ss:$2 sm:$0xff]  ;;  %v4856_v38 = vld [vmem:[#allocation3] ss:$2 sm:$0xff] }
 0x9d3   :  { %2308 = vrot.lane.b32.xlu1 %v2296_v52, %s4191_s20  ;;  %2305 = vrot.lane.b32.xlu0 %v4856_v38, %s4198_s0  ;;  %v2298_v39 = vrot.slane %v2296_v52, 7 }
 0x9d5   :  { %v2300_v4 = vsel %vm34_vm1, 0.0, %v2298_v39 }
 0x9d6   :  { %v2301_v54 = vsel %vm1734_vm6, %v2300_v4, 0.0 }
 0x9d7   :  { %v2303_v0 = vsel %vm2302_vm12, %v2301_v54, %v2298_v39  ;;  %v4200_v54 = vmov 2  }
 0xa45   :  { %v2309_v12 = vpop.permute.xlu1 %2308  ;;  %v2306_v23 = vpop.permute.xlu0 %2305 }
 0xa46   :  { %v2311_v33 = vsel %vm1625_vm5, %v2303_v0, %v2306_v23  ;;  %vm3149_vm5 = vcmask 392192  }
 0xa47   :  { %v2312_v28 = vsel %vm1716_vm10, %v2311_v33, %v2309_v12  ;;  %v4201_v12 = vmov 3  }
 0xa48   :  { %3907 = vmatmul.mubr.msk.f32.vlgmr.msra.gmra.mrb[6].mxu1 %vm1724_vm11, %v2312_v28 }
 0xa49   :  { %4021 = vmatpush3.bf16.msra.mxu1 %v4018_v46 }
 0xa4a   :  { %3913 = vmatprep.subr.mxu1 %v2432_v35 }
 0xa4d   :  { %3914 = vmatpush3.msra.mxu1 %v2432_v35 }
 0xb1b   :  { %v2389_v55 = vpop.f32.mrb[6].mxu1 }
 0xb1c   :  { %v2390_v7 = vadd.f32 %v3775_v45, %v2389_v55  ;;  %v3908_v1 = vpop.f32.mrb[7].mxu1 }
 0xb1e   :  { %v2395_v2 = vsel %vm1716_vm10, %v2390_v7, 0.0  ;;  %v2402_v25 = vmul.f32 %v2390_v7, %v2390_v7 }
 0xb1f   :  { %v2396_v51 = vrot.slane %v2395_v2, 4 }
 0xb20   :  { %v2403_v56 = vsel %vm1716_vm10, %v2402_v25, 0.0 }
 0xb21   :  { %v2397_v59 = vadd.f32 %v2396_v51, %v2395_v2  ;;  %v2404_v16 = vrot.slane %v2403_v56, 4  ;;  %v2645_v2 = vld [vmem:[#allocation5 + $0x92] sm:$0xff]  ;;  %v3778_v51 = vld [vmem:[#allocation5 + $0x8a] ss:$0 sm:$0xff] }
 0xb23   :  { %v2398_v5 = vrot.slane %v2397_v59, 2  ;;  %v2405_v8 = vadd.f32 %v2404_v16, %v2403_v56 }
 0xb25   :  { %v2399_v3 = vadd.f32 %v2398_v5, %v2397_v59  ;;  %v2406_v42 = vrot.slane %v2405_v8, 2 }
 0xb27   :  { %v2400_v49 = vrot.slane %v2399_v3, 1  ;;  %v2407_v37 = vadd.f32 %v2406_v42, %v2405_v8 }
 0xb29   :  { %v2401_v43 = vadd.f32 %v2400_v49, %v2399_v3  ;;  %v2408_v6 = vrot.slane %v2407_v37, 1 }
 0xb2b   :  { %v2409_v26 = vadd.f32 %v2408_v6, %v2407_v37  ;;  %v2410_v40 = vmul.f32 0.125, %v2401_v43 }
 0xb2d   :  { %v2411_v44 = vmul.f32 0.125, %v2409_v26  ;;  %v2412_v29 = vmul.f32 %v2410_v40, %v2410_v40 }
 0xb2f   :  { %v2413_v13 = vsub.f32 %v2411_v44, %v2412_v29 }
 0xb31   :  { %v2414_v22 = vadd.f32 1e-05, %v2413_v13 }
 0xb33   :  { %4125 = vrsqrt.f32 %v2414_v22 }
 0xb3d   :  { %v4126_v11 = vpop.eup %4125 }
 0xb3e   :  { %v2416_v31 = vmul.f32 %v4126_v11, %v2393_v24 }
 0xb40   :  { %v2417_v60 = vmul.f32 %v2416_v31, %v2410_v40  ;;  %v2422_v62 = vrot.slane %v2416_v31, %v4262_v21 }
 0xb42   :  { %v2418_v34 = vsub.f32 %v2394_v27, %v2417_v60  ;;  %v2423_v53 = vmul.f32 %v2422_v62, %v2390_v7 }
 0xb44   :  { %v2427_v57 = vrot.slane %v2418_v34, %v4262_v21 }
 0xb46   :  { %v2428_v50 = vadd.f32 %v2427_v57, %v2423_v53  ;;  %v2597_v53 = vld [vmem:[#allocation5 + $0x8d] sm:$0xf] }
 0xb47   :  { %v2606_v35 = vrot.slane %v2597_v53, %v4262_v21 }
 0xb48   :  { %v2429_v30 = vmax.f32 %v2428_v50, 0.0 }
 0xb4a   :  { %v2435_v17 = vrot.slane %v2429_v30, 7  ;;  %v2437_v15 = vrot.slane %v2429_v30, 5 }
 0xb4c   :  { %v2442_v48 = vsel %vm42_vm0, %v2437_v15, 0.0  ;;  %v2439_v47 = vsel %vm34_vm1, 0.0, %v2435_v17  ;;  %v2615_v17 = vrot.slane %v2597_v53, %v4256_v18 }
 0xb4d   :  { %v2446_v32 = vrot.slane %v2442_v48, 1  ;;  %v2440_v20 = vsel %vm2302_vm12, %v2439_v47, 0.0  ;;  %v2455_v52 = vrot.slane %v2442_v48, 2 }
 0xb4e   :  { %v2441_v63 = vsel %vm98_vm2, %v2440_v20, %v2437_v15 }
 0xb4f   :  { %2450 = vrot.lane.b32.xlu1 %v2446_v32, %s4191_s20  ;;  %v2445_v61 = vrot.slane %v2441_v63, 1  ;;  %v2454_v39 = vrot.slane %v2441_v63, 2 }
 0xb51   :  { %v2447_v14 = vsel %vm98_vm2, %v2445_v61, %v2446_v32  ;;  %v2456_v4 = vsel %vm132_vm3, %v2454_v39, %v2455_v52  ;;  %v2635_v61 = vrot.slane %v2597_v53, %v4327_v9 }
 0xb52   :  { %2448 = vrot.lane.b32.xlu0 %v2447_v14, %s4191_s20 }
 0xb53   :  { %2459 = vrot.lane.b32.xlu1 %v2455_v52, %s4199_s30  ;;  %v2561_v52 = vld [vmem:[#allocation5 + $0x8b] sm:$0x1] }
 0xb56   :  { %2457 = vrot.lane.b32.xlu0 %v2456_v4, %s4199_s30 }
 0xb57   :  { %2609 = vperm.xlu1 %4103, %v4856_v38  }
 0xb5a   :  { %2600 = vperm.xlu0 %4104, %v4856_v38  }
 0xb5b   :  { %4105 = vset.pattern.permute.xlu1 %v4200_v54 }
 0xb5c   :  { %2619 = vperm.xlu1 %4105, %v4856_v38  }
 0xb5e   :  { %4106 = vset.pattern.permute.xlu0 %v4201_v12 }
 0xb5f   :  { %2629 = vperm.xlu0 %4106, %v4856_v38   ;;  %v2646_v38 = vld [vmem:[#allocation5 + $0x9a] sm:$0xff] }
 0xb60   :  { %v4022_v25 = vpack.c.bf16 %v2646_v38, %v2645_v2 }
 0xb62   :  { %4023 = vmatprep.subr.bf16.mxu0 %v4022_v25 }
 0xb63   :  { %4025 = vmatpush3.bf16.msra.mxu0 %v4022_v25 }
 0xbc1   :  { %v2451_v0 = vpop.permute.xlu1 %2450 }
 0xbc2   :  { %v2464_v55 = vsel %vm1716_vm10, %v2442_v48, %v2451_v0  ;;  %v2625_v48 = vrot.slane %v2597_v53, %v4259_v19  ;;  %v2562_v0 = vld [vmem:[#allocation5 + $0x8c] sm:$0x1] }
 0xbc4   :  { %v2449_v23 = vpop.permute.xlu0 %2448 }
 0xbc5   :  { %v2460_v33 = vpop.permute.xlu1 %2459  ;;  %v2463_v28 = vsel %vm1716_vm10, %v2441_v63, %v2449_v23 }
 0xbc6   :  { %v2467_v1 = vsel %vm2465_vm13, %v2464_v55, %v2460_v33 }
 0xbc8   :  { %v2458_v45 = vpop.permute.xlu0 %2457 }
 0xbc9   :  { %v2466_v7 = vsel %vm2465_vm13, %v2463_v28, %v2458_v45  ;;  %v3781_v45 = vld [vmem:[#allocation5 + $0x91] ss:$0 sm:$0xff] }
 0xbca   :  { %3915 = vmatprep.mubr.msk.f32.mxu1 %vm2472_vm14, %v2466_v7  ;;  %v2647_v7 = vld [vmem:[#allocation5 + $0xa2] sm:$0xff] }
 0xbcb   :  { %3916 = vmatmul.mubr.msk.f32.vlgmr.msra.gmra.mrb[8].mxu1 %vm2472_vm14, %v2467_v1  ;;  %3922 = vmatprep.subr.mxu0 %v2647_v7 }
 0xbcc   :  { %3923 = vmatpush3.msra.mxu0 %v2647_v7  ;;  %v2811_v7 = vld [vmem:[#allocation5 + $0xad] sm:$0xff] }
 0xbcd   :  { %4030 = vmatprep.subr.bf16.mxu0 %v4194_v58 }
 0xbd6   :  { %v2610_v57 = vpop.permute.xlu1 %2609 }
 0xbd7   :  { %v2616_v32 = vmul.f32 %v2615_v17, %v2610_v57 }
 0xbd9   :  { %v2601_v30 = vpop.permute.xlu0 %2600 }
 0xbda   :  { %v2607_v15 = vmul.f32 %v2606_v35, %v2601_v30 }
 0xbdb   :  { %v2620_v47 = vpop.permute.xlu1 %2619 }
 0xbdc   :  { %v2617_v20 = vadd.f32 %v2616_v32, %v2607_v15  ;;  %v2626_v63 = vmul.f32 %v2625_v48, %v2620_v47 }
 0xbde   :  { %v2630_v14 = vpop.permute.xlu0 %2629  ;;  %v2627_v4 = vadd.f32 %v2626_v63, %v2617_v20 }
 0xbdf   :  { %v2636_v54 = vmul.f32 %v2635_v61, %v2630_v14 }
 0xbe1   :  { %v2637_v18 = vadd.f32 %v2636_v54, %v2627_v4 }
 0xbe3   :  { %v2642_v1 = vadd.f32 %v3781_v45, %v2637_v18 }
 0xc9e   :  { %v3917_v56 = vpop.f32.mrb[8].mxu1 }
 0xc9f   :  { %v2551_v59 = vadd.f32 %v3917_v56, %v3778_v51  ;;  %v2545_v16 = vpop.f32.mrb[9].mxu1 }
 0xca0   :  { %v2546_v5 = vadd.f32 %v3778_v51, %v2545_v16 }
 0xca1   :  { %v2557_v8 = vrot.slane %v2551_v59, 2 }
 0xca2   :  { %v2556_v3 = vrot.slane %v2546_v5, 2 }
 0xca4   :  { %v2558_v42 = vsel %vm132_vm3, %v2556_v3, %v2557_v8 }
 0xca5   :  { %v2560_v49 = vsel %vm1734_vm6, %v2546_v5, %v2558_v42 }
 0xca6   :  { %v2563_v37 = vsel %vm1716_vm10, %v2560_v49, 0.0  ;;  %v2570_v43 = vmul.f32 %v2560_v49, %v2560_v49 }
 0xca7   :  { %v2564_v6 = vrot.slane %v2563_v37, 4 }
 0xca8   :  { %v2571_v26 = vsel %vm1716_vm10, %v2570_v43, 0.0 }
 0xca9   :  { %v2565_v40 = vadd.f32 %v2564_v6, %v2563_v37  ;;  %v2572_v44 = vrot.slane %v2571_v26, 4 }
 0xcab   :  { %v2566_v29 = vrot.slane %v2565_v40, 2  ;;  %v2573_v13 = vadd.f32 %v2572_v44, %v2571_v26 }
 0xcad   :  { %v2567_v22 = vadd.f32 %v2566_v29, %v2565_v40  ;;  %v2574_v24 = vrot.slane %v2573_v13, 2 }
 0xcaf   :  { %v2568_v11 = vrot.slane %v2567_v22, 1  ;;  %v2575_v31 = vadd.f32 %v2574_v24, %v2573_v13 }
 0xcb1   :  { %v2569_v27 = vadd.f32 %v2568_v11, %v2567_v22  ;;  %v2576_v60 = vrot.slane %v2575_v31, 1  ;;  %v3782_v11 = vld [vmem:[#allocation5 + $0xaa] ss:$0 sm:$0xff] }
 0xcb3   :  { %v2577_v62 = vadd.f32 %v2576_v60, %v2575_v31  ;;  %v2578_v34 = vmul.f32 0.125, %v2569_v27 }
 0xcb5   :  { %v2579_v10 = vmul.f32 0.125, %v2577_v62  ;;  %v2580_v41 = vmul.f32 %v2578_v34, %v2578_v34 }
 0xcb7   :  { %v2581_v46 = vsub.f32 %v2579_v10, %v2580_v41 }
 0xcb9   :  { %v2582_v50 = vadd.f32 1e-05, %v2581_v46 }
 0xcbb   :  { %4127 = vrsqrt.f32 %v2582_v50 }
 0xcc5   :  { %v4128_v39 = vpop.eup %4127 }
 0xcc6   :  { %v2584_v12 = vmul.f32 %v4128_v39, %v2561_v52 }
 0xcc8   :  { %v2585_v23 = vmul.f32 %v2584_v12, %v2578_v34  ;;  %v2590_v33 = vrot.slane %v2584_v12, %v4262_v21 }
 0xcca   :  { %v2586_v28 = vsub.f32 %v2562_v0, %v2585_v23  ;;  %v2591_v19 = vmul.f32 %v2590_v33, %v2560_v49  ;;  %v2774_v23 = vld [vmem:[#allocation5 + $0xab] sm:$0x1] }
 0xccc   :  { %v2595_v55 = vrot.slane %v2586_v28, %v4262_v21  ;;  %v2775_v28 = vld [vmem:[#allocation5 + $0xac] sm:$0x1] }
 0xcce   :  { %v2596_v9 = vadd.f32 %v2595_v55, %v2591_v19 }
 0xcd0   :  { %v2643_v2 = vadd.f32 %v2642_v1, %v2596_v9  ;;  %v2812_v1 = vld [vmem:[#allocation5 + $0xb5] sm:$0xff] }
 0xcd1   :  { %v4026_v9 = vpack.c.bf16 %v2812_v1, %v2811_v7  ;;  %v2940_v7 = vld [vmem:[#allocation5 + $0xc6] sm:$0x1] }
 0xcd2   :  { %v4902_v38 = vmax.f32 %v2643_v2, 0.0 }
 0xcd3   :  { %4027 = vmatprep.subr.bf16.mxu1 %v4026_v9 }
 0xcd4   :  { %v2652_v25 = vrot.slane %v4902_v38, 5  ;;  %v2650_v51 = vrot.slane %v4902_v38, 7  ;;  %4029 = vmatpush3.bf16.msra.mxu1 %v4026_v9 }
 0xcd6   :  { %v2657_v56 = vsel %vm42_vm0, %v2652_v25, 0.0  ;;  %v2654_v59 = vsel %vm34_vm1, 0.0, %v2650_v51 }
 0xcd7   :  { %v2661_v16 = vrot.slane %v2657_v56, 1  ;;  %v2655_v5 = vsel %vm2302_vm12, %v2654_v59, 0.0  ;;  %v2670_v3 = vrot.slane %v2657_v56, 2 }
 0xcd8   :  { %v2656_v8 = vsel %vm98_vm2, %v2655_v5, %v2652_v25 }
 0xcd9   :  { %2665 = vrot.lane.b32.xlu1 %v2661_v16, %s4191_s20  ;;  %v2669_v42 = vrot.slane %v2656_v8, 2  ;;  %v2660_v49 = vrot.slane %v2656_v8, 1 }
 0xcdb   :  { %v2671_v37 = vsel %vm132_vm3, %v2669_v42, %v2670_v3  ;;  %v2662_v43 = vsel %vm98_vm2, %v2660_v49, %v2661_v16 }
 0xcdc   :  { %2672 = vrot.lane.b32.xlu0 %v2671_v37, %s4199_s30 }
 0xcdd   :  { %2663 = vrot.lane.b32.xlu1 %v2662_v43, %s4191_s20 }
 0xce1   :  { %2674 = vrot.lane.b32.xlu1 %v2670_v3, %s4199_s30 }
 0xd4b   :  { %v2666_v6 = vpop.permute.xlu1 %2665 }
 0xd4c   :  { %v2679_v13 = vsel %vm1716_vm10, %v2657_v56, %v2666_v6  ;;  %v2813_v56 = vld [vmem:[#allocation5 + $0xbd] sm:$0xff] }
 0xd4d   :  { %3931 = vmatprep.subr.mxu1 %v2813_v56 }
 0xd4e   :  { %v2673_v40 = vpop.permute.xlu0 %2672  ;;  %3932 = vmatpush3.msra.mxu1 %v2813_v56 }
 0xd4f   :  { %v2664_v26 = vpop.permute.xlu1 %2663  ;;  %4033 = vmatprep.subr.bf16.mxu1 %v4194_v58 }
 0xd50   :  { %v2678_v44 = vsel %vm1716_vm10, %v2656_v8, %v2664_v26 }
 0xd51   :  { %v2680_v29 = vsel %vm2465_vm13, %v2678_v44, %v2673_v40 }
 0xd52   :  { %3924 = vmatprep.mubr.msk.f32.mxu0 %vm2472_vm14, %v2680_v29 }
 0xd53   :  { %v2675_v22 = vpop.permute.xlu1 %2674 }
 0xd54   :  { %v2681_v24 = vsel %vm2465_vm13, %v2679_v13, %v2675_v22 }
 0xd55   :  { %3925 = vmatmul.mubr.msk.f32.vlgmr.msra.gmra.mrb[12].mxu0 %vm2472_vm14, %v2681_v24 }
 0xd56   :  { %3942 = vmatprep.mubr.msk.f32.mxu0 %vm4196_vm9, %v4197_v36 }
 0xe28   :  { %v3926_v31 = vpop.f32.mrb[12].mxu0 }
 0xe29   :  { %v2764_v27 = vadd.f32 %v3926_v31, %v3782_v11  ;;  %v2758_v60 = vpop.f32.mrb[13].mxu0 }
 0xe2a   :  { %v2759_v62 = vadd.f32 %v3782_v11, %v2758_v60 }
 0xe2b   :  { %v2770_v34 = vrot.slane %v2764_v27, 2 }
 0xe2c   :  { %v2769_v10 = vrot.slane %v2759_v62, 2 }
 0xe2e   :  { %v2771_v41 = vsel %vm132_vm3, %v2769_v10, %v2770_v34  ;;  %v2979_v34 = vld [vmem:[#allocation5 + $0xd0] sm:$0xff] }
 0xe2f   :  { %v2773_v46 = vsel %vm1734_vm6, %v2759_v62, %v2771_v41  ;;  %v2978_v62 = vld [vmem:[#allocation5 + $0xc8] sm:$0xff]  ;;  %v3785_v41 = vld [vmem:[#allocation5 + $0xc5] ss:$0 sm:$0xff] }
 0xe30   :  { %v2776_v53 = vsel %vm1716_vm10, %v2773_v46, 0.0  ;;  %v2783_v57 = vmul.f32 %v2773_v46, %v2773_v46  ;;  %v4031_v10 = vpack.c.bf16 %v2979_v34, %v2978_v62  ;;  %v3121_v34 = vld [vmem:[#allocation5 + $0x103] sm:$0xff] }
 0xe31   :  { %v2777_v50 = vrot.slane %v2776_v53, 4 }
 0xe32   :  { %v2784_v35 = vsel %vm1716_vm10, %v2783_v57, 0.0  ;;  %4032 = vmatpush3.bf16.msra.mxu0 %v4031_v10  ;;  %v3122_v10 = vld [vmem:[#allocation5 + $0x10b] sm:$0xff] }
 0xe33   :  { %v2778_v30 = vadd.f32 %v2777_v50, %v2776_v53  ;;  %v2785_v17 = vrot.slane %v2784_v35, 4  ;;  %3940 = vmatprep.subr.mxu0 %v4197_v36 }
 0xe35   :  { %v2779_v15 = vrot.slane %v2778_v30, 2  ;;  %v2786_v48 = vadd.f32 %v2785_v17, %v2784_v35 }
 0xe37   :  { %v2780_v47 = vadd.f32 %v2779_v15, %v2778_v30  ;;  %v2787_v32 = vrot.slane %v2786_v48, 2 }
 0xe39   :  { %v2781_v20 = vrot.slane %v2780_v47, 1  ;;  %v2788_v63 = vadd.f32 %v2787_v32, %v2786_v48 }
 0xe3b   :  { %v2782_v61 = vadd.f32 %v2781_v20, %v2780_v47  ;;  %v2789_v14 = vrot.slane %v2788_v63, 1 }
 0xe3d   :  { %v2790_v52 = vadd.f32 %v2789_v14, %v2788_v63  ;;  %v2791_v39 = vmul.f32 0.125, %v2782_v61 }
 0xe3f   :  { %v2792_v4 = vmul.f32 0.125, %v2790_v52  ;;  %v2793_v54 = vmul.f32 %v2791_v39, %v2791_v39 }
 0xe41   :  { %v2794_v12 = vsub.f32 %v2792_v4, %v2793_v54 }
 0xe43   :  { %v2795_v0 = vadd.f32 1e-05, %v2794_v12 }
 0xe45   :  { %4129 = vrsqrt.f32 %v2795_v0 }
 0xe4f   :  { %v4130_v33 = vpop.eup %4129 }
 0xe50   :  { %v2797_v18 = vmul.f32 %v4130_v33, %v2774_v23 }
 0xe52   :  { %v2798_v45 = vmul.f32 %v2797_v18, %v2791_v39  ;;  %v2803_v19 = vrot.slane %v2797_v18, %v4262_v21 }
 0xe54   :  { %v2799_v55 = vsub.f32 %v2775_v28, %v2798_v45  ;;  %v2804_v2 = vmul.f32 %v2803_v19, %v2773_v46 }
 0xe56   :  { %v2808_v25 = vrot.slane %v2799_v55, %v4262_v21 }
 0xe58   :  { %v2809_v51 = vadd.f32 %v2808_v25, %v2804_v2  ;;  %v2941_v2 = vld [vmem:[#allocation5 + $0xc7] sm:$0x1] }
 0xe5a   :  { %v2810_v59 = vmax.f32 %v2809_v51, 0.0 }
 0xe5c   :  { %v2816_v16 = vrot.slane %v2810_v59, 7  ;;  %v2818_v5 = vrot.slane %v2810_v59, 5 }
 0xe5e   :  { %v2823_v8 = vsel %vm42_vm0, %v2818_v5, 0.0  ;;  %v2820_v3 = vsel %vm34_vm1, 0.0, %v2816_v16 }
 0xe5f   :  { %v2827_v42 = vrot.slane %v2823_v8, 1  ;;  %v2821_v49 = vsel %vm2302_vm12, %v2820_v3, 0.0  ;;  %v2836_v26 = vrot.slane %v2823_v8, 2  ;;  %v2980_v3 = vld [vmem:[#allocation5 + $0xd8] sm:$0xff] }
 0xe60   :  { %v2822_v37 = vsel %vm98_vm2, %v2821_v49, %v2818_v5  ;;  %3941 = vmatpush3.msra.mxu0 %v2980_v3 }
 0xe61   :  { %2831 = vrot.lane.b32.xlu1 %v2827_v42, %s4191_s20  ;;  %v2826_v43 = vrot.slane %v2822_v37, 1  ;;  %v2835_v40 = vrot.slane %v2822_v37, 2  ;;  %3960 = vmatprep.subr.mxu0 %v4197_v36 }
 0xe63   :  { %v2828_v6 = vsel %vm98_vm2, %v2826_v43, %v2827_v42  ;;  %v2837_v44 = vsel %vm132_vm3, %v2835_v40, %v2836_v26 }
 0xe64   :  { %2829 = vrot.lane.b32.xlu0 %v2828_v6, %s4191_s20 }
 0xe65   :  { %2840 = vrot.lane.b32.xlu1 %v2836_v26, %s4199_s30 }
 0xe68   :  { %2838 = vrot.lane.b32.xlu0 %v2837_v44, %s4199_s30 }
 0xed3   :  { %v2832_v29 = vpop.permute.xlu1 %2831 }
 0xed4   :  { %v2845_v31 = vsel %vm1716_vm10, %v2823_v8, %v2832_v29 }
 0xed6   :  { %v2830_v13 = vpop.permute.xlu0 %2829 }
 0xed7   :  { %v2841_v22 = vpop.permute.xlu1 %2840  ;;  %v2844_v24 = vsel %vm1716_vm10, %v2822_v37, %v2830_v13  ;;  %v3263_v13 = vld [vmem:[#allocation5 + $0x116] sm:$0xff] }
 0xed8   :  { %v2847_v60 = vsel %vm2465_vm13, %v2845_v31, %v2841_v22  ;;  %v3119_v31 = vld [vmem:[#allocation5 + $0xf3] sm:$0xff] }
 0xeda   :  { %v2839_v11 = vpop.permute.xlu0 %2838 }
 0xedb   :  { %v2846_v27 = vsel %vm2465_vm13, %v2844_v24, %v2839_v11  ;;  %v3117_v24 = vld [vmem:[#allocation5 + $0xe3] sm:$0xff]  ;;  %v3118_v11 = vld [vmem:[#allocation5 + $0xeb] sm:$0xff] }
 0xedc   :  { %3933 = vmatprep.mubr.msk.f32.mxu1 %vm2472_vm14, %v2846_v27  ;;  %v4034_v27 = vpack.c.bf16 %v3118_v11, %v3117_v24  ;;  %v3346_v11 = vld [vmem:[#allocation5 + $0x137] sm:$0xff] }
 0xedd   :  { %3934 = vmatmul.mubr.msk.f32.vlgmr.msra.gmra.mrb[10].mxu1 %vm2472_vm14, %v2847_v60  ;;  %v3120_v60 = vld [vmem:[#allocation5 + $0xfb] sm:$0xff] }
 0xede   :  { %3957 = vmatprep.mubr.msk.f32.mxu1 %vm4196_vm9, %v4197_v36  ;;  %4035 = vmatpush3.bf16.msra.mxu1 %v4034_v27  ;;  %v4037_v62 = vpack.c.bf16 %v3120_v60, %v3119_v31  ;;  %v3347_v27 = vld [vmem:[#allocation5 + $0x13f] sm:$0xff]  ;;  %v3348_v60 = vld [vmem:[#allocation5 + $0x147] sm:$0xff] }
 0xedf   :  { %4036 = vmatprep.subr.bf16.mxu1 %v4194_v58 }
 0xee2   :  { %4038 = vmatpush3.bf16.msra.mxu1 %v4037_v62  ;;  %v4049_v62 = vpack.c.bf16 %v3348_v60, %v3347_v27  ;;  %v3492_v27 = vld [vmem:[#allocation5 + $0x172] sm:$0xff]  ;;  %v3493_v60 = vld [vmem:[#allocation5 + $0x17a] sm:$0xff] }
 0xee3   :  { %4039 = vmatprep.subr.bf16.mxu1 %v4194_v58 }
 0xfb0   :  { %v3935_v46 = vpop.f32.mrb[10].mxu1 }
 0xfb1   :  { %v2930_v53 = vadd.f32 %v3935_v46, %v3785_v41  ;;  %v2924_v57 = vpop.f32.mrb[11].mxu1  ;;  %v3788_v46 = vld [vmem:[#allocation5 + $0xe0] ss:$0 sm:$0xff] }
 0xfb2   :  { %v2925_v50 = vadd.f32 %v3785_v41, %v2924_v57  ;;  %v4040_v41 = vpack.c.bf16 %v3122_v10, %v3121_v34  ;;  %v3790_v34 = vld [vmem:[#allocation5 + $0x113] ss:$0 sm:$0xff] }
 0xfb3   :  { %v2936_v35 = vrot.slane %v2930_v53, 2 }
 0xfb4   :  { %v2935_v30 = vrot.slane %v2925_v50, 2  ;;  %4041 = vmatpush3.bf16.msra.mxu1 %v4040_v41 }
 0xfb5   :  { %4051 = vmatprep.subr.bf16.mxu1 %v4194_v58 }
 0xfb6   :  { %v2937_v17 = vsel %vm132_vm3, %v2935_v30, %v2936_v35  ;;  %vm3081_vm3 = vcmask 125952  }
 0xfb7   :  { %v2939_v15 = vsel %vm1734_vm6, %v2925_v50, %v2937_v17 }
 0xfb8   :  { %v2942_v48 = vsel %vm1716_vm10, %v2939_v15, 0.0  ;;  %v2949_v47 = vmul.f32 %v2939_v15, %v2939_v15 }
 0xfb9   :  { %v2943_v32 = vrot.slane %v2942_v48, 4 }
 0xfba   :  { %v2950_v20 = vsel %vm1716_vm10, %v2949_v47, 0.0 }
 0xfbb   :  { %v2944_v63 = vadd.f32 %v2943_v32, %v2942_v48  ;;  %v2951_v61 = vrot.slane %v2950_v20, 4 }
 0xfbd   :  { %v2945_v14 = vrot.slane %v2944_v63, 2  ;;  %v2952_v52 = vadd.f32 %v2951_v61, %v2950_v20 }
 0xfbf   :  { %v2946_v39 = vadd.f32 %v2945_v14, %v2944_v63  ;;  %v2953_v4 = vrot.slane %v2952_v52, 2 }
 0xfc1   :  { %v2947_v54 = vrot.slane %v2946_v39, 1  ;;  %v2954_v12 = vadd.f32 %v2953_v4, %v2952_v52 }
 0xfc3   :  { %v2948_v0 = vadd.f32 %v2947_v54, %v2946_v39  ;;  %v2955_v23 = vrot.slane %v2954_v12, 1 }
 0xfc5   :  { %v2956_v33 = vadd.f32 %v2955_v23, %v2954_v12  ;;  %v2957_v18 = vmul.f32 0.125, %v2948_v0 }
 0xfc7   :  { %v2958_v28 = vmul.f32 0.125, %v2956_v33  ;;  %v2959_v45 = vmul.f32 %v2957_v18, %v2957_v18 }
 0xfc9   :  { %v2960_v19 = vsub.f32 %v2958_v28, %v2959_v45 }
 0xfcb   :  { %v2961_v55 = vadd.f32 1e-05, %v2960_v19  ;;  %v3079_v19 = vld [vmem:[#allocation5 + $0xe1] sm:$0x1] }
 0xfcd   :  { %4131 = vrsqrt.f32 %v2961_v55 }
 0xfd7   :  { %v4132_v1 = vpop.eup %4131 }
 0xfd8   :  { %v2963_v9 = vmul.f32 %v4132_v1, %v2940_v7  ;;  %v3080_v1 = vld [vmem:[#allocation5 + $0xe2] sm:$0x1] }
 0xfda   :  { %v2964_v25 = vmul.f32 %v2963_v9, %v2957_v18  ;;  %v2969_v51 = vrot.slane %v2963_v9, %v4262_v21 }
 0xfdc   :  { %v2965_v56 = vsub.f32 %v2941_v2, %v2964_v25  ;;  %v2970_v59 = vmul.f32 %v2969_v51, %v2939_v15 }
 0xfde   :  { %v2974_v16 = vrot.slane %v2965_v56, %v4262_v21 }
 0xfe0   :  { %v2975_v5 = vadd.f32 %v2974_v16, %v2970_v59 }
 0xfe2   :  { %v2976_v8 = vadd.f32 %v2975_v5, %v4902_v38 }
 0xfe4   :  { %v2977_v42 = vmax.f32 %v2976_v8, 0.0 }
 0xfe6   :  { %2982 = vst.msk [vmem:[#allocation4] sm:$0xff] %vm1716_vm10, %v2977_v42 }
 0xfed   :  { %v2985_v49 = vld [vmem:[#allocation4 + $0x1] ss:$2 sm:$0xf]  ;;  %v2983_v37 = vld [vmem:[#allocation4] ss:$2 sm:$0xf] }
 0xfee   :  { %2997 = vrot.lane.b32.xlu1 %v2985_v49, %s4199_s30  ;;  %2994 = vrot.lane.b32.xlu0 %v2983_v37, %s4191_s20  ;;  %v2987_v43 = vrot.slane %v2985_v49, 7 }
 0xff0   :  { %v2989_v6 = vsel %vm34_vm1, 0.0, %v2987_v43 }
 0xff1   :  { %v2991_v26 = vsel %vm2990_vm15, %v2989_v6, 0.0 }
 0xff2   :  { %v2992_v40 = vsel %vm42_vm0, %v2991_v26, %v2987_v43 }
0x1060   :  { %v2998_v38 = vpop.permute.xlu1 %2997  ;;  %v2995_v44 = vpop.permute.xlu0 %2994 }
0x1061   :  { %v3000_v29 = vsel %vm1716_vm10, %v2992_v40, %v2995_v44 }
0x1062   :  { %v3001_v22 = vsel %vm2465_vm13, %v3000_v29, %v2998_v38  ;;  %v3343_v29 = vld [vmem:[#allocation5 + $0x11f] sm:$0xff] }
0x1063   :  { %3943 = vmatmul.mubr.msk.f32.vlgmr.msra.gmra.mrb[14].mxu0 %vm2472_vm14, %v3001_v22  ;;  %v3345_v22 = vld [vmem:[#allocation5 + $0x12f] sm:$0xff] }
0x1064   :  { %3961 = vmatpush3.msra.mxu0 %v3263_v13  ;;  %3962 = vmatprep.mubr.msk.f32.mxu0 %vm4196_vm9, %v4197_v36  ;;  %v3344_v13 = vld [vmem:[#allocation5 + $0x127] sm:$0xff]  ;;  %v4046_v31 = vpack.c.bf16 %v3346_v11, %v3345_v22 }
0x1065   :  { %4042 = vmatprep.subr.bf16.mxu0 %v4194_v58  ;;  %v4043_v24 = vpack.c.bf16 %v3344_v13, %v3343_v29  ;;  %v3488_v29 = vld [vmem:[#allocation5 + $0x152] sm:$0xff]  ;;  %v3489_v13 = vld [vmem:[#allocation5 + $0x15a] sm:$0xff]  ;;  %v3490_v22 = vld [vmem:[#allocation5 + $0x162] sm:$0xff] }
0x1066   :  { %v3491_v11 = vld [vmem:[#allocation5 + $0x16a] sm:$0xff] }
0x1067   :  { %3963 = vmatmul.mubr.msk.f32.vlgmr.msra.gmra.mrb[16].mxu0 %vm1716_vm10, %v2983_v37 }
0x1068   :  { %3977 = vmatprep.mubr.msk.f32.mxu0 %vm4196_vm9, %v4197_v36  ;;  %4044 = vmatpush3.bf16.msra.mxu0 %v4043_v24  ;;  %v4052_v24 = vpack.c.bf16 %v3489_v13, %v3488_v29 }
0x1069   :  { %4045 = vmatprep.subr.bf16.mxu0 %v4194_v58 }
0x106c   :  { %4047 = vmatpush3.bf16.msra.mxu0 %v4046_v31  ;;  %v4055_v31 = vpack.c.bf16 %v3491_v11, %v3490_v22 }
0x106d   :  { %4048 = vmatprep.subr.bf16.mxu0 %v4194_v58 }
0x1070   :  { %4050 = vmatpush3.bf16.msra.mxu0 %v4049_v62  ;;  %v4058_v62 = vpack.c.bf16 %v3493_v60, %v3492_v27 }
0x1071   :  { %4060 = vmatprep.subr.bf16.mxu0 %v4194_v58 }
0x1136   :  { %v3075_v53 = vpop.f32.mrb[14].mxu0 }
0x1137   :  { %v3076_v57 = vadd.f32 %v3788_v46, %v3075_v53  ;;  %v3944_v50 = vpop.f32.mrb[15].mxu0 }
0x1139   :  { %v3082_v35 = vsel %vm3081_vm3, %v3076_v57, 0.0  ;;  %v3089_v30 = vmul.f32 %v3076_v57, %v3076_v57 }
0x113a   :  { %v3083_v17 = vrot.slane %v3082_v35, 4  ;;  %v4977_v15 = vpop.f32.mrb[16].mxu0 }
0x113b   :  { %v3090_v48 = vsel %vm3081_vm3, %v3089_v30, 0.0  ;;  %v3964_v47 = vpop.f32.mrb[17].mxu0 }
0x113c   :  { %v3084_v32 = vadd.f32 %v3083_v17, %v3082_v35  ;;  %v3091_v20 = vrot.slane %v3090_v48, 4 }
0x113e   :  { %v3085_v63 = vrot.slane %v3084_v32, 2  ;;  %v3092_v61 = vadd.f32 %v3091_v20, %v3090_v48 }
0x1140   :  { %v3086_v14 = vadd.f32 %v3085_v63, %v3084_v32  ;;  %v3093_v52 = vrot.slane %v3092_v61, 2 }
0x1142   :  { %v3087_v39 = vrot.slane %v3086_v14, 1  ;;  %v3094_v4 = vadd.f32 %v3093_v52, %v3092_v61 }
0x1144   :  { %v3088_v54 = vadd.f32 %v3087_v39, %v3086_v14  ;;  %v3095_v12 = vrot.slane %v3094_v4, 1 }
0x1146   :  { %v3096_v0 = vadd.f32 %v3095_v12, %v3094_v4  ;;  %v3097_v23 = vmul.f32 0.25, %v3088_v54 }
0x1148   :  { %v3098_v33 = vmul.f32 0.25, %v3096_v0  ;;  %v3099_v18 = vmul.f32 %v3097_v23, %v3097_v23 }
0x114a   :  { %v3100_v28 = vsub.f32 %v3098_v33, %v3099_v18 }
0x114c   :  { %v3101_v45 = vadd.f32 1e-05, %v3100_v28  ;;  %v3227_v28 = vld [vmem:[#allocation5 + $0x114] sm:$0x1] }
0x114e   :  { %4133 = vrsqrt.f32 %v3101_v45 }
0x1158   :  { %v4134_v55 = vpop.eup %4133 }
0x1159   :  { %v3103_v7 = vmul.f32 %v4134_v55, %v3079_v19  ;;  %v3228_v55 = vld [vmem:[#allocation5 + $0x115] sm:$0x1] }
0x115b   :  { %v3104_v9 = vmul.f32 %v3103_v7, %v3097_v23  ;;  %v3109_v2 = vrot.slane %v3103_v7, %v4262_v21 }
0x115d   :  { %v3105_v25 = vsub.f32 %v3080_v1, %v3104_v9  ;;  %v3110_v51 = vmul.f32 %v3109_v2, %v3076_v57  ;;  %v3792_v2 = vld [vmem:[#allocation5 + $0x11e] ss:$0 sm:$0xff] }
0x115f   :  { %v3114_v56 = vrot.slane %v3105_v25, %v4262_v21 }
0x1161   :  { %v3115_v59 = vadd.f32 %v3114_v56, %v3110_v51  ;;  %v3338_v56 = vadd.f32 %v3792_v2, %v4977_v15 }
0x1163   :  { %v3116_v16 = vmax.f32 %v3115_v59, 0.0 }
0x1165   :  { %v3125_v5 = vrot.slane %v3116_v16, 7  ;;  %v3127_v8 = vrot.slane %v3116_v16, 5 }
0x1167   :  { %v3129_v3 = vsel %vm34_vm1, 0.0, %v3125_v5 }
0x1168   :  { %v3130_v42 = vsel %vm42_vm0, %v3129_v3, 0.0 }
0x1169   :  { %v3131_v49 = vsel %vm2302_vm12, %v3130_v42, %v3127_v8 }
0x116a   :  { %v3132_v37 = vsel %vm98_vm2, %v3131_v49, 0.0 }
0x116b   :  { %v3138_v43 = vrot.slane %v3132_v37, 2  ;;  %v3134_v6 = vrot.slane %v3132_v37, 1 }
0x116d   :  { %3139 = vrot.lane.b32.xlu1 %v3138_v43, %s4202_s3  ;;  %3135 = vrot.lane.b32.xlu0 %v3134_v6, %s4199_s30 }
0x11df   :  { %v3140_v26 = vpop.permute.xlu1 %3139  ;;  %v3136_v38 = vpop.permute.xlu0 %3135 }
0x11e0   :  { %v3142_v40 = vsel %vm2465_vm13, %v3132_v37, %v3136_v38 }
0x11e1   :  { %v3144_v44 = vsel %vm3143_vm4, %v3142_v40, %v3140_v26 }
0x11e2   :  { %3958 = vmatmul.mubr.msk.f32.vlgmr.msra.gmra.mrb[12].mxu1 %vm3149_vm5, %v3144_v44 }
0x11e3   :  { %3992 = vmatprep.mubr.msk.f32.mxu1 %vm4196_vm9, %v4197_v36  ;;  %4053 = vmatpush3.bf16.msra.mxu1 %v4052_v24 }
0x11e4   :  { %4054 = vmatprep.subr.bf16.mxu1 %v4194_v58 }
0x11e7   :  { %4056 = vmatpush3.bf16.msra.mxu1 %v4055_v31 }
0x11e8   :  { %4057 = vmatprep.subr.bf16.mxu1 %v4194_v58 }
0x11eb   :  { %4059 = vmatpush3.bf16.msra.mxu1 %v4058_v62 }
0x12b5   :  { %v3219_v10 = vpop.f32.mrb[12].mxu1 }
0x12b6   :  { %v3220_v41 = vadd.f32 %v3790_v34, %v3219_v10  ;;  %v3959_v46 = vpop.f32.mrb[13].mxu1  ;;  %v3794_v34 = vld [vmem:[#allocation5 + $0x14f] ss:$0 sm:$0xff] }
0x12b8   :  { %v3224_v53 = vrot.slane %v3220_v41, 2 }
0x12ba   :  { %v3226_v57 = vsel %vm2990_vm15, %v3220_v41, %v3224_v53 }
0x12bb   :  { %v3229_v50 = vsel %vm3081_vm3, %v3226_v57, 0.0  ;;  %v3236_v35 = vmul.f32 %v3226_v57, %v3226_v57 }
0x12bc   :  { %v3230_v30 = vrot.slane %v3229_v50, 4 }
0x12bd   :  { %v3237_v17 = vsel %vm3081_vm3, %v3236_v35, 0.0 }
0x12be   :  { %v3231_v48 = vadd.f32 %v3230_v30, %v3229_v50  ;;  %v3238_v47 = vrot.slane %v3237_v17, 4 }
0x12c0   :  { %v3232_v32 = vrot.slane %v3231_v48, 2  ;;  %v3239_v20 = vadd.f32 %v3238_v47, %v3237_v17 }
0x12c2   :  { %v3233_v63 = vadd.f32 %v3232_v32, %v3231_v48  ;;  %v3240_v61 = vrot.slane %v3239_v20, 2 }
0x12c4   :  { %v3234_v14 = vrot.slane %v3233_v63, 1  ;;  %v3241_v52 = vadd.f32 %v3240_v61, %v3239_v20 }
0x12c6   :  { %v3235_v39 = vadd.f32 %v3234_v14, %v3233_v63  ;;  %v3242_v4 = vrot.slane %v3241_v52, 1 }
0x12c8   :  { %v3243_v54 = vadd.f32 %v3242_v4, %v3241_v52  ;;  %v3244_v12 = vmul.f32 0.25, %v3235_v39 }
0x12ca   :  { %v3245_v0 = vmul.f32 0.25, %v3243_v54  ;;  %v3246_v23 = vmul.f32 %v3244_v12, %v3244_v12 }
0x12cc   :  { %v3247_v33 = vsub.f32 %v3245_v0, %v3246_v23 }
0x12ce   :  { %v3248_v18 = vadd.f32 1e-05, %v3247_v33  ;;  %v3451_v33 = vld [vmem:[#allocation5 + $0x150] sm:$0x1] }
0x12d0   :  { %4135 = vrsqrt.f32 %v3248_v18 }
0x12da   :  { %v4136_v45 = vpop.eup %4135 }
0x12db   :  { %v3250_v19 = vmul.f32 %v4136_v45, %v3227_v28  ;;  %v3452_v45 = vld [vmem:[#allocation5 + $0x151] sm:$0x1] }
0x12dd   :  { %v3251_v7 = vmul.f32 %v3250_v19, %v3244_v12  ;;  %v3256_v1 = vrot.slane %v3250_v19, %v4262_v21 }
0x12df   :  { %v3252_v9 = vsub.f32 %v3228_v55, %v3251_v7  ;;  %v3257_v25 = vmul.f32 %v3256_v1, %v3226_v57 }
0x12e1   :  { %v3261_v51 = vrot.slane %v3252_v9, %v4262_v21 }
0x12e3   :  { %v3262_v59 = vadd.f32 %v3261_v51, %v3257_v25 }
0x12e5   :  { %v3341_v16 = vadd.f32 %v3338_v56, %v3262_v59 }
0x12e7   :  { %v5002_v5 = vmax.f32 %v3341_v16, 0.0 }
0x12e9   :  { %v3351_v8 = vrot.slane %v5002_v5, 7  ;;  %v3353_v3 = vrot.slane %v5002_v5, 5 }
0x12eb   :  { %v3355_v42 = vsel %vm34_vm1, 0.0, %v3351_v8 }
0x12ec   :  { %v3356_v49 = vsel %vm42_vm0, %v3355_v42, 0.0 }
0x12ed   :  { %v3357_v37 = vsel %vm2302_vm12, %v3356_v49, %v3353_v3 }
0x12ee   :  { %v3358_v43 = vsel %vm98_vm2, %v3357_v37, 0.0 }
0x12ef   :  { %v3364_v6 = vrot.slane %v3358_v43, 2  ;;  %v3360_v26 = vrot.slane %v3358_v43, 1 }
0x12f1   :  { %3365 = vrot.lane.b32.xlu1 %v3364_v6, %s4202_s3  ;;  %3361 = vrot.lane.b32.xlu0 %v3360_v26, %s4199_s30 }
0x1363   :  { %v3366_v15 = vpop.permute.xlu1 %3365  ;;  %v3362_v38 = vpop.permute.xlu0 %3361 }
0x1364   :  { %v3368_v40 = vsel %vm2465_vm13, %v3358_v43, %v3362_v38  ;;  %v3657_v38 = vld [vmem:[#allocation5 + $0x18d] sm:$0xff] }
0x1365   :  { %v3369_v44 = vsel %vm3143_vm4, %v3368_v40, %v3366_v15  ;;  %v3656_v15 = vld [vmem:[#allocation5 + $0x185] sm:$0xff] }
0x1366   :  { %3978 = vmatmul.mubr.msk.f32.vlgmr.msra.gmra.mrb[18].mxu0 %vm3149_vm5, %v3369_v44  ;;  %v4061_v40 = vpack.c.bf16 %v3657_v38, %v3656_v15  ;;  %v3796_v44 = vld [vmem:[#allocation5 + $0x182] ss:$0 sm:$0xff] }
0x1367   :  { %3999 = vmatprep.mubr.msk.f32.mxu0 %vm4196_vm9, %v4197_v36 }
0x1368   :  { %4062 = vmatpush3.bf16.msra.mxu0 %v4061_v40 }
0x1439   :  { %v3443_v10 = vpop.f32.mrb[18].mxu0 }
0x143a   :  { %v3444_v41 = vadd.f32 %v3794_v34, %v3443_v10  ;;  %v3979_v36 = vpop.f32.mrb[19].mxu0 }
0x143c   :  { %v3448_v46 = vrot.slane %v3444_v41, 2 }
0x143e   :  { %v3450_v53 = vsel %vm2990_vm15, %v3444_v41, %v3448_v46 }
0x143f   :  { %v3453_v57 = vsel %vm3081_vm3, %v3450_v53, 0.0  ;;  %v3460_v50 = vmul.f32 %v3450_v53, %v3450_v53 }
0x1440   :  { %v3454_v35 = vrot.slane %v3453_v57, 4 }
0x1441   :  { %v3461_v30 = vsel %vm3081_vm3, %v3460_v50, 0.0 }
0x1442   :  { %v3455_v17 = vadd.f32 %v3454_v35, %v3453_v57  ;;  %v3462_v48 = vrot.slane %v3461_v30, 4 }
0x1444   :  { %v3456_v47 = vrot.slane %v3455_v17, 2  ;;  %v3463_v32 = vadd.f32 %v3462_v48, %v3461_v30 }
0x1446   :  { %v3457_v20 = vadd.f32 %v3456_v47, %v3455_v17  ;;  %v3464_v58 = vrot.slane %v3463_v32, 2 }
0x1448   :  { %v3458_v63 = vrot.slane %v3457_v20, 1  ;;  %v3465_v61 = vadd.f32 %v3464_v58, %v3463_v32 }
0x144a   :  { %v3459_v14 = vadd.f32 %v3458_v63, %v3457_v20  ;;  %v3466_v52 = vrot.slane %v3465_v61, 1  ;;  %v3596_v63 = vld [vmem:[#allocation5 + $0x183] sm:$0x1] }
0x144c   :  { %v3467_v39 = vadd.f32 %v3466_v52, %v3465_v61  ;;  %v3468_v4 = vmul.f32 0.25, %v3459_v14  ;;  %v3597_v52 = vld [vmem:[#allocation5 + $0x184] sm:$0x1] }
0x144e   :  { %v3469_v54 = vmul.f32 0.25, %v3467_v39  ;;  %v3470_v12 = vmul.f32 %v3468_v4, %v3468_v4 }
0x1450   :  { %v3471_v0 = vsub.f32 %v3469_v54, %v3470_v12 }
0x1452   :  { %v3472_v23 = vadd.f32 1e-05, %v3471_v0 }
0x1454   :  { %4137 = vrsqrt.f32 %v3472_v23 }
0x145e   :  { %v4138_v18 = vpop.eup %4137 }
0x145f   :  { %v3474_v28 = vmul.f32 %v4138_v18, %v3451_v33 }
0x1461   :  { %v3475_v19 = vmul.f32 %v3474_v28, %v3468_v4  ;;  %v3480_v55 = vrot.slane %v3474_v28, %v4262_v21 }
0x1463   :  { %v3476_v7 = vsub.f32 %v3452_v45, %v3475_v19  ;;  %v3481_v1 = vmul.f32 %v3480_v55, %v3450_v53 }
0x1465   :  { %v3485_v9 = vrot.slane %v3476_v7, %v4262_v21 }
0x1467   :  { %v3486_v2 = vadd.f32 %v3485_v9, %v3481_v1 }
0x1469   :  { %v3487_v25 = vmax.f32 %v3486_v2, 0.0 }
0x146b   :  { %v3496_v51 = vrot.slane %v3487_v25, 7  ;;  %v3498_v56 = vrot.slane %v3487_v25, 5 }
0x146d   :  { %v3500_v59 = vsel %vm34_vm1, 0.0, %v3496_v51 }
0x146e   :  { %v3501_v16 = vsel %vm42_vm0, %v3500_v59, 0.0  ;;  %vm3634_vm0 = vcmask 123904  }
0x146f   :  { %v3502_v8 = vsel %vm2302_vm12, %v3501_v16, %v3498_v56 }
0x1470   :  { %v3503_v3 = vsel %vm98_vm2, %v3502_v8, 0.0  ;;  %vm3736_vm2 = vcmask 33792  }
0x1471   :  { %v3509_v42 = vrot.slane %v3503_v3, 2  ;;  %v3505_v49 = vrot.slane %v3503_v3, 1 }
0x1473   :  { %3510 = vrot.lane.b32.xlu1 %v3509_v42, %s4202_s3  ;;  %3506 = vrot.lane.b32.xlu0 %v3505_v49, %s4199_s30  ;;  %v3798_v49 = vld [vmem:[#allocation5 + $0x195] ss:$0 sm:$0xff] }
0x14e5   :  { %v3511_v37 = vpop.permute.xlu1 %3510  ;;  %v3507_v43 = vpop.permute.xlu0 %3506 }
0x14e6   :  { %v3513_v6 = vsel %vm2465_vm13, %v3503_v3, %v3507_v43 }
0x14e7   :  { %v3514_v26 = vsel %vm3143_vm4, %v3513_v6, %v3511_v37 }
0x14e8   :  { %3993 = vmatmul.mubr.msk.f32.vlgmr.msra.gmra.mrb[14].mxu1 %vm3149_vm5, %v3514_v26 }
0x15bb   :  { %v3588_v29 = vpop.f32.mrb[14].mxu1 }
0x15bc   :  { %v3589_v13 = vadd.f32 %v3796_v44, %v3588_v29  ;;  %v3994_v22 = vpop.f32.mrb[15].mxu1 }
0x15be   :  { %v3593_v24 = vrot.slane %v3589_v13, 2 }
0x15c0   :  { %v3595_v11 = vsel %vm2990_vm15, %v3589_v13, %v3593_v24 }
0x15c1   :  { %v3598_v31 = vsel %vm3081_vm3, %v3595_v11, 0.0  ;;  %v3605_v27 = vmul.f32 %v3595_v11, %v3595_v11 }
0x15c2   :  { %v3599_v60 = vrot.slane %v3598_v31, 4 }
0x15c3   :  { %v3606_v62 = vsel %vm3081_vm3, %v3605_v27, 0.0 }
0x15c4   :  { %v3600_v34 = vadd.f32 %v3599_v60, %v3598_v31  ;;  %v3607_v10 = vrot.slane %v3606_v62, 4 }
0x15c6   :  { %v3601_v41 = vrot.slane %v3600_v34, 2  ;;  %v3608_v36 = vadd.f32 %v3607_v10, %v3606_v62 }
0x15c8   :  { %v3602_v46 = vadd.f32 %v3601_v41, %v3600_v34  ;;  %v3609_v53 = vrot.slane %v3608_v36, 2 }
0x15ca   :  { %v3603_v57 = vrot.slane %v3602_v46, 1  ;;  %v3610_v50 = vadd.f32 %v3609_v53, %v3608_v36 }
0x15cc   :  { %v3604_v35 = vadd.f32 %v3603_v57, %v3602_v46  ;;  %v3611_v30 = vrot.slane %v3610_v50, 1 }
0x15ce   :  { %v3612_v17 = vadd.f32 %v3611_v30, %v3610_v50  ;;  %v3613_v48 = vmul.f32 0.25, %v3604_v35 }
0x15d0   :  { %v3614_v47 = vmul.f32 0.25, %v3612_v17  ;;  %v3615_v32 = vmul.f32 %v3613_v48, %v3613_v48 }
0x15d2   :  { %v3616_v20 = vsub.f32 %v3614_v47, %v3615_v32 }
0x15d4   :  { %v3617_v58 = vadd.f32 1e-05, %v3616_v20 }
0x15d6   :  { %4139 = vrsqrt.f32 %v3617_v58 }
0x15e0   :  { %v4140_v61 = vpop.eup %4139 }
0x15e1   :  { %v3619_v14 = vmul.f32 %v4140_v61, %v3596_v63 }
0x15e3   :  { %v3620_v39 = vmul.f32 %v3619_v14, %v3613_v48  ;;  %v3625_v4 = vrot.slane %v3619_v14, %v4262_v21 }
0x15e5   :  { %v3621_v54 = vsub.f32 %v3597_v52, %v3620_v39  ;;  %v3626_v12 = vmul.f32 %v3625_v4, %v3595_v11 }
0x15e7   :  { %v3630_v0 = vrot.slane %v3621_v54, %v4262_v21 }
0x15e9   :  { %v3631_v23 = vadd.f32 %v3630_v0, %v3626_v12 }
0x15eb   :  { %v3632_v33 = vadd.f32 %v3631_v23, %v5002_v5 }
0x15ed   :  { %v3633_v18 = vmax.f32 %v3632_v33, 0.0 }
0x15ef   :  { %v3635_v28 = vsel %vm3634_vm0, %v3633_v18, 0.0  ;;  %v3645_v45 = vrot.slane %v3633_v18, 2 }
0x15f0   :  { %v3636_v19 = vrot.slane %v3635_v28, 4 }
0x15f1   :  { %v3647_v55 = vsel %vm3634_vm0, %v3645_v45, 0.0 }
0x15f2   :  { %v3637_v7 = vadd.f32 %v3636_v19, %v3635_v28  ;;  %v3648_v1 = vrot.slane %v3647_v55, 4 }
0x15f4   :  { %v3638_v9 = vrot.slane %v3637_v7, 2  ;;  %v3649_v2 = vadd.f32 %v3648_v1, %v3647_v55 }
0x15f6   :  { %v3639_v25 = vadd.f32 %v3638_v9, %v3637_v7  ;;  %v3650_v51 = vrot.slane %v3649_v2, 2 }
0x15f8   :  { %v3640_v56 = vrot.slane %v3639_v25, 1  ;;  %v3651_v59 = vadd.f32 %v3650_v51, %v3649_v2 }
0x15fa   :  { %v3641_v16 = vadd.f32 %v3640_v56, %v3639_v25  ;;  %v3652_v8 = vrot.slane %v3651_v59, 1 }
0x15fc   :  { %v3653_v21 = vadd.f32 %v3652_v8, %v3651_v59  ;;  %v3643_v3 = vmul.f32 0.5, %v3641_v16 }
0x15fe   :  { %v3654_v42 = vmul.f32 0.5, %v3653_v21 }
0x1600   :  { %v3655_v5 = vsel %vm34_vm1, %v3643_v3, %v3654_v42 }
0x1601   :  { %4000 = vmatmul.mubr.msk.f32.vlgmr.msra.gmra.mrb[20].mxu0 %vm2465_vm13, %v3655_v5 }
0x16d4   :  { %v3732_v37 = vpop.f32.mrb[20].mxu0 }
0x16d5   :  { %v3733_v43 = vadd.f32 %v3798_v49, %v3732_v37  ;;  %v4001_v6 = vpop.f32.mrb[21].mxu0 }
0x16d7   :  { %3737 = vst.msk [vmem:[#allocation8] sm:$0x3] %vm3736_vm2, %v3733_v43 }
0x16d8   :  { %4174 = shalt.err (!%p4171_p12)
}
0x16d9   :  { %s4175_s9 = scalar_lea.hbm %s5055_s2, 32 }
0x16da   :  { %p4176_p13 = scmp.ne.s32.totalorder %s5055_s2, %s4175_s9  ;;  %p4179_p0 = scmp.lt.u32.totalorder %s4175_s9, %s5055_s2 }
0x16dc   :  { %p4181_p1 = pnand %p4179_p0, %p4176_p13 }
0x16de   :  { %4184 = shalt.err (!%p4181_p1)
}
0x16df   :  { %3747 = dma.vmem_to_hbm [thread:$0]  %s3745_s5, 32, %s5055_s2, [#allocation7]  }
0x16e0   :  { %4187 = dma.done.wait [#allocation7], 32  }
0x16e1   :  { %4188 = vsyncadd [#allocation7], 4294967264 }
0x16e2   :  { %3751 = vsyncpa [#allocation6], 1 }
0x16e3   :  { %3752 = vsyncpa [#allocation7], 1 }

</bundles_post_ra>
